<compile_context>
chip_gen: v6e
topology: v6e:2x2x1
jax: 0.10.0
libtpu: 0.0.40
codegen_flags: <defaults>
</compile_context>

<pallas_src>
import functools

import jax
import jax.numpy as jnp
import numpy as np
from jax import lax
from jax.experimental import pallas as pl
from jax.experimental.pallas import tpu as pltpu


# ------------------------------ fused kernel ------------------------------- #

def _lenet_kernel(xs_ref, w1t_ref, b1t_ref, s1r_ref, s1c_ref,
                  w2t_ref, b2t_ref, s2r_ref, s2c_ref, tsel_ref,
                  wfc1_ref, bfc1_ref, wfc2_ref, bfc2_ref, wfc3_ref, bfc3_ref,
                  out_ref, p1_ref, *, n, k, h, h1p, s):
    f32 = jnp.float32
    dot = functools.partial(jnp.dot, preferred_element_type=f32)

    # ---- conv1 + bias + ReLU:  y1 (n*h, 28*6) ----
    # conv as sum over ky of (row-shifted input slab) @ Toeplitz(ky)
    nh = n * h
    y1 = dot(xs_ref[pl.ds(0, nh), :], w1t_ref[0]) + b1t_ref[...]
    for ky in range(1, k):
        y1 = y1 + dot(xs_ref[pl.ds(ky, nh), :], w1t_ref[ky])
    y1 = jnp.maximum(y1, 0.0)

    # ---- pool1 (2x2, stride 2) via one-hot gather matmuls ----
    # p1 (n*h1p + k-1, 14*6); the k-1 trailing rows are zero padding so the
    # conv2 row shifts below stay in bounds.
    u0 = dot(s1r_ref[0], y1)
    u1 = dot(s1r_ref[1], y1)
    p1_ref[...] = jnp.maximum(
        jnp.maximum(dot(u0, s1c_ref[0]), dot(u0, s1c_ref[1])),
        jnp.maximum(dot(u1, s1c_ref[0]), dot(u1, s1c_ref[1])))

    # ---- conv2 + bias + ReLU:  y2 (n*h1p, 10*16) ----
    nh1 = n * h1p
    y2 = dot(p1_ref[pl.ds(0, nh1), :], w2t_ref[0]) + b2t_ref[...]
    for ky in range(1, k):
        y2 = y2 + dot(p1_ref[pl.ds(ky, nh1), :], w2t_ref[ky])
    y2 = jnp.maximum(y2, 0.0)

    # ---- pool2 -> p2 (n*s, 5*16), rows = (batch, out_row) ----
    v0 = dot(s2r_ref[0], y2)
    v1 = dot(s2r_ref[1], y2)
    p2 = jnp.maximum(
        jnp.maximum(dot(v0, s2c_ref[0]), dot(v0, s2c_ref[1])),
        jnp.maximum(dot(v1, s2c_ref[0]), dot(v1, s2c_ref[1])))

    # ---- flatten (NCHW order folded into per-row fc1 weight blocks) + fc1 ----
    z = dot(dot(tsel_ref[0], p2), wfc1_ref[0]) + bfc1_ref[...]
    for hh in range(1, s):
        z = z + dot(dot(tsel_ref[hh], p2), wfc1_ref[hh])
    z = jnp.maximum(z, 0.0)

    # ---- fc2 + ReLU, fc3 ----
    z = jnp.maximum(dot(z, wfc2_ref[...]) + bfc2_ref[...], 0.0)
    out_ref[...] = (dot(z, wfc3_ref[...]) + bfc3_ref[...]).astype(out_ref.dtype)


# -------------------- host-side one-time parameter re-layout --------------- #

def _conv_toeplitz(w, w_in):
    # w: PyTorch (Cout, Cin, K, K) -> (K, w_in*Cin, (w_in-K+1)*Cout)
    # t[ky, wcol*Cin+ci, ow*Cout+co] = w[co, ci, ky, wcol-ow] if 0<=wcol-ow<K
    w = np.asarray(w, np.float32)
    cout, cin, kk, _ = w.shape
    w_out = w_in - kk + 1
    t = np.zeros((kk, w_in * cin, w_out * cout), np.float32)
    for ky in range(kk):
        for ow in range(w_out):
            for kx in range(kk):
                wc = ow + kx
                t[ky, wc * cin:(wc + 1) * cin, ow * cout:(ow + 1) * cout] = \
                    w[:, :, ky, kx].T
    return t


def _pool_row_select(n_img, h_in, h_out, pad_rows):
    # (2, n_img*h_out + pad_rows, n_img*h_in): [dy, b*h_out+ph, b*h_in+2ph+dy]=1
    sel = np.zeros((2, n_img * h_out + pad_rows, n_img * h_in), np.float32)
    for dy in range(2):
        for b in range(n_img):
            for ph in range(h_out):
                sel[dy, b * h_out + ph, b * h_in + 2 * ph + dy] = 1.0
    return sel


def _pool_col_select(w_in_pos, w_out_pos, c):
    # (2, w_in_pos*c, w_out_pos*c): [dx, (2pw+dx)*c + ch, pw*c + ch] = 1
    sel = np.zeros((2, w_in_pos * c, w_out_pos * c), np.float32)
    for dx in range(2):
        for pw in range(w_out_pos):
            for ch in range(c):
                sel[dx, (2 * pw + dx) * c + ch, pw * c + ch] = 1.0
    return sel


def _flatten_select(n_img, h_out):
    # (h_out, n_img, n_img*h_out): picks row (b, h) of the pooled slab.
    t = np.zeros((h_out, n_img, n_img * h_out), np.float32)
    for hh in range(h_out):
        for b in range(n_img):
            t[hh, b, b * h_out + hh] = 1.0
    return t


def prepare_lenet(params, batch, image_size=32, num_classes=10):
    """One-time re-layout of PyTorch-style params into kernel tables."""
    k, c0, c1, c2 = 5, 3, 6, 16
    h = image_size
    oh1 = h - k + 1            # 28
    h1p = oh1 // 2             # 14
    oh2 = h1p - k + 1          # 10
    s = oh2 // 2               # 5
    assert oh1 % 2 == 0 and oh2 % 2 == 0

    fc1_w = np.asarray(params['fc1_w'], np.float32)       # (120, c2*s*s)
    kp = {
        'w1t': jnp.asarray(_conv_toeplitz(params['conv1_w'], h)),
        'b1t': jnp.asarray(np.tile(np.asarray(params['conv1_b'], np.float32),
                                   oh1)[None, :]),
        's1r': jnp.asarray(_pool_row_select(batch, h, h1p, pad_rows=k - 1)),
        's1c': jnp.asarray(_pool_col_select(oh1, h1p, c1)),
        'w2t': jnp.asarray(_conv_toeplitz(params['conv2_w'], h1p)),
        'b2t': jnp.asarray(np.tile(np.asarray(params['conv2_b'], np.float32),
                                   oh2)[None, :]),
        's2r': jnp.asarray(_pool_row_select(batch, h1p, s, pad_rows=0)),
        's2c': jnp.asarray(_pool_col_select(oh2, s, c2)),
        'tsel': jnp.asarray(_flatten_select(batch, s)),
        # flatten is torch NCHW order: fc1_w[j, c*s*s + h*s + w] -> [h, w*c2+c, j]
        'wfc1': jnp.asarray(fc1_w.reshape(-1, c2, s, s).transpose(2, 3, 1, 0)
                            .reshape(s, s * c2, fc1_w.shape[0])),
        'bfc1': jnp.asarray(np.asarray(params['fc1_b'], np.float32)[None, :]),
        'wfc2': jnp.asarray(np.asarray(params['fc2_w'], np.float32).T),
        'bfc2': jnp.asarray(np.asarray(params['fc2_b'], np.float32)[None, :]),
        'wfc3': jnp.asarray(np.asarray(params['fc3_w'], np.float32).T),
        'bfc3': jnp.asarray(np.asarray(params['fc3_b'], np.float32)[None, :]),
    }
    meta = dict(n=batch, k=k, h=h, h1p=h1p, s=s, c0=c0, c1=c1, c2=c2,
                num_classes=num_classes)
    return kp, meta


# ------------------------------ forward wrapper ----------------------------- #

def lenet_forward(kp, meta, x_nchw):
    n, k, h, h1p, s = meta['n'], meta['k'], meta['h'], meta['h1p'], meta['s']
    c0, c1, num_classes = meta['c0'], meta['c1'], meta['num_classes']
    assert x_nchw.shape[0] == n

    # Boundary layout plumbing only: NCHW -> (batch*row, col*chan) slab,
    # padded with k-1 zero rows so the in-kernel ky row-shifts stay in bounds.
    xs = jnp.transpose(x_nchw, (0, 2, 3, 1)).reshape(n * h, h * c0)
    xs = jnp.pad(xs, ((0, k - 1), (0, 0)))

    kernel = functools.partial(_lenet_kernel, n=n, k=k, h=h, h1p=h1p, s=s)
    return pl.pallas_call(
        kernel,
        out_shape=jax.ShapeDtypeStruct((n, num_classes), jnp.float32),
        in_specs=[pl.BlockSpec(memory_space=pltpu.MemorySpace.VMEM)] * 16,
        out_specs=pl.BlockSpec(memory_space=pltpu.MemorySpace.VMEM),
        scratch_shapes=[pltpu.VMEM((n * h1p + k - 1, h1p * c1), jnp.float32)],
        # If batch grows: add a grid over batch rows with
        # dimension_semantics=("parallel",) to use both v7x TensorCores.
    )(xs, kp['w1t'], kp['b1t'], kp['s1r'], kp['s1c'],
      kp['w2t'], kp['b2t'], kp['s2r'], kp['s2c'], kp['tsel'],
      kp['wfc1'], kp['bfc1'], kp['wfc2'], kp['bfc2'], kp['wfc3'], kp['bfc3'])


# ----------------------------- pure-JAX reference --------------------------- #

def reference_forward(params, x_nchw):
    hi = lax.Precision.HIGHEST

    def conv(x, w, b):
        y = lax.conv_general_dilated(
            x, w, window_strides=(1, 1), padding='VALID',
            dimension_numbers=('NCHW', 'OIHW', 'NCHW'), precision=hi)
        return jax.nn.relu(y + b[None, :, None, None])

    def pool(x):
        return lax.reduce_window(x, -jnp.inf, lax.max,
                                 (1, 1, 2, 2), (1, 1, 2, 2), 'VALID')

    x = pool(conv(x_nchw, params['conv1_w'], params['conv1_b']))
    x = pool(conv(x, params['conv2_w'], params['conv2_b']))
    x = x.reshape(x.shape[0], -1)
    x = jax.nn.relu(jnp.dot(x, params['fc1_w'].T, precision=hi) + params['fc1_b'])
    x = jax.nn.relu(jnp.dot(x, params['fc2_w'].T, precision=hi) + params['fc2_b'])
    return jnp.dot(x, params['fc3_w'].T, precision=hi) + params['fc3_b']


# ----------------------------------- main ----------------------------------- #

if __name__ == "__main__":
    num_classes, image_size, batch = 10, 32, 2
    spatial = ((image_size - 4) // 2 - 4) // 2          # = 5
    fc1_in = 16 * spatial * spatial                      # = 400

    key = jax.random.PRNGKey(0)
    keys = jax.random.split(key, 11)

    def u(k_, shape, fan_in):
        bound = 1.0 / np.sqrt(fan_in)
        return jax.random.uniform(k_, shape, jnp.float32, -bound, bound)

    params = {
        'conv1_w': u(keys[0], (6, 3, 5, 5), 3 * 5 * 5),
        'conv1_b': u(keys[1], (6,),         3 * 5 * 5),
        'conv2_w': u(keys[2], (16, 6, 5, 5), 6 * 5 * 5),
        'conv2_b': u(keys[3], (16,),         6 * 5 * 5),
        'fc1_w':   u(keys[4], (120, fc1_in), fc1_in),
        'fc1_b':   u(keys[5], (120,),        fc1_in),
        'fc2_w':   u(keys[6], (84, 120),     120),
        'fc2_b':   u(keys[7], (84,),         120),
        'fc3_w':   u(keys[8], (num_classes, 84), 84),
        'fc3_b':   u(keys[9], (num_classes,),    84),
    }
    x = jax.random.normal(keys[10], (batch, 3, image_size, image_size),
                          jnp.float32)

    kp, meta = prepare_lenet(params, batch, image_size, num_classes)
    fwd = jax.jit(lambda xx: lenet_forward(kp, meta, xx))

    out = jax.block_until_ready(fwd(x))
    assert out.shape == (batch, num_classes), out.shape

    ref = jax.block_until_ready(reference_forward(params, x))
    # Tolerance accommodates possible bf16-pass rounding of MXU f32 matmuls;
    # any layout/index bug would show as an O(1) error and still be caught.
    np.testing.assert_allclose(np.asarray(out), np.asarray(ref),
                               rtol=2e-2, atol=2e-2)
    print("KERNEL_OK")
</pallas_src>

<mosaic_0001>
module attributes {stable_mosaic.version = 11 : i64} {
  func.func @_lenet_kernel(%arg0: memref<68x96xf32, #tpu.memory_space<vmem>>, %arg1: memref<5x96x168xf32, #tpu.memory_space<vmem>>, %arg2: memref<1x168xf32, #tpu.memory_space<vmem>>, %arg3: memref<2x32x64xf32, #tpu.memory_space<vmem>>, %arg4: memref<2x168x84xf32, #tpu.memory_space<vmem>>, %arg5: memref<5x84x160xf32, #tpu.memory_space<vmem>>, %arg6: memref<1x160xf32, #tpu.memory_space<vmem>>, %arg7: memref<2x10x28xf32, #tpu.memory_space<vmem>>, %arg8: memref<2x160x80xf32, #tpu.memory_space<vmem>>, %arg9: memref<5x2x10xf32, #tpu.memory_space<vmem>>, %arg10: memref<5x80x120xf32, #tpu.memory_space<vmem>>, %arg11: memref<1x120xf32, #tpu.memory_space<vmem>>, %arg12: memref<120x84xf32, #tpu.memory_space<vmem>>, %arg13: memref<1x84xf32, #tpu.memory_space<vmem>>, %arg14: memref<84x10xf32, #tpu.memory_space<vmem>>, %arg15: memref<1x10xf32, #tpu.memory_space<vmem>>, %arg16: memref<2x10xf32, #tpu.memory_space<vmem>>, %arg17: memref<32x84xf32, #tpu.memory_space<vmem>>) attributes {dimension_semantics = [], scalar_prefetch = 0 : i64, scratch_operands = 1 : i64, tpu.core_type = #tpu.core_type<tc>} {
    %c0 = arith.constant 0 : index
    %c0_0 = arith.constant 0 : index
    %0 = vector.load %arg0[%c0, %c0_0] : memref<68x96xf32, #tpu.memory_space<vmem>>, vector<64x96xf32>
    %c0_1 = arith.constant 0 : index
    %c0_2 = arith.constant 0 : index
    %c0_3 = arith.constant 0 : index
    %1 = vector.load %arg1[%c0_1, %c0_2, %c0_3] : memref<5x96x168xf32, #tpu.memory_space<vmem>>, vector<1x96x168xf32>
    %2 = vector.shape_cast %1 : vector<1x96x168xf32> to vector<96x168xf32>
    %cst = arith.constant dense<0.000000e+00> : vector<64x168xf32>
    %3 = tpu.matmul %0, %2, %cst {dimension_numbers = #tpu.dot_dimension_numbers<[1], [0], [0], [1], [0, 0, 1, 1], [], []>} : vector<64x96xf32>, vector<96x168xf32>, vector<64x168xf32> -> vector<64x168xf32>
    %c0_4 = arith.constant 0 : index
    %c0_5 = arith.constant 0 : index
    %4 = vector.load %arg2[%c0_4, %c0_5] : memref<1x168xf32, #tpu.memory_space<vmem>>, vector<1x168xf32>
    %5 = vector.broadcast %4 : vector<1x168xf32> to vector<64x168xf32>
    %6 = arith.addf %3, %5 : vector<64x168xf32>
    %c1 = arith.constant 1 : index
    %c0_6 = arith.constant 0 : index
    %7 = vector.load %arg0[%c1, %c0_6] : memref<68x96xf32, #tpu.memory_space<vmem>>, vector<64x96xf32>
    %c1_7 = arith.constant 1 : index
    %c0_8 = arith.constant 0 : index
    %c0_9 = arith.constant 0 : index
    %8 = vector.load %arg1[%c1_7, %c0_8, %c0_9] : memref<5x96x168xf32, #tpu.memory_space<vmem>>, vector<1x96x168xf32>
    %9 = vector.shape_cast %8 : vector<1x96x168xf32> to vector<96x168xf32>
    %cst_10 = arith.constant dense<0.000000e+00> : vector<64x168xf32>
    %10 = tpu.matmul %7, %9, %cst_10 {dimension_numbers = #tpu.dot_dimension_numbers<[1], [0], [0], [1], [0, 0, 1, 1], [], []>} : vector<64x96xf32>, vector<96x168xf32>, vector<64x168xf32> -> vector<64x168xf32>
    %11 = arith.addf %6, %10 : vector<64x168xf32>
    %c2 = arith.constant 2 : index
    %c0_11 = arith.constant 0 : index
    %12 = vector.load %arg0[%c2, %c0_11] : memref<68x96xf32, #tpu.memory_space<vmem>>, vector<64x96xf32>
    %c2_12 = arith.constant 2 : index
    %c0_13 = arith.constant 0 : index
    %c0_14 = arith.constant 0 : index
    %13 = vector.load %arg1[%c2_12, %c0_13, %c0_14] : memref<5x96x168xf32, #tpu.memory_space<vmem>>, vector<1x96x168xf32>
    %14 = vector.shape_cast %13 : vector<1x96x168xf32> to vector<96x168xf32>
    %cst_15 = arith.constant dense<0.000000e+00> : vector<64x168xf32>
    %15 = tpu.matmul %12, %14, %cst_15 {dimension_numbers = #tpu.dot_dimension_numbers<[1], [0], [0], [1], [0, 0, 1, 1], [], []>} : vector<64x96xf32>, vector<96x168xf32>, vector<64x168xf32> -> vector<64x168xf32>
    %16 = arith.addf %11, %15 : vector<64x168xf32>
    %c3 = arith.constant 3 : index
    %c0_16 = arith.constant 0 : index
    %17 = vector.load %arg0[%c3, %c0_16] : memref<68x96xf32, #tpu.memory_space<vmem>>, vector<64x96xf32>
    %c3_17 = arith.constant 3 : index
    %c0_18 = arith.constant 0 : index
    %c0_19 = arith.constant 0 : index
    %18 = vector.load %arg1[%c3_17, %c0_18, %c0_19] : memref<5x96x168xf32, #tpu.memory_space<vmem>>, vector<1x96x168xf32>
    %19 = vector.shape_cast %18 : vector<1x96x168xf32> to vector<96x168xf32>
    %cst_20 = arith.constant dense<0.000000e+00> : vector<64x168xf32>
    %20 = tpu.matmul %17, %19, %cst_20 {dimension_numbers = #tpu.dot_dimension_numbers<[1], [0], [0], [1], [0, 0, 1, 1], [], []>} : vector<64x96xf32>, vector<96x168xf32>, vector<64x168xf32> -> vector<64x168xf32>
    %21 = arith.addf %16, %20 : vector<64x168xf32>
    %c4 = arith.constant 4 : index
    %c0_21 = arith.constant 0 : index
    %22 = vector.load %arg0[%c4, %c0_21] : memref<68x96xf32, #tpu.memory_space<vmem>>, vector<64x96xf32>
    %c4_22 = arith.constant 4 : index
    %c0_23 = arith.constant 0 : index
    %c0_24 = arith.constant 0 : index
    %23 = vector.load %arg1[%c4_22, %c0_23, %c0_24] : memref<5x96x168xf32, #tpu.memory_space<vmem>>, vector<1x96x168xf32>
    %24 = vector.shape_cast %23 : vector<1x96x168xf32> to vector<96x168xf32>
    %cst_25 = arith.constant dense<0.000000e+00> : vector<64x168xf32>
    %25 = tpu.matmul %22, %24, %cst_25 {dimension_numbers = #tpu.dot_dimension_numbers<[1], [0], [0], [1], [0, 0, 1, 1], [], []>} : vector<64x96xf32>, vector<96x168xf32>, vector<64x168xf32> -> vector<64x168xf32>
    %26 = arith.addf %21, %25 : vector<64x168xf32>
    %cst_26 = arith.constant 0.000000e+00 : f32
    %27 = vector.broadcast %cst_26 : f32 to vector<64x168xf32>
    %28 = arith.maximumf %26, %27 : vector<64x168xf32>
    %c0_27 = arith.constant 0 : index
    %c0_28 = arith.constant 0 : index
    %c0_29 = arith.constant 0 : index
    %29 = vector.load %arg3[%c0_27, %c0_28, %c0_29] : memref<2x32x64xf32, #tpu.memory_space<vmem>>, vector<1x32x64xf32>
    %30 = vector.shape_cast %29 : vector<1x32x64xf32> to vector<32x64xf32>
    %cst_30 = arith.constant dense<0.000000e+00> : vector<32x168xf32>
    %31 = tpu.matmul %30, %28, %cst_30 {dimension_numbers = #tpu.dot_dimension_numbers<[1], [0], [0], [1], [0, 0, 1, 1], [], []>} : vector<32x64xf32>, vector<64x168xf32>, vector<32x168xf32> -> vector<32x168xf32>
    %c1_31 = arith.constant 1 : index
    %c0_32 = arith.constant 0 : index
    %c0_33 = arith.constant 0 : index
    %32 = vector.load %arg3[%c1_31, %c0_32, %c0_33] : memref<2x32x64xf32, #tpu.memory_space<vmem>>, vector<1x32x64xf32>
    %33 = vector.shape_cast %32 : vector<1x32x64xf32> to vector<32x64xf32>
    %cst_34 = arith.constant dense<0.000000e+00> : vector<32x168xf32>
    %34 = tpu.matmul %33, %28, %cst_34 {dimension_numbers = #tpu.dot_dimension_numbers<[1], [0], [0], [1], [0, 0, 1, 1], [], []>} : vector<32x64xf32>, vector<64x168xf32>, vector<32x168xf32> -> vector<32x168xf32>
    %c0_35 = arith.constant 0 : index
    %c0_36 = arith.constant 0 : index
    %c0_37 = arith.constant 0 : index
    %35 = vector.load %arg4[%c0_35, %c0_36, %c0_37] : memref<2x168x84xf32, #tpu.memory_space<vmem>>, vector<1x168x84xf32>
    %36 = vector.shape_cast %35 : vector<1x168x84xf32> to vector<168x84xf32>
    %cst_38 = arith.constant dense<0.000000e+00> : vector<32x84xf32>
    %37 = tpu.matmul %31, %36, %cst_38 {dimension_numbers = #tpu.dot_dimension_numbers<[1], [0], [0], [1], [0, 0, 1, 1], [], []>} : vector<32x168xf32>, vector<168x84xf32>, vector<32x84xf32> -> vector<32x84xf32>
    %c1_39 = arith.constant 1 : index
    %c0_40 = arith.constant 0 : index
    %c0_41 = arith.constant 0 : index
    %38 = vector.load %arg4[%c1_39, %c0_40, %c0_41] : memref<2x168x84xf32, #tpu.memory_space<vmem>>, vector<1x168x84xf32>
    %39 = vector.shape_cast %38 : vector<1x168x84xf32> to vector<168x84xf32>
    %cst_42 = arith.constant dense<0.000000e+00> : vector<32x84xf32>
    %40 = tpu.matmul %31, %39, %cst_42 {dimension_numbers = #tpu.dot_dimension_numbers<[1], [0], [0], [1], [0, 0, 1, 1], [], []>} : vector<32x168xf32>, vector<168x84xf32>, vector<32x84xf32> -> vector<32x84xf32>
    %41 = arith.maximumf %37, %40 : vector<32x84xf32>
    %c0_43 = arith.constant 0 : index
    %c0_44 = arith.constant 0 : index
    %c0_45 = arith.constant 0 : index
    %42 = vector.load %arg4[%c0_43, %c0_44, %c0_45] : memref<2x168x84xf32, #tpu.memory_space<vmem>>, vector<1x168x84xf32>
    %43 = vector.shape_cast %42 : vector<1x168x84xf32> to vector<168x84xf32>
    %cst_46 = arith.constant dense<0.000000e+00> : vector<32x84xf32>
    %44 = tpu.matmul %34, %43, %cst_46 {dimension_numbers = #tpu.dot_dimension_numbers<[1], [0], [0], [1], [0, 0, 1, 1], [], []>} : vector<32x168xf32>, vector<168x84xf32>, vector<32x84xf32> -> vector<32x84xf32>
    %c1_47 = arith.constant 1 : index
    %c0_48 = arith.constant 0 : index
    %c0_49 = arith.constant 0 : index
    %45 = vector.load %arg4[%c1_47, %c0_48, %c0_49] : memref<2x168x84xf32, #tpu.memory_space<vmem>>, vector<1x168x84xf32>
    %46 = vector.shape_cast %45 : vector<1x168x84xf32> to vector<168x84xf32>
    %cst_50 = arith.constant dense<0.000000e+00> : vector<32x84xf32>
    %47 = tpu.matmul %34, %46, %cst_50 {dimension_numbers = #tpu.dot_dimension_numbers<[1], [0], [0], [1], [0, 0, 1, 1], [], []>} : vector<32x168xf32>, vector<168x84xf32>, vector<32x84xf32> -> vector<32x84xf32>
    %48 = arith.maximumf %44, %47 : vector<32x84xf32>
    %49 = arith.maximumf %41, %48 : vector<32x84xf32>
    %c0_51 = arith.constant 0 : index
    %c0_52 = arith.constant 0 : index
    %50 = vector.load %arg17[%c0_51, %c0_52] : memref<32x84xf32, #tpu.memory_space<vmem>>, vector<32x84xf32>
    tpu.vector_store %arg17[%c0_51, %c0_52], %49 {strides = array<i32>} : memref<32x84xf32, #tpu.memory_space<vmem>>, vector<32x84xf32>,
    %c0_53 = arith.constant 0 : index
    %c0_54 = arith.constant 0 : index
    %51 = vector.load %arg17[%c0_53, %c0_54] : memref<32x84xf32, #tpu.memory_space<vmem>>, vector<28x84xf32>
    %c0_55 = arith.constant 0 : index
    %c0_56 = arith.constant 0 : index
    %c0_57 = arith.constant 0 : index
    %52 = vector.load %arg5[%c0_55, %c0_56, %c0_57] : memref<5x84x160xf32, #tpu.memory_space<vmem>>, vector<1x84x160xf32>
    %53 = vector.shape_cast %52 : vector<1x84x160xf32> to vector<84x160xf32>
    %cst_58 = arith.constant dense<0.000000e+00> : vector<28x160xf32>
    %54 = tpu.matmul %51, %53, %cst_58 {dimension_numbers = #tpu.dot_dimension_numbers<[1], [0], [0], [1], [0, 0, 1, 1], [], []>} : vector<28x84xf32>, vector<84x160xf32>, vector<28x160xf32> -> vector<28x160xf32>
    %c0_59 = arith.constant 0 : index
    %c0_60 = arith.constant 0 : index
    %55 = vector.load %arg6[%c0_59, %c0_60] : memref<1x160xf32, #tpu.memory_space<vmem>>, vector<1x160xf32>
    %56 = vector.broadcast %55 : vector<1x160xf32> to vector<28x160xf32>
    %57 = arith.addf %54, %56 : vector<28x160xf32>
    %c1_61 = arith.constant 1 : index
    %c0_62 = arith.constant 0 : index
    %58 = vector.load %arg17[%c1_61, %c0_62] : memref<32x84xf32, #tpu.memory_space<vmem>>, vector<28x84xf32>
    %c1_63 = arith.constant 1 : index
    %c0_64 = arith.constant 0 : index
    %c0_65 = arith.constant 0 : index
    %59 = vector.load %arg5[%c1_63, %c0_64, %c0_65] : memref<5x84x160xf32, #tpu.memory_space<vmem>>, vector<1x84x160xf32>
    %60 = vector.shape_cast %59 : vector<1x84x160xf32> to vector<84x160xf32>
    %cst_66 = arith.constant dense<0.000000e+00> : vector<28x160xf32>
    %61 = tpu.matmul %58, %60, %cst_66 {dimension_numbers = #tpu.dot_dimension_numbers<[1], [0], [0], [1], [0, 0, 1, 1], [], []>} : vector<28x84xf32>, vector<84x160xf32>, vector<28x160xf32> -> vector<28x160xf32>
    %62 = arith.addf %57, %61 : vector<28x160xf32>
    %c2_67 = arith.constant 2 : index
    %c0_68 = arith.constant 0 : index
    %63 = vector.load %arg17[%c2_67, %c0_68] : memref<32x84xf32, #tpu.memory_space<vmem>>, vector<28x84xf32>
    %c2_69 = arith.constant 2 : index
    %c0_70 = arith.constant 0 : index
    %c0_71 = arith.constant 0 : index
    %64 = vector.load %arg5[%c2_69, %c0_70, %c0_71] : memref<5x84x160xf32, #tpu.memory_space<vmem>>, vector<1x84x160xf32>
    %65 = vector.shape_cast %64 : vector<1x84x160xf32> to vector<84x160xf32>
    %cst_72 = arith.constant dense<0.000000e+00> : vector<28x160xf32>
    %66 = tpu.matmul %63, %65, %cst_72 {dimension_numbers = #tpu.dot_dimension_numbers<[1], [0], [0], [1], [0, 0, 1, 1], [], []>} : vector<28x84xf32>, vector<84x160xf32>, vector<28x160xf32> -> vector<28x160xf32>
    %67 = arith.addf %62, %66 : vector<28x160xf32>
    %c3_73 = arith.constant 3 : index
    %c0_74 = arith.constant 0 : index
    %68 = vector.load %arg17[%c3_73, %c0_74] : memref<32x84xf32, #tpu.memory_space<vmem>>, vector<28x84xf32>
    %c3_75 = arith.constant 3 : index
    %c0_76 = arith.constant 0 : index
    %c0_77 = arith.constant 0 : index
    %69 = vector.load %arg5[%c3_75, %c0_76, %c0_77] : memref<5x84x160xf32, #tpu.memory_space<vmem>>, vector<1x84x160xf32>
    %70 = vector.shape_cast %69 : vector<1x84x160xf32> to vector<84x160xf32>
    %cst_78 = arith.constant dense<0.000000e+00> : vector<28x160xf32>
    %71 = tpu.matmul %68, %70, %cst_78 {dimension_numbers = #tpu.dot_dimension_numbers<[1], [0], [0], [1], [0, 0, 1, 1], [], []>} : vector<28x84xf32>, vector<84x160xf32>, vector<28x160xf32> -> vector<28x160xf32>
    %72 = arith.addf %67, %71 : vector<28x160xf32>
    %c4_79 = arith.constant 4 : index
    %c0_80 = arith.constant 0 : index
    %73 = vector.load %arg17[%c4_79, %c0_80] : memref<32x84xf32, #tpu.memory_space<vmem>>, vector<28x84xf32>
    %c4_81 = arith.constant 4 : index
    %c0_82 = arith.constant 0 : index
    %c0_83 = arith.constant 0 : index
    %74 = vector.load %arg5[%c4_81, %c0_82, %c0_83] : memref<5x84x160xf32, #tpu.memory_space<vmem>>, vector<1x84x160xf32>
    %75 = vector.shape_cast %74 : vector<1x84x160xf32> to vector<84x160xf32>
    %cst_84 = arith.constant dense<0.000000e+00> : vector<28x160xf32>
    %76 = tpu.matmul %73, %75, %cst_84 {dimension_numbers = #tpu.dot_dimension_numbers<[1], [0], [0], [1], [0, 0, 1, 1], [], []>} : vector<28x84xf32>, vector<84x160xf32>, vector<28x160xf32> -> vector<28x160xf32>
    %77 = arith.addf %72, %76 : vector<28x160xf32>
    %cst_85 = arith.constant 0.000000e+00 : f32
    %78 = vector.broadcast %cst_85 : f32 to vector<28x160xf32>
    %79 = arith.maximumf %77, %78 : vector<28x160xf32>
    %c0_86 = arith.constant 0 : index
    %c0_87 = arith.constant 0 : index
    %c0_88 = arith.constant 0 : index
    %80 = vector.load %arg7[%c0_86, %c0_87, %c0_88] : memref<2x10x28xf32, #tpu.memory_space<vmem>>, vector<1x10x28xf32>
    %81 = vector.shape_cast %80 : vector<1x10x28xf32> to vector<10x28xf32>
    %cst_89 = arith.constant dense<0.000000e+00> : vector<10x160xf32>
    %82 = tpu.matmul %81, %79, %cst_89 {dimension_numbers = #tpu.dot_dimension_numbers<[1], [0], [0], [1], [0, 0, 1, 1], [], []>} : vector<10x28xf32>, vector<28x160xf32>, vector<10x160xf32> -> vector<10x160xf32>
    %c1_90 = arith.constant 1 : index
    %c0_91 = arith.constant 0 : index
    %c0_92 = arith.constant 0 : index
    %83 = vector.load %arg7[%c1_90, %c0_91, %c0_92] : memref<2x10x28xf32, #tpu.memory_space<vmem>>, vector<1x10x28xf32>
    %84 = vector.shape_cast %83 : vector<1x10x28xf32> to vector<10x28xf32>
    %cst_93 = arith.constant dense<0.000000e+00> : vector<10x160xf32>
    %85 = tpu.matmul %84, %79, %cst_93 {dimension_numbers = #tpu.dot_dimension_numbers<[1], [0], [0], [1], [0, 0, 1, 1], [], []>} : vector<10x28xf32>, vector<28x160xf32>, vector<10x160xf32> -> vector<10x160xf32>
    %c0_94 = arith.constant 0 : index
    %c0_95 = arith.constant 0 : index
    %c0_96 = arith.constant 0 : index
    %86 = vector.load %arg8[%c0_94, %c0_95, %c0_96] : memref<2x160x80xf32, #tpu.memory_space<vmem>>, vector<1x160x80xf32>
    %87 = vector.shape_cast %86 : vector<1x160x80xf32> to vector<160x80xf32>
    %cst_97 = arith.constant dense<0.000000e+00> : vector<10x80xf32>
    %88 = tpu.matmul %82, %87, %cst_97 {dimension_numbers = #tpu.dot_dimension_numbers<[1], [0], [0], [1], [0, 0, 1, 1], [], []>} : vector<10x160xf32>, vector<160x80xf32>, vector<10x80xf32> -> vector<10x80xf32>
    %c1_98 = arith.constant 1 : index
    %c0_99 = arith.constant 0 : index
    %c0_100 = arith.constant 0 : index
    %89 = vector.load %arg8[%c1_98, %c0_99, %c0_100] : memref<2x160x80xf32, #tpu.memory_space<vmem>>, vector<1x160x80xf32>
    %90 = vector.shape_cast %89 : vector<1x160x80xf32> to vector<160x80xf32>
    %cst_101 = arith.constant dense<0.000000e+00> : vector<10x80xf32>
    %91 = tpu.matmul %82, %90, %cst_101 {dimension_numbers = #tpu.dot_dimension_numbers<[1], [0], [0], [1], [0, 0, 1, 1], [], []>} : vector<10x160xf32>, vector<160x80xf32>, vector<10x80xf32> -> vector<10x80xf32>
    %92 = arith.maximumf %88, %91 : vector<10x80xf32>
    %c0_102 = arith.constant 0 : index
    %c0_103 = arith.constant 0 : index
    %c0_104 = arith.constant 0 : index
    %93 = vector.load %arg8[%c0_102, %c0_103, %c0_104] : memref<2x160x80xf32, #tpu.memory_space<vmem>>, vector<1x160x80xf32>
    %94 = vector.shape_cast %93 : vector<1x160x80xf32> to vector<160x80xf32>
    %cst_105 = arith.constant dense<0.000000e+00> : vector<10x80xf32>
    %95 = tpu.matmul %85, %94, %cst_105 {dimension_numbers = #tpu.dot_dimension_numbers<[1], [0], [0], [1], [0, 0, 1, 1], [], []>} : vector<10x160xf32>, vector<160x80xf32>, vector<10x80xf32> -> vector<10x80xf32>
    %c1_106 = arith.constant 1 : index
    %c0_107 = arith.constant 0 : index
    %c0_108 = arith.constant 0 : index
    %96 = vector.load %arg8[%c1_106, %c0_107, %c0_108] : memref<2x160x80xf32, #tpu.memory_space<vmem>>, vector<1x160x80xf32>
    %97 = vector.shape_cast %96 : vector<1x160x80xf32> to vector<160x80xf32>
    %cst_109 = arith.constant dense<0.000000e+00> : vector<10x80xf32>
    %98 = tpu.matmul %85, %97, %cst_109 {dimension_numbers = #tpu.dot_dimension_numbers<[1], [0], [0], [1], [0, 0, 1, 1], [], []>} : vector<10x160xf32>, vector<160x80xf32>, vector<10x80xf32> -> vector<10x80xf32>
    %99 = arith.maximumf %95, %98 : vector<10x80xf32>
    %100 = arith.maximumf %92, %99 : vector<10x80xf32>
    %c0_110 = arith.constant 0 : index
    %c0_111 = arith.constant 0 : index
    %c0_112 = arith.constant 0 : index
    %101 = vector.load %arg9[%c0_110, %c0_111, %c0_112] : memref<5x2x10xf32, #tpu.memory_space<vmem>>, vector<1x2x10xf32>
    %102 = vector.shape_cast %101 : vector<1x2x10xf32> to vector<2x10xf32>
    %cst_113 = arith.constant dense<0.000000e+00> : vector<2x80xf32>
    %103 = tpu.matmul %102, %100, %cst_113 {dimension_numbers = #tpu.dot_dimension_numbers<[1], [0], [0], [1], [0, 0, 1, 1], [], []>} : vector<2x10xf32>, vector<10x80xf32>, vector<2x80xf32> -> vector<2x80xf32>
    %c0_114 = arith.constant 0 : index
    %c0_115 = arith.constant 0 : index
    %c0_116 = arith.constant 0 : index
    %104 = vector.load %arg10[%c0_114, %c0_115, %c0_116] : memref<5x80x120xf32, #tpu.memory_space<vmem>>, vector<1x80x120xf32>
    %105 = vector.shape_cast %104 : vector<1x80x120xf32> to vector<80x120xf32>
    %cst_117 = arith.constant dense<0.000000e+00> : vector<2x120xf32>
    %106 = tpu.matmul %103, %105, %cst_117 {dimension_numbers = #tpu.dot_dimension_numbers<[1], [0], [0], [1], [0, 0, 1, 1], [], []>} : vector<2x80xf32>, vector<80x120xf32>, vector<2x120xf32> -> vector<2x120xf32>
    %c0_118 = arith.constant 0 : index
    %c0_119 = arith.constant 0 : index
    %107 = vector.load %arg11[%c0_118, %c0_119] : memref<1x120xf32, #tpu.memory_space<vmem>>, vector<1x120xf32>
    %108 = vector.broadcast %107 : vector<1x120xf32> to vector<2x120xf32>
    %109 = arith.addf %106, %108 : vector<2x120xf32>
    %c1_120 = arith.constant 1 : index
    %c0_121 = arith.constant 0 : index
    %c0_122 = arith.constant 0 : index
    %110 = vector.load %arg9[%c1_120, %c0_121, %c0_122] : memref<5x2x10xf32, #tpu.memory_space<vmem>>, vector<1x2x10xf32>
    %111 = vector.shape_cast %110 : vector<1x2x10xf32> to vector<2x10xf32>
    %cst_123 = arith.constant dense<0.000000e+00> : vector<2x80xf32>
    %112 = tpu.matmul %111, %100, %cst_123 {dimension_numbers = #tpu.dot_dimension_numbers<[1], [0], [0], [1], [0, 0, 1, 1], [], []>} : vector<2x10xf32>, vector<10x80xf32>, vector<2x80xf32> -> vector<2x80xf32>
    %c1_124 = arith.constant 1 : index
    %c0_125 = arith.constant 0 : index
    %c0_126 = arith.constant 0 : index
    %113 = vector.load %arg10[%c1_124, %c0_125, %c0_126] : memref<5x80x120xf32, #tpu.memory_space<vmem>>, vector<1x80x120xf32>
    %114 = vector.shape_cast %113 : vector<1x80x120xf32> to vector<80x120xf32>
    %cst_127 = arith.constant dense<0.000000e+00> : vector<2x120xf32>
    %115 = tpu.matmul %112, %114, %cst_127 {dimension_numbers = #tpu.dot_dimension_numbers<[1], [0], [0], [1], [0, 0, 1, 1], [], []>} : vector<2x80xf32>, vector<80x120xf32>, vector<2x120xf32> -> vector<2x120xf32>
    %116 = arith.addf %109, %115 : vector<2x120xf32>
    %c2_128 = arith.constant 2 : index
    %c0_129 = arith.constant 0 : index
    %c0_130 = arith.constant 0 : index
    %117 = vector.load %arg9[%c2_128, %c0_129, %c0_130] : memref<5x2x10xf32, #tpu.memory_space<vmem>>, vector<1x2x10xf32>
    %118 = vector.shape_cast %117 : vector<1x2x10xf32> to vector<2x10xf32>
    %cst_131 = arith.constant dense<0.000000e+00> : vector<2x80xf32>
    %119 = tpu.matmul %118, %100, %cst_131 {dimension_numbers = #tpu.dot_dimension_numbers<[1], [0], [0], [1], [0, 0, 1, 1], [], []>} : vector<2x10xf32>, vector<10x80xf32>, vector<2x80xf32> -> vector<2x80xf32>
    %c2_132 = arith.constant 2 : index
    %c0_133 = arith.constant 0 : index
    %c0_134 = arith.constant 0 : index
    %120 = vector.load %arg10[%c2_132, %c0_133, %c0_134] : memref<5x80x120xf32, #tpu.memory_space<vmem>>, vector<1x80x120xf32>
    %121 = vector.shape_cast %120 : vector<1x80x120xf32> to vector<80x120xf32>
    %cst_135 = arith.constant dense<0.000000e+00> : vector<2x120xf32>
    %122 = tpu.matmul %119, %121, %cst_135 {dimension_numbers = #tpu.dot_dimension_numbers<[1], [0], [0], [1], [0, 0, 1, 1], [], []>} : vector<2x80xf32>, vector<80x120xf32>, vector<2x120xf32> -> vector<2x120xf32>
    %123 = arith.addf %116, %122 : vector<2x120xf32>
    %c3_136 = arith.constant 3 : index
    %c0_137 = arith.constant 0 : index
    %c0_138 = arith.constant 0 : index
    %124 = vector.load %arg9[%c3_136, %c0_137, %c0_138] : memref<5x2x10xf32, #tpu.memory_space<vmem>>, vector<1x2x10xf32>
    %125 = vector.shape_cast %124 : vector<1x2x10xf32> to vector<2x10xf32>
    %cst_139 = arith.constant dense<0.000000e+00> : vector<2x80xf32>
    %126 = tpu.matmul %125, %100, %cst_139 {dimension_numbers = #tpu.dot_dimension_numbers<[1], [0], [0], [1], [0, 0, 1, 1], [], []>} : vector<2x10xf32>, vector<10x80xf32>, vector<2x80xf32> -> vector<2x80xf32>
    %c3_140 = arith.constant 3 : index
    %c0_141 = arith.constant 0 : index
    %c0_142 = arith.constant 0 : index
    %127 = vector.load %arg10[%c3_140, %c0_141, %c0_142] : memref<5x80x120xf32, #tpu.memory_space<vmem>>, vector<1x80x120xf32>
    %128 = vector.shape_cast %127 : vector<1x80x120xf32> to vector<80x120xf32>
    %cst_143 = arith.constant dense<0.000000e+00> : vector<2x120xf32>
    %129 = tpu.matmul %126, %128, %cst_143 {dimension_numbers = #tpu.dot_dimension_numbers<[1], [0], [0], [1], [0, 0, 1, 1], [], []>} : vector<2x80xf32>, vector<80x120xf32>, vector<2x120xf32> -> vector<2x120xf32>
    %130 = arith.addf %123, %129 : vector<2x120xf32>
    %c4_144 = arith.constant 4 : index
    %c0_145 = arith.constant 0 : index
    %c0_146 = arith.constant 0 : index
    %131 = vector.load %arg9[%c4_144, %c0_145, %c0_146] : memref<5x2x10xf32, #tpu.memory_space<vmem>>, vector<1x2x10xf32>
    %132 = vector.shape_cast %131 : vector<1x2x10xf32> to vector<2x10xf32>
    %cst_147 = arith.constant dense<0.000000e+00> : vector<2x80xf32>
    %133 = tpu.matmul %132, %100, %cst_147 {dimension_numbers = #tpu.dot_dimension_numbers<[1], [0], [0], [1], [0, 0, 1, 1], [], []>} : vector<2x10xf32>, vector<10x80xf32>, vector<2x80xf32> -> vector<2x80xf32>
    %c4_148 = arith.constant 4 : index
    %c0_149 = arith.constant 0 : index
    %c0_150 = arith.constant 0 : index
    %134 = vector.load %arg10[%c4_148, %c0_149, %c0_150] : memref<5x80x120xf32, #tpu.memory_space<vmem>>, vector<1x80x120xf32>
    %135 = vector.shape_cast %134 : vector<1x80x120xf32> to vector<80x120xf32>
    %cst_151 = arith.constant dense<0.000000e+00> : vector<2x120xf32>
    %136 = tpu.matmul %133, %135, %cst_151 {dimension_numbers = #tpu.dot_dimension_numbers<[1], [0], [0], [1], [0, 0, 1, 1], [], []>} : vector<2x80xf32>, vector<80x120xf32>, vector<2x120xf32> -> vector<2x120xf32>
    %137 = arith.addf %130, %136 : vector<2x120xf32>
    %cst_152 = arith.constant 0.000000e+00 : f32
    %138 = vector.broadcast %cst_152 : f32 to vector<2x120xf32>
    %139 = arith.maximumf %137, %138 : vector<2x120xf32>
    %c0_153 = arith.constant 0 : index
    %c0_154 = arith.constant 0 : index
    %140 = vector.load %arg12[%c0_153, %c0_154] : memref<120x84xf32, #tpu.memory_space<vmem>>, vector<120x84xf32>
    %cst_155 = arith.constant dense<0.000000e+00> : vector<2x84xf32>
    %141 = tpu.matmul %139, %140, %cst_155 {dimension_numbers = #tpu.dot_dimension_numbers<[1], [0], [0], [1], [0, 0, 1, 1], [], []>} : vector<2x120xf32>, vector<120x84xf32>, vector<2x84xf32> -> vector<2x84xf32>
    %c0_156 = arith.constant 0 : index
    %c0_157 = arith.constant 0 : index
    %142 = vector.load %arg13[%c0_156, %c0_157] : memref<1x84xf32, #tpu.memory_space<vmem>>, vector<1x84xf32>
    %143 = vector.broadcast %142 : vector<1x84xf32> to vector<2x84xf32>
    %144 = arith.addf %141, %143 : vector<2x84xf32>
    %cst_158 = arith.constant 0.000000e+00 : f32
    %145 = vector.broadcast %cst_158 : f32 to vector<2x84xf32>
    %146 = arith.maximumf %144, %145 : vector<2x84xf32>
    %c0_159 = arith.constant 0 : index
    %c0_160 = arith.constant 0 : index
    %147 = vector.load %arg14[%c0_159, %c0_160] : memref<84x10xf32, #tpu.memory_space<vmem>>, vector<84x10xf32>
    %cst_161 = arith.constant dense<0.000000e+00> : vector<2x10xf32>
    %148 = tpu.matmul %146, %147, %cst_161 {dimension_numbers = #tpu.dot_dimension_numbers<[1], [0], [0], [1], [0, 0, 1, 1], [], []>} : vector<2x84xf32>, vector<84x10xf32>, vector<2x10xf32> -> vector<2x10xf32>
    %c0_162 = arith.constant 0 : index
    %c0_163 = arith.constant 0 : index
    %149 = vector.load %arg15[%c0_162, %c0_163] : memref<1x10xf32, #tpu.memory_space<vmem>>, vector<1x10xf32>
    %150 = vector.broadcast %149 : vector<1x10xf32> to vector<2x10xf32>
    %151 = arith.addf %148, %150 : vector<2x10xf32>
    %c0_164 = arith.constant 0 : index
    %c0_165 = arith.constant 0 : index
    %152 = vector.load %arg16[%c0_164, %c0_165] : memref<2x10xf32, #tpu.memory_space<vmem>>, vector<2x10xf32>
    tpu.vector_store %arg16[%c0_164, %c0_165], %151 {strides = array<i32>} : memref<2x10xf32, #tpu.memory_space<vmem>>, vector<2x10xf32>,
    return
  }
}

</mosaic_0001>

<bundles_post_ra>
// kernel: _lambda_.1
= control target key start
LH: loop header
LB: loop body
LE: loop exit
PB: predicated region body
PF: predicated region fallthrough
CT: control target
= control target key end

     0   :  { %s6503_s0 = inlined_call_operand.vmem [shape: f32[68,96], index: 0, kind: input, shape index: {}]   ;;  %s6504_s1 = inlined_call_operand.vmem [shape: f32[5,96,168], index: 1, kind: input, shape index: {}]   ;;  %s6505_s2 = inlined_call_operand.hbm [shape: f32[1,168], index: 2, kind: input, shape index: {}]   ;;  %s6506_s3 = inlined_call_operand.hbm [shape: f32[2,32,64], index: 3, kind: input, shape index: {}]   ;;  %s6507_s4 = inlined_call_operand.hbm [shape: f32[2,168,84], index: 4, kind: input, shape index: {}]   ;;  %s6508_s5 = inlined_call_operand.hbm [shape: f32[5,84,160], index: 5, kind: input, shape index: {}]   ;;  %s6509_s6 = inlined_call_operand.vmem [shape: f32[1,160], index: 6, kind: input, shape index: {}]   ;;  %s6510_s7 = inlined_call_operand.hbm [shape: f32[2,10,28], index: 7, kind: input, shape index: {}]   ;;  %s6511_s8 = inlined_call_operand.hbm [shape: f32[2,160,80], index: 8, kind: input, shape index: {}]   ;;  %s6512_s9 = inlined_call_operand.vmem [shape: f32[5,2,10], index: 9, kind: input, shape index: {}]   ;;  %s6513_s10 = inlined_call_operand.hbm [shape: f32[5,80,120], index: 10, kind: input, shape index: {}]   ;;  %s6514_s11 = inlined_call_operand.vmem [shape: f32[1,120], index: 11, kind: input, shape index: {}]   ;;  %s6515_s12 = inlined_call_operand.hbm [shape: f32[120,84], index: 12, kind: input, shape index: {}]   ;;  %s6516_s13 = inlined_call_operand.vmem [shape: f32[1,84], index: 13, kind: input, shape index: {}]   ;;  %s6517_s14 = inlined_call_operand.hbm [shape: f32[84,10], index: 14, kind: input, shape index: {}]   ;;  %s6518_s15 = inlined_call_operand.vmem [shape: f32[1,10], index: 15, kind: input, shape index: {}]   ;;  %s6519_s16 = inlined_call_operand.hbm [shape: f32[2,10], index: 16, kind: output, shape index: {}]  }
   0x1   :  { %6546 = sst [smem:[#allocation60_spill]] %s6503_s0 }
   0x2   :  { %21 = vsyncpa [#allocation4], 0 }
   0x3   :  { %22 = vsyncpa [#allocation7], 0 }
   0x4   :  { %23 = vsyncpa [#allocation10], 0 }
   0x5   :  { %24 = vsyncpa [#allocation13], 0 }
   0x6   :  { %25 = vsyncpa [#allocation16], 0 }
   0x7   :  { %26 = vsyncpa [#allocation5], 0  ;;  %s4801_s21 = smov [#allocation6]  }
   0x8   :  { %s46_s22 = sshll.u32 %s4801_s21, 4  ;;  %s47_s22 = int_to_ptr.vmem [resolvable:$true] %s46_s22 }
   0x9   :  { %s4597_s23 = scalar_lea.vmem %s47_s22, 1024  ;;  %p4602_p1 = scmp.lt.s32.totalorder %s47_s22, %s47_s22 }
   0xa   :  { %p4598_p0 = scmp.ne.s32.totalorder %s47_s22, %s4597_s23  ;;  %p4603_p2 = scmp.lt.s32.totalorder %s4597_s23, %s4597_s23 }
   0xc   :  { %p4604_p3 = por %p4603_p2, %p4602_p1 }
   0xe   :  { %p4605_p4 = pnand %p4604_p3, %p4598_p0 }
  0x10   :  { %4608 = shalt.err (!%p4605_p4)
}
  0x11   :  { %s4802_s24 = smov 128   ;;  %s4803_s25 = smov 8  }
  0x12   :  { %52 = dma.hbm_to_vmem [thread:$0]  %s6506_s3, 1024, %s47_s22, [#allocation7], %s4802_s24, %s4802_s24, %s4803_s25  }
  0x13   :  { %s4804_s28 = smov [#allocation9]  }
  0x14   :  { %s70_s29 = sshll.u32 %s4804_s28, 4  ;;  %s71_s29 = int_to_ptr.vmem [resolvable:$true] %s70_s29 }
  0x15   :  { %s4617_s30 = scalar_lea.vmem %s71_s29, 14080  ;;  %p4622_p6 = scmp.lt.s32.totalorder %s71_s29, %s71_s29 }
  0x16   :  { %p4618_p5 = scmp.ne.s32.totalorder %s71_s29, %s4617_s30  ;;  %p4623_p7 = scmp.lt.s32.totalorder %s4617_s30, %s4617_s30 }
  0x18   :  { %p4624_p8 = por %p4623_p7, %p4622_p6 }
  0x1a   :  { %p4625_p9 = pnand %p4624_p8, %p4618_p5 }
  0x1c   :  { %4628 = shalt.err (!%p4625_p9)
}
  0x1d   :  { %s4805_s0 = smov 256   ;;  %s4806_s17 = smov 16  }
  0x1e   :  { %76 = dma.hbm_to_vmem [thread:$0]  %s6508_s5, 14080, %s71_s29, [#allocation10], %s4805_s0, %s4805_s0, %s4806_s17  }
  0x1f   :  { %s4807_s20 = smov [#allocation12]   ;;  %s4808_s23 = smov [#allocation15]  }
  0x20   :  { %s96_s21 = sshll.u32 %s4807_s20, 4  ;;  %s124_s3 = sshll.u32 %s4808_s23, 4  ;;  %s97_s21 = int_to_ptr.vmem [resolvable:$true] %s96_s21  ;;  %s125_s3 = int_to_ptr.vmem [resolvable:$true] %s124_s3 }
  0x21   :  { %s4637_s22 = scalar_lea.vmem %s97_s21, 5120  ;;  %p4642_p11 = scmp.lt.s32.totalorder %s97_s21, %s97_s21 }
  0x22   :  { %p4638_p10 = scmp.ne.s32.totalorder %s97_s21, %s4637_s22  ;;  %p4643_p12 = scmp.lt.s32.totalorder %s4637_s22, %s4637_s22 }
  0x24   :  { %p4644_p13 = por %p4643_p12, %p4642_p11 }
  0x26   :  { %p4645_p0 = pnand %p4644_p13, %p4638_p10 }
  0x28   :  { %4648 = shalt.err (!%p4645_p0)
}
  0x29   :  { %102 = dma.hbm_to_vmem [thread:$0]  %s6511_s8, 5120, %s97_s21, [#allocation13], %s4802_s24, %s4802_s24, %s4803_s25  }
  0x2a   :  { %s4657_s5 = scalar_lea.vmem %s125_s3, 1920  ;;  %p4662_p2 = scmp.lt.s32.totalorder %s125_s3, %s125_s3 }
  0x2b   :  { %p4658_p1 = scmp.ne.s32.totalorder %s125_s3, %s4657_s5  ;;  %p4663_p3 = scmp.lt.s32.totalorder %s4657_s5, %s4657_s5 }
  0x2d   :  { %p4664_p4 = por %p4663_p3, %p4662_p2 }
  0x2f   :  { %p4665_p5 = pnand %p4664_p4, %p4658_p1 }
  0x31   :  { %4668 = shalt.err (!%p4665_p5)
}
  0x32   :  { %130 = dma.hbm_to_vmem [thread:$0]  %s6515_s12, 1920, %s125_s3, [#allocation16], %s4802_s24, %s4802_s24, %s4803_s25  }
  0x33   :  { %s4809_s30 = smov [#allocation3]   ;;  %s4810_s17 = smov [#allocation8]  }
  0x34   :  { %s37_s0 = sshll.u32 %s4809_s30, 4  ;;  %s58_s18 = sshll.u32 %s4810_s17, 4  ;;  %s38_s0 = int_to_ptr.vmem [resolvable:$true] %s37_s0  ;;  %s59_s18 = int_to_ptr.vmem [resolvable:$true] %s58_s18 }
  0x35   :  { %s4677_s8 = scalar_lea.vmem %s38_s0, 32  ;;  %p4682_p7 = scmp.lt.s32.totalorder %s38_s0, %s38_s0 }
  0x36   :  { %p4678_p6 = scmp.ne.s32.totalorder %s38_s0, %s4677_s8  ;;  %p4683_p8 = scmp.lt.s32.totalorder %s4677_s8, %s4677_s8 }
  0x38   :  { %p4684_p9 = por %p4683_p8, %p4682_p7 }
  0x3a   :  { %p4685_p10 = pnand %p4684_p9, %p4678_p6 }
  0x3c   :  { %4688 = shalt.err (!%p4685_p10)
}
  0x3d   :  { %40 = dma.hbm_to_vmem [thread:$0]  %s6505_s2, 32, %s38_s0, [#allocation4]  }
  0x3e   :  { %s4697_s21 = scalar_lea.vmem %s59_s18, 5376  ;;  %p4702_p12 = scmp.lt.s32.totalorder %s59_s18, %s59_s18 }
  0x3f   :  { %p4698_p11 = scmp.ne.s32.totalorder %s59_s18, %s4697_s21  ;;  %p4703_p13 = scmp.lt.s32.totalorder %s4697_s21, %s4697_s21 }
  0x41   :  { %p4704_p0 = por %p4703_p13, %p4702_p12 }
  0x43   :  { %p4705_p1 = pnand %p4704_p0, %p4698_p11 }
  0x45   :  { %4708 = shalt.err (!%p4705_p1)
}
  0x46   :  { %64 = dma.hbm_to_vmem [thread:$0]  %s6507_s4, 5376, %s59_s18, [#allocation7], %s4802_s24, %s4802_s24, %s4803_s25  }
  0x47   :  { %s4811_s3 = smov [#allocation11]   ;;  %s4812_s26 = smov [#allocation14]  }
  0x48   :  { %s84_s22 = sshll.u32 %s4811_s3, 4  ;;  %s110_s27 = sshll.u32 %s4812_s26, 4  ;;  %s85_s22 = int_to_ptr.vmem [resolvable:$true] %s84_s22  ;;  %s111_s27 = int_to_ptr.vmem [resolvable:$true] %s110_s27 }
  0x49   :  { %s4717_s2 = scalar_lea.vmem %s85_s22, 512  ;;  %p4722_p3 = scmp.lt.s32.totalorder %s85_s22, %s85_s22 }
  0x4a   :  { %p4718_p2 = scmp.ne.s32.totalorder %s85_s22, %s4717_s2  ;;  %p4723_p4 = scmp.lt.s32.totalorder %s4717_s2, %s4717_s2 }
  0x4c   :  { %p4724_p5 = por %p4723_p4, %p4722_p3 }
  0x4e   :  { %p4725_p6 = pnand %p4724_p5, %p4718_p2 }
  0x50   :  { %4728 = shalt.err (!%p4725_p6)
}
  0x51   :  { %90 = dma.hbm_to_vmem [thread:$0]  %s6510_s7, 512, %s85_s22, [#allocation10], %s4802_s24, %s4802_s24, %s4803_s25  }
  0x52   :  { %s4737_s4 = scalar_lea.vmem %s111_s27, 6400  ;;  %p4742_p8 = scmp.lt.s32.totalorder %s111_s27, %s111_s27 }
  0x53   :  { %p4738_p7 = scmp.ne.s32.totalorder %s111_s27, %s4737_s4  ;;  %p4743_p9 = scmp.lt.s32.totalorder %s4737_s4, %s4737_s4 }
  0x55   :  { %p4744_p10 = por %p4743_p9, %p4742_p8 }
  0x57   :  { %p4745_p11 = pnand %p4744_p10, %p4738_p7 }
  0x59   :  { %4748 = shalt.err (!%p4745_p11)
}
  0x5a   :  { %116 = dma.hbm_to_vmem [thread:$0]  %s6513_s10, 6400, %s111_s27, [#allocation13], %s4802_s24, %s4802_s24, %s4803_s25  }
  0x5b   :  { %s4813_s0 = smov [#allocation17]  }
  0x5c   :  { %s138_s17 = sshll.u32 %s4813_s0, 4  ;;  %s139_s17 = int_to_ptr.vmem [resolvable:$true] %s138_s17 }
  0x5d   :  { %s4757_s18 = scalar_lea.vmem %s139_s17, 1408  ;;  %p4762_p13 = scmp.lt.s32.totalorder %s139_s17, %s139_s17 }
  0x5e   :  { %p4758_p12 = scmp.ne.s32.totalorder %s139_s17, %s4757_s18  ;;  %p4763_p0 = scmp.lt.s32.totalorder %s4757_s18, %s4757_s18 }
  0x60   :  { %p4764_p1 = por %p4763_p0, %p4762_p13 }
  0x62   :  { %p4765_p2 = pnand %p4764_p1, %p4758_p12 }
  0x64   :  { %4768 = shalt.err (!%p4765_p2)
}
  0x65   :  { %144 = dma.hbm_to_vmem [thread:$0]  %s6517_s14, 1408, %s139_s17, [#allocation16], %s4802_s24, %s4802_s24, %s4803_s25  }
  0x66   :  { %4789 = dma.done.wait [#allocation4], 32  }
  0x67   :  { %4790 = vsyncadd [#allocation4], 4294967264 }
  0x68   :  { %4791 = dma.done.wait [#allocation7], 6400  }
  0x69   :  { %4792 = vsyncadd [#allocation7], 4294960896 }
  0x6a   :  { %4793 = dma.done.wait [#allocation10], 14592  }
  0x6b   :  { %4794 = vsyncadd [#allocation10], 4294952704 }
  0x6c   :  { %4795 = dma.done.wait [#allocation13], 11520  }
  0x6d   :  { %4796 = vsyncadd [#allocation13], 4294955776 }
  0x6e   :  { %4797 = dma.done.wait [#allocation16], 3328  }
  0x6f   :  { %4798 = vsyncadd [#allocation16], 4294963968  ;;  %v6536_v0 = vmov 0.0   ;;  %v205_v1 = vld [vmem:[%s6504_s1 + $0xb8] sm:$0xff]  ;;  %v204_v2 = vld [vmem:[%s6504_s1 + $0xb0] sm:$0xff]  ;;  %s6547_s10 = sld [smem:[#allocation60_spill]] }
  0x70   :  { %307 = vmatprep.mubr.f32.mxu0 %v6536_v0  ;;  %477 = vmatprep.mubr.f32.mxu1 %v6536_v0  ;;  %v203_v3 = vld [vmem:[%s6504_s1 + $0xa8] sm:$0xff]  ;;  %v4067_v4 = vld [vmem:[%s6504_s1 + $0x178] sm:$0xff]  ;;  %v202_v5 = vld [vmem:[%s6504_s1 + $0xa0] sm:$0xff]  ;;  %vm218_vm0 = vcmask 785408   ;;  %vm1120_vm1 = vcmask 523264   ;;  %vm1349_vm2 = vcmask 326656  }
  0x71   :  { %251 = vmatprep.subr.mxu0 %v205_v1  ;;  %v4066_v6 = vld [vmem:[%s6504_s1 + $0x170] sm:$0xff]  ;;  %421 = vmatprep.subr.mxu1 %v4067_v4  ;;  %v201_v7 = vld [vmem:[%s6504_s1 + $0x98] sm:$0xff]  ;;  %v4065_v8 = vld [vmem:[%s6504_s1 + $0x168] sm:$0xff]  ;;  %vm1803_vm3 = vcmask 1043456   ;;  %vm1748_vm4 = vcmask 687104   ;;  %vm2477_vm5 = vcmask 228352  }
  0x72   :  { %252 = vmatpush1.msra.mxu0 %v204_v2  ;;  %422 = vmatpush1.msra.mxu1 %v4066_v6  ;;  %v200_v9 = vld [vmem:[%s6504_s1 + $0x90] sm:$0xff]  ;;  %v4064_v10 = vld [vmem:[%s6504_s1 + $0x160] sm:$0xff]  ;;  %v4063_v11 = vld [vmem:[%s6504_s1 + $0x158] sm:$0xff]  ;;  %vm2673_vm6 = vcmask 261120   ;;  %vm4815_vm7 = vmmov 0   ;;  %vm3018_vm8 = vcmask 1041408  }
  0x73   :  { %253 = vmatprep.subr.mxu0 %v203_v3  ;;  %423 = vmatprep.subr.mxu1 %v4065_v8  ;;  %v199_v12 = vld [vmem:[%s6504_s1 + $0x88] sm:$0xff]  ;;  %v4062_v13 = vld [vmem:[%s6504_s1 + $0x150] sm:$0xff]  ;;  %v198_v14 = vld [vmem:[%s6504_s1 + $0x80] sm:$0xff]  ;;  %vm3014_vm9 = vcmask 80896   ;;  %vm3109_vm10 = vcmask 654336   ;;  %vm3846_vm11 = vcmask 982016  }
  0x74   :  { %254 = vmatpush1.msra.mxu0 %v202_v5  ;;  %424 = vmatpush1.msra.mxu1 %v4064_v10  ;;  %v4061_v15 = vld [vmem:[%s6504_s1 + $0x148] sm:$0xff]  ;;  %v197_v16 = vld [vmem:[%s6504_s1 + $0x78] sm:$0xff]  ;;  %v4060_v17 = vld [vmem:[%s6504_s1 + $0x140] sm:$0xff]  ;;  %s4816_s12 = smov [#allocation18]   ;;  %vm4015_vm12 = vcmask 74752  }
  0x75   :  { %255 = vmatprep.subr.mxu0 %v201_v7  ;;  %425 = vmatprep.subr.mxu1 %v4063_v11  ;;  %v196_v18 = vld [vmem:[%s6504_s1 + $0x70] sm:$0xff]  ;;  %v4059_v19 = vld [vmem:[%s6504_s1 + $0x138] sm:$0xff]  ;;  %v195_v20 = vld [vmem:[%s6504_s1 + $0x68] sm:$0xff]  ;;  %s4023_s23 = sshll.u32 %s4816_s12, 4  ;;  %s4024_s23 = int_to_ptr.vmem [resolvable:$true] %s4023_s23 }
  0x76   :  { %256 = vmatpush1.msra.mxu0 %v200_v9  ;;  %426 = vmatpush1.msra.mxu1 %v4062_v13  ;;  %v4058_v21 = vld [vmem:[%s6504_s1 + $0x130] sm:$0xff]  ;;  %v194_v22 = vld [vmem:[%s6504_s1 + $0x60] sm:$0xff]  ;;  %v4057_v23 = vld [vmem:[%s6504_s1 + $0x128] sm:$0xff]  ;;  %s4769_s3 = scalar_lea.vmem %s4024_s23, 32  ;;  %p4774_p4 = scmp.lt.s32.totalorder %s4024_s23, %s4024_s23 }
  0x77   :  { %257 = vmatprep.subr.mxu0 %v199_v12  ;;  %427 = vmatprep.subr.mxu1 %v4061_v15  ;;  %v193_v24 = vld [vmem:[%s6504_s1 + $0x58] sm:$0xff]  ;;  %v4056_v25 = vld [vmem:[%s6504_s1 + $0x120] sm:$0xff]  ;;  %v192_v26 = vld [vmem:[%s6504_s1 + $0x50] sm:$0xff]  ;;  %p4770_p3 = scmp.ne.s32.totalorder %s4024_s23, %s4769_s3  ;;  %p4775_p5 = scmp.lt.s32.totalorder %s4769_s3, %s4769_s3 }
  0x78   :  { %258 = vmatpush1.msra.mxu0 %v198_v14  ;;  %428 = vmatpush1.msra.mxu1 %v4060_v17  ;;  %v4055_v27 = vld [vmem:[%s6504_s1 + $0x118] sm:$0xff]  ;;  %v191_v28 = vld [vmem:[%s6504_s1 + $0x48] sm:$0xff]  ;;  %v4054_v29 = vld [vmem:[%s6504_s1 + $0x110] sm:$0xff] }
  0x79   :  { %259 = vmatprep.subr.mxu0 %v197_v16  ;;  %429 = vmatprep.subr.mxu1 %v4059_v19  ;;  %v190_v30 = vld [vmem:[%s6504_s1 + $0x40] sm:$0xff]  ;;  %v4053_v31 = vld [vmem:[%s6504_s1 + $0x108] sm:$0xff]  ;;  %v189_v32 = vld [vmem:[%s6504_s1 + $0x38] sm:$0xff]  ;;  %p4776_p6 = por %p4775_p5, %p4774_p4 }
  0x7a   :  { %260 = vmatpush1.msra.mxu0 %v196_v18  ;;  %430 = vmatpush1.msra.mxu1 %v4058_v21  ;;  %v4052_v33 = vld [vmem:[%s6504_s1 + $0x100] sm:$0xff]  ;;  %v188_v34 = vld [vmem:[%s6504_s1 + $0x30] sm:$0xff]  ;;  %v4051_v35 = vld [vmem:[%s6504_s1 + $0xf8] sm:$0xff] }
  0x7b   :  { %261 = vmatprep.subr.mxu0 %v195_v20  ;;  %431 = vmatprep.subr.mxu1 %v4057_v23  ;;  %v187_v36 = vld [vmem:[%s6504_s1 + $0x28] sm:$0xff]  ;;  %v4050_v37 = vld [vmem:[%s6504_s1 + $0xf0] sm:$0xff]  ;;  %v186_v38 = vld [vmem:[%s6504_s1 + $0x20] sm:$0xff]  ;;  %p4777_p7 = pnand %p4776_p6, %p4770_p3 }
  0x7c   :  { %262 = vmatpush1.msra.mxu0 %v194_v22  ;;  %432 = vmatpush1.msra.mxu1 %v4056_v25  ;;  %v4049_v39 = vld [vmem:[%s6504_s1 + $0xe8] sm:$0xff]  ;;  %v185_v40 = vld [vmem:[%s6504_s1 + $0x18] sm:$0xff]  ;;  %v4048_v41 = vld [vmem:[%s6504_s1 + $0xe0] sm:$0xff] }
  0x7d   :  { %263 = vmatprep.subr.mxu0 %v193_v24  ;;  %433 = vmatprep.subr.mxu1 %v4055_v27  ;;  %v184_v42 = vld [vmem:[%s6504_s1 + $0x10] sm:$0xff]  ;;  %v4047_v43 = vld [vmem:[%s6504_s1 + $0xd8] sm:$0xff]  ;;  %v183_v44 = vld [vmem:[%s6504_s1 + $0x8] sm:$0xff] }
  0x7e   :  { %264 = vmatpush1.msra.mxu0 %v192_v26  ;;  %434 = vmatpush1.msra.mxu1 %v4054_v29  ;;  %v4046_v45 = vld [vmem:[%s6504_s1 + $0xd0] sm:$0xff]  ;;  %v182_v46 = vld [vmem:[%s6504_s1] sm:$0xff]  ;;  %v4045_v47 = vld [vmem:[%s6504_s1 + $0xc8] sm:$0xff] }
  0x7f   :  { %265 = vmatprep.subr.mxu0 %v191_v28  ;;  %435 = vmatprep.subr.mxu1 %v4053_v31  ;;  %v174_v48 = vld [vmem:[%s6547_s10] sm:$0xff]  ;;  %v4099_v51 = vld [vmem:[%s6504_s1 + $0x238] sm:$0xff]  ;;  %v4098_v52 = vld [vmem:[%s6504_s1 + $0x230] sm:$0xff] }
  0x80   :  { %266 = vmatpush1.msra.mxu0 %v190_v30  ;;  %436 = vmatpush1.msra.mxu1 %v4052_v33  ;;  %v4044_v49 = vld [vmem:[%s6504_s1 + $0xc0] sm:$0xff]  ;;  %v4131_v53 = vld [vmem:[%s6504_s1 + $0x2f8] sm:$0xff]  ;;  %v175_v54 = vld [vmem:[%s6547_s10 + $0x8] sm:$0xff] }
  0x81   :  { %267 = vmatprep.subr.mxu0 %v189_v32  ;;  %437 = vmatprep.subr.mxu1 %v4051_v35  ;;  %v356_v50 = vld [vmem:[%s6547_s10 + $0x1] sm:$0xff]  ;;  %v357_v56 = vld [vmem:[%s6547_s10 + $0x9] sm:$0xff]  ;;  %v4095_v59 = vld [vmem:[%s6504_s1 + $0x218] sm:$0xff] }
  0x82   :  { %268 = vmatpush1.msra.mxu0 %v188_v34  ;;  %438 = vmatpush1.msra.mxu1 %v4050_v37  ;;  %v4097_v55 = vld [vmem:[%s6504_s1 + $0x228] sm:$0xff]  ;;  %v4096_v57 = vld [vmem:[%s6504_s1 + $0x220] sm:$0xff]  ;;  %v4130_v58 = vld [vmem:[%s6504_s1 + $0x2f0] sm:$0xff] }
  0x83   :  { %269 = vmatprep.subr.mxu0 %v187_v36  ;;  %439 = vmatprep.subr.mxu1 %v4049_v39  ;;  %v176_v60 = vld [vmem:[%s6547_s10 + $0x10] sm:$0xff]  ;;  %v4129_v61 = vld [vmem:[%s6504_s1 + $0x2e8] sm:$0xff]  ;;  %v4128_v1 = vld [vmem:[%s6504_s1 + $0x2e0] sm:$0xff] }
  0x84   :  { %270 = vmatpush1.msra.mxu0 %v186_v38  ;;  %440 = vmatpush1.msra.mxu1 %v4048_v41  ;;  %v358_v62 = vld [vmem:[%s6547_s10 + $0x11] sm:$0xff]  ;;  %v4093_v2 = vld [vmem:[%s6504_s1 + $0x208] sm:$0xff]  ;;  %v359_v5 = vld [vmem:[%s6547_s10 + $0x19] sm:$0xff] }
  0x85   :  { %271 = vmatprep.subr.mxu0 %v185_v40  ;;  %441 = vmatprep.subr.mxu1 %v4047_v43  ;;  %v4094_v63 = vld [vmem:[%s6504_s1 + $0x210] sm:$0xff]  ;;  %v177_v3 = vld [vmem:[%s6547_s10 + $0x18] sm:$0xff]  ;;  %v4092_v6 = vld [vmem:[%s6504_s1 + $0x200] sm:$0xff] }
  0x86   :  { %272 = vmatpush1.msra.mxu0 %v184_v42  ;;  %442 = vmatpush1.msra.mxu1 %v4046_v45  ;;  %v4127_v4 = vld [vmem:[%s6504_s1 + $0x2d8] sm:$0xff]  ;;  %v4126_v7 = vld [vmem:[%s6504_s1 + $0x2d0] sm:$0xff]  ;;  %v4125_v9 = vld [vmem:[%s6504_s1 + $0x2c8] sm:$0xff] }
  0x87   :  { %273 = vmatprep.subr.mxu0 %v183_v44  ;;  %443 = vmatprep.subr.mxu1 %v4045_v47  ;;  %v4091_v8 = vld [vmem:[%s6504_s1 + $0x1f8] sm:$0xff]  ;;  %v178_v10 = vld [vmem:[%s6547_s10 + $0x20] sm:$0xff]  ;;  %v4090_v11 = vld [vmem:[%s6504_s1 + $0x1f0] sm:$0xff] }
  0x88   :  { %274 = vmatpush1.msra.mxu0 %v182_v46  ;;  %444 = vmatpush1.msra.mxu1 %v4044_v49  ;;  %v4124_v12 = vld [vmem:[%s6504_s1 + $0x2c0] sm:$0xff]  ;;  %v4089_v14 = vld [vmem:[%s6504_s1 + $0x1e8] sm:$0xff]  ;;  %v4123_v15 = vld [vmem:[%s6504_s1 + $0x2b8] sm:$0xff] }
  0x89   :  { %4036 = vmatmul.mubr.msk.f32.vlgmr.msra.gmra.mxu0 %vm218_vm0, %v174_v48  ;;  %4068 = vmatmul.mubr.msk.f32.vlgmr.msra.gmra.mxu1 %vm218_vm0, %v356_v50  ;;  %v360_v13 = vld [vmem:[%s6547_s10 + $0x21] sm:$0xff]  ;;  %v4122_v17 = vld [vmem:[%s6504_s1 + $0x2b0] sm:$0xff]  ;;  %v4087_v19 = vld [vmem:[%s6504_s1 + $0x1d8] sm:$0xff] }
  0x8a   :  { %313 = vmatprep.mubr.f32.mxu0 %v6536_v0  ;;  %483 = vmatprep.mubr.f32.mxu1 %v6536_v0  ;;  %v4088_v16 = vld [vmem:[%s6504_s1 + $0x1e0] sm:$0xff]  ;;  %v179_v18 = vld [vmem:[%s6547_s10 + $0x28] sm:$0xff]  ;;  %v4086_v21 = vld [vmem:[%s6504_s1 + $0x1d0] sm:$0xff] }
  0x8b   :  { %607 = vmatprep.subr.mxu0 %v4099_v51  ;;  %793 = vmatprep.subr.mxu1 %v4131_v53  ;;  %v4121_v20 = vld [vmem:[%s6504_s1 + $0x2a8] sm:$0xff]  ;;  %v4120_v22 = vld [vmem:[%s6504_s1 + $0x2a0] sm:$0xff]  ;;  %v4119_v25 = vld [vmem:[%s6504_s1 + $0x298] sm:$0xff] }
  0x8c   :  { %608 = vmatpush1.msra.mxu0 %v4098_v52  ;;  %794 = vmatpush1.msra.mxu1 %v4130_v58  ;;  %v361_v23 = vld [vmem:[%s6547_s10 + $0x29] sm:$0xff]  ;;  %v4084_v26 = vld [vmem:[%s6504_s1 + $0x1c0] sm:$0xff]  ;;  %v4083_v29 = vld [vmem:[%s6504_s1 + $0x1b8] sm:$0xff] }
  0x8d   :  { %4037 = vmatmul.mubr.msk.f32.gmra.mxu0 %vm218_vm0, %v175_v54  ;;  %609 = vmatprep.subr.mxu0 %v4097_v55  ;;  %v4085_v24 = vld [vmem:[%s6504_s1 + $0x1c8] sm:$0xff]  ;;  %v4118_v27 = vld [vmem:[%s6504_s1 + $0x290] sm:$0xff]  ;;  %v4116_v32 = vld [vmem:[%s6504_s1 + $0x280] sm:$0xff] }
  0x8e   :  { %4069 = vmatmul.mubr.msk.f32.gmra.mxu1 %vm218_vm0, %v357_v56  ;;  %319 = vmatprep.mubr.f32.mxu0 %v6536_v0  ;;  %v180_v28 = vld [vmem:[%s6547_s10 + $0x30] sm:$0xff]  ;;  %v4117_v30 = vld [vmem:[%s6504_s1 + $0x288] sm:$0xff]  ;;  %v4115_v35 = vld [vmem:[%s6504_s1 + $0x278] sm:$0xff] }
  0x8f   :  { %489 = vmatprep.mubr.f32.mxu1 %v6536_v0  ;;  %610 = vmatpush1.msra.mxu0 %v4096_v57  ;;  %v4082_v31 = vld [vmem:[%s6504_s1 + $0x1b0] sm:$0xff]  ;;  %v4081_v34 = vld [vmem:[%s6504_s1 + $0x1a8] sm:$0xff]  ;;  %v4080_v36 = vld [vmem:[%s6504_s1 + $0x1a0] sm:$0xff] }
  0x90   :  { %611 = vmatprep.subr.mxu0 %v4095_v59  ;;  %795 = vmatprep.subr.mxu1 %v4129_v61  ;;  %v362_v33 = vld [vmem:[%s6547_s10 + $0x31] sm:$0xff]  ;;  %v4113_v40 = vld [vmem:[%s6504_s1 + $0x268] sm:$0xff]  ;;  %v4112_v42 = vld [vmem:[%s6504_s1 + $0x260] sm:$0xff] }
  0x91   :  { %4038 = vmatmul.mubr.msk.f32.gmra.mxu0 %vm218_vm0, %v176_v60  ;;  %796 = vmatpush1.msra.mxu1 %v4128_v1  ;;  %v4114_v37 = vld [vmem:[%s6504_s1 + $0x270] sm:$0xff]  ;;  %v181_v38 = vld [vmem:[%s6547_s10 + $0x38] sm:$0xff]  ;;  %v4077_v44 = vld [vmem:[%s6504_s1 + $0x188] sm:$0xff] }
  0x92   :  { %4070 = vmatmul.mubr.msk.f32.gmra.mxu1 %vm218_vm0, %v358_v62  ;;  %325 = vmatprep.mubr.f32.mxu0 %v6536_v0  ;;  %v4079_v39 = vld [vmem:[%s6504_s1 + $0x198] sm:$0xff]  ;;  %v4078_v41 = vld [vmem:[%s6504_s1 + $0x190] sm:$0xff]  ;;  %v4076_v46 = vld [vmem:[%s6504_s1 + $0x180] sm:$0xff] }
  0x93   :  { %495 = vmatprep.mubr.f32.mxu1 %v6536_v0  ;;  %612 = vmatpush1.msra.mxu0 %v4094_v63  ;;  %v363_v43 = vld [vmem:[%s6547_s10 + $0x39] sm:$0xff]  ;;  %v4110_v47 = vld [vmem:[%s6504_s1 + $0x250] sm:$0xff]  ;;  %v542_v48 = vld [vmem:[%s6547_s10 + $0x2] sm:$0xff] }
  0x94   :  { %613 = vmatprep.subr.mxu0 %v4093_v2  ;;  %797 = vmatprep.subr.mxu1 %v4127_v4  ;;  %v4111_v45 = vld [vmem:[%s6504_s1 + $0x258] sm:$0xff]  ;;  %v4109_v49 = vld [vmem:[%s6504_s1 + $0x248] sm:$0xff]  ;;  %v4108_v50 = vld [vmem:[%s6504_s1 + $0x240] sm:$0xff] }
  0x95   :  { %4039 = vmatmul.mubr.msk.f32.gmra.mxu0 %vm218_vm0, %v177_v3  ;;  %798 = vmatpush1.msra.mxu1 %v4126_v7  ;;  %v728_v51 = vld [vmem:[%s6547_s10 + $0x3] sm:$0xff]  ;;  %v4163_v52 = vld [vmem:[%s6504_s1 + $0x3b8] sm:$0xff]  ;;  %v4162_v54 = vld [vmem:[%s6504_s1 + $0x3b0] sm:$0xff] }
  0x96   :  { %4071 = vmatmul.mubr.msk.f32.gmra.mxu1 %vm218_vm0, %v359_v5  ;;  %331 = vmatprep.mubr.f32.mxu0 %v6536_v0  ;;  %v543_v53 = vld [vmem:[%s6547_s10 + $0xa] sm:$0xff]  ;;  %v4160_v57 = vld [vmem:[%s6504_s1 + $0x3a0] sm:$0xff]  ;;  %v544_v58 = vld [vmem:[%s6547_s10 + $0x12] sm:$0xff] }
  0x97   :  { %614 = vmatpush1.msra.mxu0 %v4092_v6  ;;  %799 = vmatprep.subr.mxu1 %v4125_v9  ;;  %v729_v55 = vld [vmem:[%s6547_s10 + $0xb] sm:$0xff]  ;;  %v4159_v59 = vld [vmem:[%s6504_s1 + $0x398] sm:$0xff]  ;;  %v4156_v63 = vld [vmem:[%s6504_s1 + $0x380] sm:$0xff] }
  0x98   :  { %615 = vmatprep.subr.mxu0 %v4091_v8  ;;  %501 = vmatprep.mubr.f32.mxu1 %v6536_v0  ;;  %v4161_v56 = vld [vmem:[%s6504_s1 + $0x3a8] sm:$0xff]  ;;  %v4158_v60 = vld [vmem:[%s6504_s1 + $0x390] sm:$0xff]  ;;  %v545_v1 = vld [vmem:[%s6547_s10 + $0x1a] sm:$0xff] }
  0x99   :  { %4040 = vmatmul.mubr.msk.f32.gmra.mxu0 %vm218_vm0, %v178_v10  ;;  %800 = vmatpush1.msra.mxu1 %v4124_v12  ;;  %v730_v61 = vld [vmem:[%s6547_s10 + $0x13] sm:$0xff]  ;;  %v4157_v62 = vld [vmem:[%s6504_s1 + $0x388] sm:$0xff]  ;;  %v731_v4 = vld [vmem:[%s6547_s10 + $0x1b] sm:$0xff] }
  0x9a   :  { %616 = vmatpush1.msra.mxu0 %v4090_v11  ;;  %4072 = vmatmul.mubr.msk.f32.gmra.mxu1 %vm218_vm0, %v360_v13  ;;  %v4155_v2 = vld [vmem:[%s6504_s1 + $0x378] sm:$0xff]  ;;  %v4154_v3 = vld [vmem:[%s6504_s1 + $0x370] sm:$0xff]  ;;  %v4153_v5 = vld [vmem:[%s6504_s1 + $0x368] sm:$0xff] }
  0x9b   :  { %617 = vmatprep.subr.mxu0 %v4089_v14  ;;  %801 = vmatprep.subr.mxu1 %v4123_v15  ;;  %v4152_v6 = vld [vmem:[%s6504_s1 + $0x360] sm:$0xff]  ;;  %v4151_v8 = vld [vmem:[%s6504_s1 + $0x358] sm:$0xff]  ;;  %v4150_v9 = vld [vmem:[%s6504_s1 + $0x350] sm:$0xff] }
  0x9c   :  { %337 = vmatprep.mubr.f32.mxu0 %v6536_v0  ;;  %618 = vmatpush1.msra.mxu0 %v4088_v16  ;;  %v546_v7 = vld [vmem:[%s6547_s10 + $0x22] sm:$0xff]  ;;  %v547_v13 = vld [vmem:[%s6547_s10 + $0x2a] sm:$0xff]  ;;  %v4147_v14 = vld [vmem:[%s6504_s1 + $0x338] sm:$0xff] }
  0x9d   :  { %802 = vmatpush1.msra.mxu1 %v4122_v17  ;;  %4041 = vmatmul.mubr.msk.f32.gmra.mxu0 %vm218_vm0, %v179_v18  ;;  %v732_v10 = vld [vmem:[%s6547_s10 + $0x23] sm:$0xff]  ;;  %v4146_v15 = vld [vmem:[%s6504_s1 + $0x330] sm:$0xff] }
  0x9e   :  { %619 = vmatprep.subr.mxu0 %v4087_v19  ;;  %803 = vmatprep.subr.mxu1 %v4121_v20  ;;  %v4149_v11 = vld [vmem:[%s6504_s1 + $0x348] sm:$0xff]  ;;  %v4148_v12 = vld [vmem:[%s6504_s1 + $0x340] sm:$0xff]  ;;  %v548_v19 = vld [vmem:[%s6547_s10 + $0x32] sm:$0xff] }
  0x9f   :  { %507 = vmatprep.mubr.f32.mxu1 %v6536_v0  ;;  %620 = vmatpush1.msra.mxu0 %v4086_v21  ;;  %v733_v16 = vld [vmem:[%s6547_s10 + $0x2b] sm:$0xff]  ;;  %v4144_v18 = vld [vmem:[%s6504_s1 + $0x320] sm:$0xff]  ;;  %v4143_v20 = vld [vmem:[%s6504_s1 + $0x318] sm:$0xff] }
  0xa0   :  { %804 = vmatpush1.msra.mxu1 %v4120_v22  ;;  %621 = vmatprep.subr.mxu0 %v4085_v24  ;;  %v4145_v17 = vld [vmem:[%s6504_s1 + $0x328] sm:$0xff]  ;;  %v4142_v21 = vld [vmem:[%s6504_s1 + $0x310] sm:$0xff]  ;;  %v4140_v24 = vld [vmem:[%s6504_s1 + $0x300] sm:$0xff] }
  0xa1   :  { %4073 = vmatmul.mubr.msk.f32.gmra.mxu1 %vm218_vm0, %v361_v23  ;;  %805 = vmatprep.subr.mxu1 %v4119_v25  ;;  %v734_v22 = vld [vmem:[%s6547_s10 + $0x33] sm:$0xff]  ;;  %v4141_v23 = vld [vmem:[%s6504_s1 + $0x308] sm:$0xff] }
  0xa2   :  { %343 = vmatprep.mubr.f32.mxu0 %v6536_v0  ;;  %622 = vmatpush1.msra.mxu0 %v4084_v26  ;;  %v549_v25 = vld [vmem:[%s6547_s10 + $0x3a] sm:$0xff] }
  0xa3   :  { %806 = vmatpush1.msra.mxu1 %v4118_v27  ;;  %4042 = vmatmul.mubr.msk.f32.gmra.mxu0 %vm218_vm0, %v180_v28  ;;  %v735_v26 = vld [vmem:[%s6547_s10 + $0x3b] sm:$0xff]  ;;  %v914_v27 = vld [vmem:[%s6547_s10 + $0x4] sm:$0xff]  ;;  %v915_v28 = vld [vmem:[%s6547_s10 + $0xc] sm:$0xff] }
  0xa4   :  { %623 = vmatprep.subr.mxu0 %v4083_v29  ;;  %807 = vmatprep.subr.mxu1 %v4117_v30  ;;  %v916_v29 = vld [vmem:[%s6547_s10 + $0x14] sm:$0xff]  ;;  %v917_v30 = vld [vmem:[%s6547_s10 + $0x1c] sm:$0xff] }
  0xa5   :  { %513 = vmatprep.mubr.f32.mxu1 %v6536_v0  ;;  %624 = vmatpush1.msra.mxu0 %v4082_v31  ;;  %v918_v31 = vld [vmem:[%s6547_s10 + $0x24] sm:$0xff] }
  0xa6   :  { %808 = vmatpush1.msra.mxu1 %v4116_v32  ;;  %625 = vmatprep.subr.mxu0 %v4081_v34  ;;  %v919_v32 = vld [vmem:[%s6547_s10 + $0x2c] sm:$0xff]  ;;  %v921_v34 = vld [vmem:[%s6547_s10 + $0x3c] sm:$0xff] }
  0xa7   :  { %4074 = vmatmul.mubr.msk.f32.gmra.mxu1 %vm218_vm0, %v362_v33  ;;  %809 = vmatprep.subr.mxu1 %v4115_v35  ;;  %v920_v33 = vld [vmem:[%s6547_s10 + $0x34] sm:$0xff]  ;;  %v208_v35 = vlaneseq }
  0xa8   :  { %349 = vmatprep.mubr.f32.mxu0 %v6536_v0  ;;  %626 = vmatpush1.msra.mxu0 %v4080_v36 }
  0xa9   :  { %810 = vmatpush1.msra.mxu1 %v4114_v37  ;;  %4043 = vmatmul.mubr.msk.f32.gmra.mxu0 %vm218_vm0, %v181_v38  ;;  %v5512_v36 = vshrl.u32 %v208_v35, 7  ;;  %v206_v38 = vld [vmem:[#allocation3] sm:$0x3]  ;;  %v5634_v35 = vld [vmem:[#allocation8 + $0x20] sm:$0xff] }
  0xaa   :  { %627 = vmatprep.subr.mxu0 %v4079_v39  ;;  %811 = vmatprep.subr.mxu1 %v4113_v40  ;;  %6563 = vst [vmem:[#allocation40_spill] sm:$0xff] %v5634_v35 }
  0xab   :  { %519 = vmatprep.mubr.f32.mxu1 %v6536_v0  ;;  %628 = vmatpush1.msra.mxu0 %v4078_v41  ;;  %6548 = vst [vmem:[#allocation25_spill] sm:$0xff] %v5512_v36  ;;  %v6522_v37 = vsub.s32 0, %v5512_v36  ;;  %v6521_v39 = vsub.s32 1, %v5512_v36 }
  0xac   :  { %812 = vmatpush1.msra.mxu1 %v4112_v42  ;;  %629 = vmatprep.subr.mxu0 %v4077_v44 }
  0xad   :  { %4075 = vmatmul.mubr.msk.f32.gmra.mxu1 %vm218_vm0, %v363_v43  ;;  %813 = vmatprep.subr.mxu1 %v4111_v45  ;;  %v5518_v40 = vrot.slane %v206_v38, %v6522_v37  ;;  %v5522_v41 = vrot.slane %v206_v38, %v6521_v39 }
  0xae   :  { %630 = vmatpush1.msra.mxu0 %v4076_v46  ;;  %663 = vmatprep.mubr.f32.mxu0 %v6536_v0 }
  0xaf   :  { %814 = vmatpush1.msra.mxu1 %v4110_v47  ;;  %4100 = vmatmul.mubr.msk.f32.vlgmr.msra.gmra.mxu0 %vm218_vm0, %v542_v48 }
  0xb0   :  { %815 = vmatprep.subr.mxu1 %v4109_v49  ;;  %849 = vmatprep.mubr.f32.mxu1 %v6536_v0 }
  0xb1   :  { %816 = vmatpush1.msra.mxu1 %v4108_v50  ;;  %669 = vmatprep.mubr.f32.mxu0 %v6536_v0 }
  0xb2   :  { %4132 = vmatmul.mubr.msk.f32.vlgmr.msra.gmra.mxu1 %vm218_vm0, %v728_v51  ;;  %979 = vmatprep.subr.mxu0 %v4163_v52 }
  0xb3   :  { %855 = vmatprep.mubr.f32.mxu1 %v6536_v0  ;;  %4101 = vmatmul.mubr.msk.f32.gmra.mxu0 %vm218_vm0, %v543_v53 }
  0xb4   :  { %675 = vmatprep.mubr.f32.mxu0 %v6536_v0  ;;  %980 = vmatpush1.msra.mxu0 %v4162_v54 }
  0xb5   :  { %981 = vmatprep.subr.mxu0 %v4161_v56 }
  0xb6   :  { %4133 = vmatmul.mubr.msk.f32.gmra.mxu1 %vm218_vm0, %v729_v55  ;;  %982 = vmatpush1.msra.mxu0 %v4160_v57 }
  0xb7   :  { %861 = vmatprep.mubr.f32.mxu1 %v6536_v0  ;;  %4102 = vmatmul.mubr.msk.f32.gmra.mxu0 %vm218_vm0, %v544_v58 }
  0xb8   :  { %983 = vmatprep.subr.mxu0 %v4159_v59  ;;  %681 = vmatprep.mubr.f32.mxu0 %v6536_v0 }
  0xb9   :  { %984 = vmatpush1.msra.mxu0 %v4158_v60 }
  0xba   :  { %4134 = vmatmul.mubr.msk.f32.gmra.mxu1 %vm218_vm0, %v730_v61  ;;  %985 = vmatprep.subr.mxu0 %v4157_v62 }
  0xbb   :  { %867 = vmatprep.mubr.f32.mxu1 %v6536_v0  ;;  %986 = vmatpush1.msra.mxu0 %v4156_v63 }
  0xbc   :  { %4103 = vmatmul.mubr.msk.f32.gmra.mxu0 %vm218_vm0, %v545_v1  ;;  %987 = vmatprep.subr.mxu0 %v4155_v2 }
  0xbd   :  { %687 = vmatprep.mubr.f32.mxu0 %v6536_v0  ;;  %988 = vmatpush1.msra.mxu0 %v4154_v3 }
  0xbe   :  { %4135 = vmatmul.mubr.msk.f32.gmra.mxu1 %vm218_vm0, %v731_v4  ;;  %989 = vmatprep.subr.mxu0 %v4153_v5 }
  0xbf   :  { %873 = vmatprep.mubr.f32.mxu1 %v6536_v0  ;;  %990 = vmatpush1.msra.mxu0 %v4152_v6 }
  0xc0   :  { %4104 = vmatmul.mubr.msk.f32.gmra.mxu0 %vm218_vm0, %v546_v7  ;;  %991 = vmatprep.subr.mxu0 %v4151_v8  ;;  %v5562_v8 = vld [vmem:[#allocation8 + $0x78] sm:$0xff] }
  0xc1   :  { %693 = vmatprep.mubr.f32.mxu0 %v6536_v0  ;;  %992 = vmatpush1.msra.mxu0 %v4150_v9  ;;  %6549 = vst [vmem:[#allocation26_spill] sm:$0xff] %v5562_v8  ;;  %v5564_v9 = vld [vmem:[#allocation8 + $0x70] sm:$0xff] }
  0xc2   :  { %4136 = vmatmul.mubr.msk.f32.gmra.mxu1 %vm218_vm0, %v732_v10  ;;  %993 = vmatprep.subr.mxu0 %v4149_v11  ;;  %6550 = vst [vmem:[#allocation27_spill] sm:$0xff] %v5564_v9 }
  0xc3   :  { %879 = vmatprep.mubr.f32.mxu1 %v6536_v0  ;;  %994 = vmatpush1.msra.mxu0 %v4148_v12  ;;  %v5572_v12 = vld [vmem:[#allocation8 + $0x68] sm:$0xff] }
  0xc4   :  { %4105 = vmatmul.mubr.msk.f32.gmra.mxu0 %vm218_vm0, %v547_v13  ;;  %995 = vmatprep.subr.mxu0 %v4147_v14  ;;  %6551 = vst [vmem:[#allocation28_spill] sm:$0xff] %v5572_v12  ;;  %v5578_v14 = vld [vmem:[#allocation8 + $0x60] sm:$0xff] }
  0xc5   :  { %699 = vmatprep.mubr.f32.mxu0 %v6536_v0  ;;  %996 = vmatpush1.msra.mxu0 %v4146_v15  ;;  %6552 = vst [vmem:[#allocation29_spill] sm:$0xff] %v5578_v14 }
  0xc6   :  { %4137 = vmatmul.mubr.msk.f32.gmra.mxu1 %vm218_vm0, %v733_v16  ;;  %997 = vmatprep.subr.mxu0 %v4145_v17  ;;  %v5584_v16 = vld [vmem:[#allocation8 + $0x58] sm:$0xff] }
  0xc7   :  { %885 = vmatprep.mubr.f32.mxu1 %v6536_v0  ;;  %998 = vmatpush1.msra.mxu0 %v4144_v18  ;;  %6553 = vst [vmem:[#allocation30_spill] sm:$0xff] %v5584_v16 }
  0xc8   :  { %4106 = vmatmul.mubr.msk.f32.gmra.mxu0 %vm218_vm0, %v548_v19  ;;  %999 = vmatprep.subr.mxu0 %v4143_v20  ;;  %v5592_v19 = vld [vmem:[#allocation8 + $0x50] sm:$0xff] }
  0xc9   :  { %705 = vmatprep.mubr.f32.mxu0 %v6536_v0  ;;  %1000 = vmatpush1.msra.mxu0 %v4142_v21  ;;  %6554 = vst [vmem:[#allocation31_spill] sm:$0xff] %v5592_v19  ;;  %v5598_v21 = vld [vmem:[#allocation8 + $0x48] sm:$0xff] }
  0xca   :  { %4138 = vmatmul.mubr.msk.f32.gmra.mxu1 %vm218_vm0, %v734_v22  ;;  %1001 = vmatprep.subr.mxu0 %v4141_v23  ;;  %6555 = vst [vmem:[#allocation32_spill] sm:$0xff] %v5598_v21  ;;  %v5604_v23 = vld [vmem:[#allocation8 + $0x40] sm:$0xff] }
  0xcb   :  { %891 = vmatprep.mubr.f32.mxu1 %v6536_v0  ;;  %1002 = vmatpush1.msra.mxu0 %v4140_v24  ;;  %6556 = vst [vmem:[#allocation33_spill] sm:$0xff] %v5604_v23 }
  0xcc   :  { %4107 = vmatmul.mubr.msk.f32.gmra.mxu0 %vm218_vm0, %v549_v25  ;;  %1362 = vmatprep.subr.mxu0 %v6536_v0 }
  0xcd   :  { %1035 = vmatprep.mubr.f32.mxu0 %v6536_v0 }
  0xce   :  { %4139 = vmatmul.mubr.msk.f32.gmra.mxu1 %vm218_vm0, %v735_v26  ;;  %v5612_v26 = vld [vmem:[#allocation8 + $0x38] sm:$0xff] }
  0xcf   :  { %1197 = vmatprep.mubr.f32.mxu1 %v6536_v0  ;;  %6557 = vst [vmem:[#allocation34_spill] sm:$0xff] %v5612_v26 }
  0xd0   :  { %4164 = vmatmul.mubr.msk.f32.vlgmr.msra.gmra.mxu0 %vm218_vm0, %v914_v27 }
  0xd1   :  { %1041 = vmatprep.mubr.f32.mxu0 %v6536_v0  ;;  %1363 = vmatpush1.msra.mxu0 %v5562_v8 }
  0xd2   :  { %1364 = vmatprep.subr.mxu0 %v6536_v0 }
  0xd3   :  { %1365 = vmatpush1.msra.mxu0 %v5564_v9 }
  0xd4   :  { %4165 = vmatmul.mubr.msk.f32.gmra.mxu0 %vm218_vm0, %v915_v28  ;;  %1366 = vmatprep.subr.mxu0 %v6536_v0  ;;  %v5618_v28 = vld [vmem:[#allocation8 + $0x30] sm:$0xff] }
  0xd5   :  { %1047 = vmatprep.mubr.f32.mxu0 %v6536_v0  ;;  %1367 = vmatpush1.msra.mxu0 %v5572_v12  ;;  %6558 = vst [vmem:[#allocation35_spill] sm:$0xff] %v5618_v28 }
  0xd6   :  { %1368 = vmatprep.subr.mxu0 %v6536_v0 }
  0xd7   :  { %1369 = vmatpush1.msra.mxu0 %v5578_v14 }
  0xd8   :  { %4166 = vmatmul.mubr.msk.f32.gmra.mxu0 %vm218_vm0, %v916_v29  ;;  %1370 = vmatprep.subr.mxu0 %v6536_v0 }
  0xd9   :  { %1053 = vmatprep.mubr.f32.mxu0 %v6536_v0  ;;  %1371 = vmatpush1.msra.mxu0 %v5584_v16 }
  0xda   :  { %1372 = vmatprep.subr.mxu0 %v6536_v0 }
  0xdb   :  { %1373 = vmatpush1.msra.mxu0 %v5592_v19 }
  0xdc   :  { %4167 = vmatmul.mubr.msk.f32.gmra.mxu0 %vm218_vm0, %v917_v30  ;;  %1374 = vmatprep.subr.mxu0 %v6536_v0 }
  0xdd   :  { %1059 = vmatprep.mubr.f32.mxu0 %v6536_v0  ;;  %1375 = vmatpush1.msra.mxu0 %v5598_v21 }
  0xde   :  { %1376 = vmatprep.subr.mxu0 %v6536_v0 }
  0xdf   :  { %1377 = vmatpush1.msra.mxu0 %v5604_v23 }
  0xe0   :  { %4168 = vmatmul.mubr.msk.f32.gmra.mxu0 %vm218_vm0, %v918_v31  ;;  %1378 = vmatprep.subr.mxu0 %v6536_v0  ;;  %v5625_v31 = vld [vmem:[#allocation8 + $0x28] sm:$0xff] }
  0xe1   :  { %1065 = vmatprep.mubr.f32.mxu0 %v6536_v0  ;;  %1379 = vmatpush1.msra.mxu0 %v5612_v26  ;;  %6560 = vst [vmem:[#allocation37_spill] sm:$0xff] %v5625_v31 }
  0xe2   :  { %1380 = vmatprep.subr.mxu0 %v6536_v0 }
  0xe3   :  { %1381 = vmatpush1.msra.mxu0 %v5618_v28 }
  0xe4   :  { %4169 = vmatmul.mubr.msk.f32.gmra.mxu0 %vm218_vm0, %v919_v32  ;;  %1382 = vmatprep.subr.mxu0 %v6536_v0 }
  0xe5   :  { %1071 = vmatprep.mubr.f32.mxu0 %v6536_v0  ;;  %1383 = vmatpush1.msra.mxu0 %v5625_v31 }
  0xe6   :  { %1384 = vmatprep.subr.mxu0 %v6536_v0 }
  0xe7   :  { %1385 = vmatpush1.msra.mxu0 %v5634_v35 }
  0xe8   :  { %4170 = vmatmul.mubr.msk.f32.gmra.mxu0 %vm218_vm0, %v920_v33  ;;  %1386 = vmatprep.subr.mxu0 %v6536_v0 }
  0xe9   :  { %1077 = vmatprep.mubr.f32.mxu0 %v6536_v0 }
  0xec   :  { %4171 = vmatmul.mubr.msk.f32.gmra.mxu0 %vm218_vm0, %v921_v34 }
 0x149   :  { %v309_v42 = vpop.f32.mrf.mxu0  ;;  %v479_v44 = vpop.f32.mrf.mxu1 }
 0x14a   :  { %v310_v43 = vadd.f32 %v309_v42, %v5518_v40 }
 0x14b   :  { %v311_v45 = vpop.f32.mrf.mxu0  ;;  %v481_v48 = vpop.f32.mrf.mxu1 }
 0x14c   :  { %v312_v46 = vadd.f32 %v311_v45, %v5522_v41  ;;  %v5526_v47 = vadd.f32 %v479_v44, %v310_v43  ;;  %v5643_v44 = vld [vmem:[#allocation8 + $0x18] sm:$0xff] }
 0x14d   :  { %v315_v49 = vpop.f32.mrf.mxu0  ;;  %6566 = vst [vmem:[#allocation43_spill] sm:$0xff] %v5643_v44  ;;  %1387 = vmatpush1.msra.mxu0 %v5643_v44 }
 0x14e   :  { %v316_v50 = vadd.f32 %v315_v49, %v5518_v40  ;;  %v5529_v51 = vadd.f32 %v481_v48, %v312_v46  ;;  %v485_v52 = vpop.f32.mrf.mxu1  ;;  %v5652_v48 = vld [vmem:[#allocation8 + $0x10] sm:$0xff]  ;;  %1388 = vmatprep.subr.mxu0 %v6536_v0 }
 0x14f   :  { %v317_v53 = vpop.f32.mrf.mxu0  ;;  %6569 = vst [vmem:[#allocation46_spill] sm:$0xff] %v5652_v48  ;;  %1389 = vmatpush1.msra.mxu0 %v5652_v48 }
 0x150   :  { %v318_v54 = vadd.f32 %v317_v53, %v5522_v41  ;;  %v5532_v55 = vadd.f32 %v485_v52, %v316_v50  ;;  %v487_v56 = vpop.f32.mrf.mxu1  ;;  %v5658_v50 = vld [vmem:[#allocation8 + $0x8] sm:$0xff]  ;;  %1390 = vmatprep.subr.mxu0 %v6536_v0  ;;  %v5666_v53 = vld [vmem:[#allocation8] sm:$0xff] }
 0x151   :  { %v5534_v57 = vpop.f32.mrf.mxu0  ;;  %6570 = vst [vmem:[#allocation47_spill] sm:$0xff] %v5658_v50  ;;  %6572 = vst [vmem:[#allocation49_spill] sm:$0xff] %v5666_v53  ;;  %1391 = vmatpush1.msra.mxu0 %v5658_v50 }
 0x152   :  { %v5536_v58 = vadd.f32 %v487_v56, %v318_v54  ;;  %v5538_v59 = vpop.f32.mrf.mxu1  ;;  %1392 = vmatprep.subr.mxu0 %v6536_v0 }
 0x153   :  { %v5540_v60 = vpop.f32.mrf.mxu0  ;;  %1393 = vmatpush1.msra.mxu0 %v5666_v53 }
 0x154   :  { %v5542_v61 = vpop.f32.mrf.mxu1  ;;  %1416 = vmatprep.subr.mxu0 %v6536_v0 }
 0x155   :  { %v5544_v62 = vpop.f32.mrf.mxu0 }
 0x156   :  { %v5546_v63 = vpop.f32.mrf.mxu1 }
 0x157   :  { %v5548_v1 = vpop.f32.mrf.mxu0 }
 0x158   :  { %v5550_v2 = vpop.f32.mrf.mxu1 }
 0x159   :  { %v5552_v3 = vpop.f32.mrf.mxu0 }
 0x15a   :  { %v5556_v5 = vpop.f32.mrf.mxu1 }
 0x15b   :  { %v5554_v4 = vpop.f32.mrf.mxu0 }
 0x15c   :  { %v5558_v6 = vpop.f32.mrf.mxu1 }
 0x15d   :  { %v5560_v7 = vpop.f32.mrf.mxu0 }
 0x15f   :  { %v5566_v10 = vpop.f32.mrf.mxu0 }
 0x161   :  { %v5569_v11 = vpop.f32.mrf.mxu1 }
 0x163   :  { %v5575_v13 = vpop.f32.mrf.mxu1  ;;  %v5580_v15 = vpop.f32.mrf.mxu0 }
 0x165   :  { %v5586_v17 = vpop.f32.mrf.mxu0 }
 0x167   :  { %v5589_v18 = vpop.f32.mrf.mxu1 }
 0x169   :  { %v5595_v20 = vpop.f32.mrf.mxu1  ;;  %v5600_v22 = vpop.f32.mrf.mxu0 }
 0x16b   :  { %v5606_v24 = vpop.f32.mrf.mxu0 }
 0x16d   :  { %v5609_v25 = vpop.f32.mrf.mxu1 }
 0x16f   :  { %v5615_v27 = vpop.f32.mrf.mxu1  ;;  %v665_v29 = vpop.f32.mrf.mxu0 }
 0x170   :  { %v5622_v30 = vadd.f32 %v665_v29, %v5526_v47  ;;  %v5680_v29 = vld [vmem:[#allocation8 + $0x98] sm:$0xff] }
 0x171   :  { %v667_v32 = vpop.f32.mrf.mxu0  ;;  %6574 = vst [vmem:[#allocation51_spill] sm:$0xff] %v5680_v29 }
 0x172   :  { %6559 = vst [vmem:[#allocation36_spill] sm:$0xff] %v5622_v30  ;;  %v5627_v33 = vpop.f32.mrf.mxu1  ;;  %v5631_v34 = vadd.f32 %v667_v32, %v5529_v51  ;;  %v354_v30 = vadd.f32 %v5606_v24, %v5522_v41 }
 0x173   :  { %6561 = vst [vmem:[#allocation38_spill] sm:$0xff] %v5627_v33  ;;  %v671_v38 = vpop.f32.mrf.mxu0  ;;  %v348_v33 = vadd.f32 %v5586_v17, %v5522_v41  ;;  %v336_v17 = vadd.f32 %v5554_v4, %v5522_v41 }
 0x174   :  { %6562 = vst [vmem:[#allocation39_spill] sm:$0xff] %v5631_v34  ;;  %v5636_v42 = vpop.f32.mrf.mxu1  ;;  %v5640_v43 = vadd.f32 %v671_v38, %v5532_v55  ;;  %v5672_v55 = vld [vmem:[#allocation8 + $0xa0] sm:$0xff]  ;;  %v5686_v38 = vld [vmem:[#allocation8 + $0x90] sm:$0xff]  ;;  %v342_v34 = vadd.f32 %v5566_v10, %v5522_v41  ;;  %v541_v24 = vadd.f32 %v5615_v27, %v354_v30  ;;  %v334_v10 = vadd.f32 %v5552_v3, %v5518_v40 }
 0x175   :  { %6564 = vst [vmem:[#allocation41_spill] sm:$0xff] %v5636_v42  ;;  %v673_v45 = vpop.f32.mrf.mxu0  ;;  %6573 = vst [vmem:[#allocation50_spill] sm:$0xff] %v5672_v55  ;;  %1417 = vmatpush2.msra.mxu0 %v5672_v55  ;;  %v322_v3 = vadd.f32 %v5534_v57, %v5518_v40 }
 0x176   :  { %6565 = vst [vmem:[#allocation42_spill] sm:$0xff] %v5640_v43  ;;  %v5645_v46 = vpop.f32.mrf.mxu1  ;;  %v5649_v47 = vadd.f32 %v673_v45, %v5536_v58  ;;  %1418 = vmatprep.subr.mxu0 %v6536_v0  ;;  %6575 = vst [vmem:[#allocation52_spill] sm:$0xff] %v5686_v38 }
 0x177   :  { %6567 = vst [vmem:[#allocation44_spill] sm:$0xff] %v5645_v46  ;;  %v5654_v49 = vpop.f32.mrf.mxu0  ;;  %1419 = vmatpush2.msra.mxu0 %v5680_v29 }
 0x178   :  { %6568 = vst [vmem:[#allocation45_spill] sm:$0xff] %v5649_v47  ;;  %v5660_v51 = vpop.f32.mrf.mxu1  ;;  %1420 = vmatprep.subr.mxu0 %v6536_v0 }
 0x179   :  { %6571 = vst [vmem:[#allocation48_spill] sm:$0xff] %v5660_v51  ;;  %v5662_v52 = vpop.f32.mrf.mxu0  ;;  %1421 = vmatpush2.msra.mxu0 %v5686_v38 }
 0x17a   :  { %v5674_v56 = vpop.f32.mrf.mxu1  ;;  %1422 = vmatprep.subr.mxu0 %v6536_v0 }
 0x17c   :  { %v5668_v54 = vpop.f32.mrf.mxu0  ;;  %v5688_v45 = vpop.f32.mrf.mxu1 }
 0x17e   :  { %v5676_v58 = vpop.f32.mrf.mxu0  ;;  %v5696_v36 = vpop.f32.mrf.mxu1 }
 0x180   :  { %v5682_v32 = vpop.f32.mrf.mxu0  ;;  %v5698_v50 = vpop.f32.mrf.mxu1 }
 0x182   :  { %v5690_v39 = vpop.f32.mrf.mxu0  ;;  %v5700_v35 = vpop.f32.mrf.mxu1 }
 0x184   :  { %v695_v37 = vpop.f32.mrf.mxu0  ;;  %v5704_v29 = vpop.f32.mrf.mxu1 }
 0x186   :  { %v697_v55 = vpop.f32.mrf.mxu0  ;;  %v881_v0 = vpop.f32.mrf.mxu1 }
 0x188   :  { %v701_v53 = vpop.f32.mrf.mxu0  ;;  %v883_v19 = vpop.f32.mrf.mxu1 }
 0x18a   :  { %v703_v48 = vpop.f32.mrf.mxu0  ;;  %v887_v12 = vpop.f32.mrf.mxu1 }
 0x18c   :  { %v707_v44 = vpop.f32.mrf.mxu0 }
 0x18e   :  { %v709_v31 = vpop.f32.mrf.mxu0 }
 0x190   :  { %v5702_v28 = vpop.f32.mrf.mxu0 }
 0x191   :  { %6576 = vst [vmem:[#allocation53_spill] sm:$0xff] %v5702_v28  ;;  %v352_v28 = vadd.f32 %v5600_v22, %v5518_v40 }
 0x192   :  { %v5706_v26 = vpop.f32.mrf.mxu0 }
 0x193   :  { %6577 = vst [vmem:[#allocation54_spill] sm:$0xff] %v5706_v26  ;;  %v889_v26 = vpop.f32.mrf.mxu1  ;;  %v540_v22 = vadd.f32 %v5609_v25, %v352_v28  ;;  %v330_v25 = vadd.f32 %v5548_v1, %v5522_v41  ;;  %v537_v28 = vadd.f32 %v5575_v13, %v342_v34  ;;  %v534_v1 = vadd.f32 %v5556_v5, %v334_v10 }
 0x194   :  { %v5708_v38 = vpop.f32.mrf.mxu0 }
 0x195   :  { %6578 = vst [vmem:[#allocation55_spill] sm:$0xff] %v5708_v38  ;;  %v893_v46 = vpop.f32.mrf.mxu1 }
 0x196   :  { %v5710_v23 = vpop.f32.mrf.mxu0 }
 0x197   :  { %6579 = vst [vmem:[#allocation56_spill] sm:$0xff] %v5710_v23  ;;  %v346_v23 = vadd.f32 %v5580_v15, %v5518_v40  ;;  %v324_v15 = vadd.f32 %v5540_v60, %v5522_v41  ;;  %v895_v30 = vpop.f32.mrf.mxu1 }
 0x198   :  { %v5712_v21 = vpop.f32.mrf.mxu0 }
 0x199   :  { %6580 = vst [vmem:[#allocation57_spill] sm:$0xff] %v5712_v21  ;;  %v340_v21 = vadd.f32 %v5560_v7, %v5518_v40  ;;  %v538_v51 = vadd.f32 %v5589_v18, %v346_v23  ;;  %v726_v7 = vadd.f32 %v707_v44, %v540_v22  ;;  %v535_v18 = vadd.f32 %v5558_v6, %v336_v17  ;;  %v6584_v17 = vld [vmem:[#allocation45_spill] sm:$0xff] }
 0x19a   :  { %v5714_v16 = vpop.f32.mrf.mxu0  ;;  %v723_v23 = vadd.f32 %v697_v55, %v537_v28  ;;  %v531_v41 = vadd.f32 %v5542_v61, %v324_v15 }
 0x19b   :  { %6581 = vst [vmem:[#allocation58_spill] sm:$0xff] %v5714_v16  ;;  %v539_v16 = vadd.f32 %v5595_v20, %v348_v33  ;;  %v328_v20 = vadd.f32 %v5544_v62, %v5518_v40  ;;  %v536_v27 = vadd.f32 %v5569_v11, %v340_v21  ;;  %v724_v60 = vadd.f32 %v701_v53, %v538_v51 }
 0x19c   :  { %v5716_v14 = vpop.f32.mrf.mxu0  ;;  %v533_v62 = vadd.f32 %v5550_v2, %v330_v25  ;;  %v721_v11 = vadd.f32 %v5690_v39, %v535_v18  ;;  %v720_v40 = vadd.f32 %v5682_v32, %v534_v1  ;;  %v909_v5 = vadd.f32 %v883_v19, %v723_v23  ;;  %v6594_v18 = vld [vmem:[#allocation38_spill] sm:$0xff] }
 0x19d   :  { %6582 = vst [vmem:[#allocation59_spill] sm:$0xff] %v5716_v14  ;;  %v725_v4 = vadd.f32 %v703_v48, %v539_v16  ;;  %v727_v14 = vadd.f32 %v709_v31, %v541_v24  ;;  %v722_v13 = vadd.f32 %v695_v37, %v536_v27  ;;  %v912_v16 = vadd.f32 %v893_v46, %v726_v7  ;;  %v6587_v7 = vld [vmem:[#allocation42_spill] sm:$0xff] }
 0x19e   :  { %v5718_v9 = vpop.f32.mrf.mxu0  ;;  %v532_v44 = vadd.f32 %v5546_v63, %v328_v20  ;;  %v910_v57 = vadd.f32 %v887_v12, %v724_v60  ;;  %v719_v61 = vadd.f32 %v5676_v58, %v533_v62  ;;  %v530_v2 = vadd.f32 %v5538_v59, %v322_v3  ;;  %v6590_v20 = vld [vmem:[#allocation39_spill] sm:$0xff]  ;;  %v6592_v60 = vld [vmem:[#allocation56_spill] sm:$0xff] }
 0x19f   :  { %v911_v21 = vadd.f32 %v889_v26, %v725_v4  ;;  %v913_v34 = vadd.f32 %v895_v30, %v727_v14  ;;  %v908_v14 = vadd.f32 %v881_v0, %v722_v13  ;;  %v717_v63 = vadd.f32 %v5662_v52, %v531_v41  ;;  %v6593_v3 = vld [vmem:[#allocation36_spill] sm:$0xff]  ;;  %v6595_v41 = vld [vmem:[#allocation55_spill] sm:$0xff] }
 0x1a0   :  { %v5720_v8 = vpop.f32.mrf.mxu0  ;;  %v718_v39 = vadd.f32 %v5668_v54, %v532_v44  ;;  %v907_v12 = vadd.f32 %v5704_v29, %v721_v11  ;;  %v716_v19 = vadd.f32 %v5654_v49, %v530_v2  ;;  %v906_v55 = vadd.f32 %v5700_v35, %v720_v40  ;;  %v6597_v11 = vld [vmem:[#allocation53_spill] sm:$0xff] }
 0x1a1   :  { %v905_v54 = vadd.f32 %v5698_v50, %v719_v61  ;;  %v903_v49 = vadd.f32 %v5688_v45, %v717_v63  ;;  %v6588_v45 = vld [vmem:[#allocation44_spill] sm:$0xff]  ;;  %v898_v23 = vadd.f32 %v6594_v18, %v6593_v3  ;;  %v6598_v61 = vmov 0.0   ;;  %v5819_v63 = vld [vmem:[#allocation8 + $0x110] sm:$0xff]  ;;  %v6609_v3 = vld [vmem:[#allocation37_spill] sm:$0xff] }
 0x1a2   :  { %v1063_v38 = vpop.f32.mrf.mxu0  ;;  %v904_v52 = vadd.f32 %v5696_v36, %v718_v39  ;;  %v902_v50 = vadd.f32 %v5674_v56, %v716_v19  ;;  %v6585_v36 = vld [vmem:[#allocation48_spill] sm:$0xff]  ;;  %v900_v25 = vadd.f32 %v6588_v45, %v6587_v7  ;;  %v6591_v56 = vld [vmem:[#allocation41_spill] sm:$0xff] }
 0x1a3   :  { %v1093_v0 = vadd.f32 %v1063_v38, %v907_v12  ;;  %v1091_v35 = vadd.f32 %v5718_v9, %v905_v54  ;;  %v901_v24 = vadd.f32 %v6585_v36, %v6584_v17  ;;  %v6589_v9 = vld [vmem:[#allocation57_spill] sm:$0xff]  ;;  %v899_v27 = vadd.f32 %v6591_v56, %v6590_v20  ;;  %v5834_v19 = vld [vmem:[#allocation8 + $0xf8] sm:$0xff] }
 0x1a4   :  { %v1067_v42 = vpop.f32.mrf.mxu0  ;;  %v6583_v32 = vld [vmem:[#allocation59_spill] sm:$0xff]  ;;  %v1088_v28 = vadd.f32 %v6589_v9, %v902_v50  ;;  %v1086_v1 = vadd.f32 %v6595_v41, %v900_v25  ;;  %v1223_v2 = vld [vmem:[#allocation6 + $0x20] sm:$0xff]  ;;  %v5824_v12 = vld [vmem:[#allocation8 + $0x108] sm:$0xff] }
 0x1a5   :  { %v1094_v58 = vadd.f32 %v1067_v42, %v908_v14  ;;  %v1090_v38 = vadd.f32 %v6583_v32, %v904_v52  ;;  %v1109_v10 = vmax.f32 %v1093_v0, 0.0  ;;  %v1087_v30 = vadd.f32 %v6592_v60, %v901_v24  ;;  %v5810_v39 = vld [vmem:[#allocation8 + $0x120] sm:$0xff]  ;;  %v5814_v14 = vld [vmem:[#allocation8 + $0x118] sm:$0xff]  ;;  %v5860_v52 = vld [vmem:[#allocation8 + $0xc8] sm:$0xff] }
 0x1a6   :  { %v1069_v43 = vpop.f32.mrf.mxu0  ;;  %v1102_v40 = vmax.f32 %v1086_v1, 0.0  ;;  %v5848_v54 = vld [vmem:[#allocation8 + $0xe0] sm:$0xff]  ;;  %v5852_v0 = vld [vmem:[#allocation8 + $0xd8] sm:$0xff]  ;;  %v5904_v36 = vld [vmem:[#allocation8 + $0x128] sm:$0xff] }
 0x1a7   :  { %v5772_v51 = vadd.f32 %v1069_v43, %v909_v5  ;;  %v1092_v43 = vadd.f32 %v5720_v8, %v906_v55  ;;  %v1110_v22 = vmax.f32 %v1094_v58, 0.0  ;;  %v6586_v8 = vld [vmem:[#allocation58_spill] sm:$0xff]  ;;  %v1106_v13 = vmax.f32 %v1090_v38, 0.0  ;;  %v1226_v55 = vld [vmem:[#allocation6 + $0x38] sm:$0xff]  ;;  %v5884_v50 = vld [vmem:[#allocation8 + $0x140] sm:$0xff] }
 0x1a8   :  { %v1073_v47 = vpop.f32.mrf.mxu0  ;;  %v1089_v15 = vadd.f32 %v6586_v8, %v903_v49  ;;  %v1103_v44 = vmax.f32 %v1087_v30, 0.0  ;;  %v1117_v5 = vld [vmem:[#allocation6 + $0x8] sm:$0xff]  ;;  %v5839_v58 = vld [vmem:[#allocation8 + $0xf0] sm:$0xff]  ;;  %v5888_v32 = vld [vmem:[#allocation8 + $0x138] sm:$0xff] }
 0x1a9   :  { %v5768_v26 = vadd.f32 %v1073_v47, %v910_v57  ;;  %v1111_v42 = vmax.f32 %v5772_v51, 0.0  ;;  %v1108_v4 = vmax.f32 %v1092_v43, 0.0  ;;  %v1225_v51 = vld [vmem:[#allocation6 + $0x30] sm:$0xff]  ;;  %v5864_v43 = vld [vmem:[#allocation8 + $0xc0] sm:$0xff]  ;;  %v5894_v38 = vld [vmem:[#allocation8 + $0x88] sm:$0xff] }
 0x1aa   :  { %v1075_v33 = vpop.f32.mrf.mxu0  ;;  %v1105_v62 = vmax.f32 %v1089_v15, 0.0  ;;  %v5872_v49 = vld [vmem:[#allocation8 + $0xb0] sm:$0xff]  ;;  %1423 = vmatpush2.msra.mxu0 %v5894_v38  ;;  %v5902_v17 = vld [vmem:[#allocation8 + $0x80] sm:$0xff] }
 0x1ab   :  { %v5762_v37 = vadd.f32 %v1075_v33, %v911_v21  ;;  %v1112_v29 = vmax.f32 %v5768_v26, 0.0  ;;  %v1107_v33 = vmax.f32 %v1091_v35, 0.0  ;;  %v1084_v21 = vadd.f32 %v6597_v11, %v898_v23  ;;  %v1224_v26 = vld [vmem:[#allocation6 + $0x28] sm:$0xff]  ;;  %1424 = vmatprep.subr.mxu0 %v6598_v61  ;;  %v6601_v7 = vld [vmem:[#allocation28_spill] sm:$0xff]  ;;  %v6608_v30 = vld [vmem:[#allocation35_spill] sm:$0xff] }
 0x1ac   :  { %v1079_v31 = vpop.f32.mrf.mxu0  ;;  %v5876_v35 = vld [vmem:[#allocation8 + $0xa8] sm:$0xff]  ;;  %1425 = vmatpush2.msra.mxu0 %v5902_v17  ;;  %v6605_v20 = vld [vmem:[#allocation32_spill] sm:$0xff]  ;;  %v6611_v41 = vld [vmem:[#allocation43_spill] sm:$0xff] }
 0x1ad   :  { %v5759_v6 = vadd.f32 %v1079_v31, %v912_v16  ;;  %v1113_v47 = vmax.f32 %v5762_v37, 0.0  ;;  %v6596_v16 = vld [vmem:[#allocation54_spill] sm:$0xff]  ;;  %1570 = vmatprep.subr.mxu0 %v6598_v61  ;;  %v6602_v45 = vld [vmem:[#allocation29_spill] sm:$0xff]  ;;  %v6610_v18 = vld [vmem:[#allocation40_spill] sm:$0xff] }
 0x1ae   :  { %v1081_v48 = vpop.f32.mrf.mxu0  ;;  %v1085_v31 = vadd.f32 %v6596_v16, %v899_v27  ;;  %v1118_v37 = vld [vmem:[#allocation6 + $0x10] sm:$0xff]  ;;  %v6606_v56 = vld [vmem:[#allocation33_spill] sm:$0xff] }
 0x1af   :  { %v5764_v46 = vadd.f32 %v1081_v48, %v913_v34  ;;  %v1114_v59 = vmax.f32 %v5759_v6, 0.0  ;;  %v1104_v34 = vmax.f32 %v1088_v28, 0.0  ;;  %v1100_v6 = vmax.f32 %v1084_v21, 0.0  ;;  %v1116_v48 = vld [vmem:[#allocation6] sm:$0xff]  ;;  %v6599_v15 = vld [vmem:[#allocation26_spill] sm:$0xff]  ;;  %v6604_v28 = vld [vmem:[#allocation31_spill] sm:$0xff] }
 0x1b0   :  { %v1101_v57 = vmax.f32 %v1085_v31, 0.0  ;;  %v6603_v9 = vld [vmem:[#allocation30_spill] sm:$0xff]  ;;  %v6613_v31 = vld [vmem:[#allocation47_spill] sm:$0xff] }
 0x1b1   :  { %v1115_v53 = vmax.f32 %v5764_v46, 0.0  ;;  %v1119_v46 = vld [vmem:[#allocation6 + $0x18] sm:$0xff]  ;;  %v6607_v60 = vld [vmem:[#allocation34_spill] sm:$0xff] }
 0x1b2   :  { %v6612_v1 = vld [vmem:[#allocation46_spill] sm:$0xff] }
 0x1b3   :  { %1149 = vmatprep.subr.mxu1 %v1115_v53 }
 0x1b4   :  { %1150 = vmatpush1.msra.mxu1 %v1114_v59 }
 0x1b5   :  { %1151 = vmatprep.subr.mxu1 %v1113_v47 }
 0x1b6   :  { %1152 = vmatpush1.msra.mxu1 %v1112_v29 }
 0x1b7   :  { %1153 = vmatprep.subr.mxu1 %v1111_v42 }
 0x1b8   :  { %1154 = vmatpush1.msra.mxu1 %v1110_v22 }
 0x1b9   :  { %1155 = vmatprep.subr.mxu1 %v1109_v10 }
 0x1ba   :  { %1156 = vmatpush1.msra.mxu1 %v1108_v4 }
 0x1bb   :  { %1157 = vmatprep.subr.mxu1 %v1107_v33 }
 0x1bc   :  { %1158 = vmatpush1.msra.mxu1 %v1106_v13 }
 0x1bd   :  { %1159 = vmatprep.subr.mxu1 %v1105_v62 }
 0x1be   :  { %1160 = vmatpush1.msra.mxu1 %v1104_v34 }
 0x1bf   :  { %1161 = vmatprep.subr.mxu1 %v1103_v44 }
 0x1c0   :  { %1162 = vmatpush1.msra.mxu1 %v1102_v40 }
 0x1c1   :  { %1163 = vmatprep.subr.mxu1 %v1101_v57 }
 0x1c2   :  { %1164 = vmatpush1.msra.mxu1 %v1100_v6 }
 0x1c3   :  { %4172 = vmatmul.mubr.msk.f32.vlgmr.msra.gmra.mxu1 %vm1120_vm1, %v1116_v48  ;;  %1255 = vmatprep.subr.mxu1 %v1115_v53  ;;  %v5829_v53 = vld [vmem:[#allocation8 + $0x100] sm:$0xff] }
 0x1c4   :  { %1256 = vmatpush1.msra.mxu1 %v1114_v59  ;;  %1203 = vmatprep.mubr.f32.mxu1 %v6598_v61  ;;  %v5844_v59 = vld [vmem:[#allocation8 + $0xe8] sm:$0xff] }
 0x1c5   :  { %1257 = vmatprep.subr.mxu1 %v1113_v47  ;;  %v5856_v47 = vld [vmem:[#allocation8 + $0xd0] sm:$0xff] }
 0x1c6   :  { %1258 = vmatpush1.msra.mxu1 %v1112_v29  ;;  %v5868_v29 = vld [vmem:[#allocation8 + $0xb8] sm:$0xff] }
 0x1c7   :  { %1259 = vmatprep.subr.mxu1 %v1111_v42  ;;  %4173 = vmatmul.mubr.msk.f32.gmra.mxu1 %vm1120_vm1, %v1117_v5  ;;  %v5880_v42 = vld [vmem:[#allocation8 + $0x148] sm:$0xff] }
 0x1c8   :  { %1260 = vmatpush1.msra.mxu1 %v1110_v22  ;;  %1209 = vmatprep.mubr.f32.mxu1 %v6598_v61  ;;  %v5896_v22 = vld [vmem:[#allocation8 + $0x130] sm:$0xff] }
 0x1c9   :  { %1261 = vmatprep.subr.mxu1 %v1109_v10  ;;  %v6600_v10 = vld [vmem:[#allocation27_spill] sm:$0xff] }
 0x1ca   :  { %1262 = vmatpush1.msra.mxu1 %v1108_v4 }
 0x1cb   :  { %1263 = vmatprep.subr.mxu1 %v1107_v33  ;;  %4174 = vmatmul.mubr.msk.f32.gmra.mxu1 %vm1120_vm1, %v1118_v37 }
 0x1cc   :  { %1264 = vmatpush1.msra.mxu1 %v1106_v13  ;;  %1215 = vmatprep.mubr.f32.mxu1 %v6598_v61 }
 0x1cd   :  { %1265 = vmatprep.subr.mxu1 %v1105_v62  ;;  %v6614_v62 = vld [vmem:[#allocation49_spill] sm:$0xff] }
 0x1ce   :  { %1266 = vmatpush1.msra.mxu1 %v1104_v34  ;;  %v6615_v34 = vld [vmem:[#allocation50_spill] sm:$0xff] }
 0x1cf   :  { %1267 = vmatprep.subr.mxu1 %v1103_v44  ;;  %4175 = vmatmul.mubr.msk.f32.gmra.mxu1 %vm1120_vm1, %v1119_v46  ;;  %v6616_v44 = vld [vmem:[#allocation51_spill] sm:$0xff] }
 0x1d0   :  { %1268 = vmatpush1.msra.mxu1 %v1102_v40  ;;  %1303 = vmatprep.mubr.f32.mxu1 %v6598_v61  ;;  %v1778_v46 = vld [vmem:[#allocation9 + $0xa8] sm:$0xf] }
 0x1d1   :  { %1269 = vmatprep.subr.mxu1 %v1101_v57  ;;  %v6617_v57 = vld [vmem:[#allocation52_spill] sm:$0xff] }
 0x1d2   :  { %1270 = vmatpush1.msra.mxu1 %v1100_v6 }
 0x1d3   :  { %4176 = vmatmul.mubr.msk.f32.vlgmr.msra.gmra.mxu1 %vm1120_vm1, %v1223_v2  ;;  %1469 = vmatprep.subr.mxu1 %v6598_v61  ;;  %v1777_v2 = vld [vmem:[#allocation9 + $0xa0] sm:$0xf] }
 0x1d4   :  { %1309 = vmatprep.mubr.f32.mxu1 %v6598_v61  ;;  %1470 = vmatpush1.msra.mxu1 %v5810_v39 }
 0x1d5   :  { %1471 = vmatprep.subr.mxu1 %v6598_v61 }
 0x1d6   :  { %1472 = vmatpush1.msra.mxu1 %v5814_v14 }
 0x1d7   :  { %4177 = vmatmul.mubr.msk.f32.gmra.mxu1 %vm1120_vm1, %v1224_v26  ;;  %1473 = vmatprep.subr.mxu1 %v6598_v61  ;;  %v1774_v26 = vld [vmem:[#allocation9 + $0x88] sm:$0xff] }
 0x1d8   :  { %1315 = vmatprep.mubr.f32.mxu1 %v6598_v61  ;;  %1474 = vmatpush1.msra.mxu1 %v5819_v63 }
 0x1d9   :  { %1475 = vmatprep.subr.mxu1 %v6598_v61 }
 0x1da   :  { %1476 = vmatpush1.msra.mxu1 %v5824_v12 }
 0x1db   :  { %4178 = vmatmul.mubr.msk.f32.gmra.mxu1 %vm1120_vm1, %v1225_v51  ;;  %1477 = vmatprep.subr.mxu1 %v6598_v61  ;;  %v1924_v51 = vld [vmem:[#allocation9 + $0x150] sm:$0xf] }
 0x1dc   :  { %1321 = vmatprep.mubr.f32.mxu1 %v6598_v61  ;;  %1478 = vmatpush1.msra.mxu1 %v5829_v53 }
 0x1dd   :  { %1479 = vmatprep.subr.mxu1 %v6598_v61 }
 0x1de   :  { %1480 = vmatpush1.msra.mxu1 %v5834_v19 }
 0x1df   :  { %4179 = vmatmul.mubr.msk.f32.gmra.mxu1 %vm1120_vm1, %v1226_v55  ;;  %1481 = vmatprep.subr.mxu1 %v6598_v61  ;;  %v1771_v55 = vld [vmem:[#allocation9 + $0x70] sm:$0xff] }
 0x1e0   :  { %1482 = vmatpush1.msra.mxu1 %v5839_v58 }
 0x1e1   :  { %1483 = vmatprep.subr.mxu1 %v6598_v61 }
 0x1e2   :  { %1484 = vmatpush1.msra.mxu1 %v5844_v59 }
 0x1e3   :  { %1485 = vmatprep.subr.mxu1 %v6598_v61 }
 0x1e4   :  { %1486 = vmatpush1.msra.mxu1 %v5848_v54 }
 0x1e5   :  { %1487 = vmatprep.subr.mxu1 %v6598_v61 }
 0x1e6   :  { %1488 = vmatpush1.msra.mxu1 %v5852_v0 }
 0x1e7   :  { %1489 = vmatprep.subr.mxu1 %v6598_v61 }
 0x1e8   :  { %1490 = vmatpush1.msra.mxu1 %v5856_v47 }
 0x1e9   :  { %1491 = vmatprep.subr.mxu1 %v6598_v61 }
 0x1ea   :  { %1492 = vmatpush1.msra.mxu1 %v5860_v52 }
 0x1eb   :  { %1493 = vmatprep.subr.mxu1 %v6598_v61 }
 0x1ec   :  { %1494 = vmatpush1.msra.mxu1 %v5864_v43 }
 0x1ed   :  { %1495 = vmatprep.subr.mxu1 %v6598_v61 }
 0x1ee   :  { %1496 = vmatpush1.msra.mxu1 %v5868_v29 }
 0x1ef   :  { %1497 = vmatprep.subr.mxu1 %v6598_v61 }
 0x1f0   :  { %1498 = vmatpush1.msra.mxu1 %v5872_v49 }
 0x1f1   :  { %1499 = vmatprep.subr.mxu1 %v6598_v61 }
 0x1f2   :  { %1500 = vmatpush1.msra.mxu1 %v5876_v35 }
 0x1f3   :  { %1523 = vmatprep.subr.mxu1 %v6598_v61 }
 0x1f4   :  { %1524 = vmatpush2.msra.mxu1 %v5880_v42 }
 0x1f5   :  { %1525 = vmatprep.subr.mxu1 %v6598_v61 }
 0x1f6   :  { %1526 = vmatpush2.msra.mxu1 %v5884_v50 }
 0x1f7   :  { %1527 = vmatprep.subr.mxu1 %v6598_v61 }
 0x1f8   :  { %1528 = vmatpush2.msra.mxu1 %v5888_v32 }
 0x1f9   :  { %1529 = vmatprep.subr.mxu1 %v6598_v61 }
 0x1fa   :  { %1530 = vmatpush2.msra.mxu1 %v5896_v22 }
 0x1fb   :  { %1531 = vmatprep.subr.mxu1 %v6598_v61 }
 0x1fc   :  { %1532 = vmatpush2.msra.mxu1 %v5904_v36 }
 0x1fd   :  { %1655 = vmatprep.subr.mxu1 %v6598_v61 }
 0x283   :  { %v1199_v24 = vpop.f32.mrf.mxu1 }
 0x285   :  { %v1201_v8 = vpop.f32.mrf.mxu1 }
 0x286   :  { %4180 = vmatprep.mubr.msk.f32.mxu0 %vm1349_vm2, %v1201_v8  ;;  %4184 = vmatprep.mubr.msk.f32.mxu1 %vm1349_vm2, %v1201_v8  ;;  %v1913_v8 = vld [vmem:[#allocation9 + $0xf8] sm:$0xff] }
 0x287   :  { %1427 = vmatmul.mubr.f32.vlgmr.msra.gmra.mxu0 %v1199_v24  ;;  %1534 = vmatmul.mubr.f32.vlgmr.msra.gmra.mxu1 %v1199_v24  ;;  %v1205_v25 = vpop.f32.mrf.mxu1  ;;  %v1762_v24 = vld [vmem:[#allocation9 + $0x28] sm:$0xff] }
 0x288   :  { %1571 = vmatpush1.msra.mxu0 %v6599_v15  ;;  %1656 = vmatpush1.msra.mxu1 %v5810_v39  ;;  %v1776_v39 = vld [vmem:[#allocation9 + $0x98] sm:$0xff]  ;;  %v1761_v15 = vld [vmem:[#allocation9 + $0x20] sm:$0xff] }
 0x289   :  { %1572 = vmatprep.subr.mxu0 %v6598_v61  ;;  %1657 = vmatprep.subr.mxu1 %v6598_v61  ;;  %v1207_v4 = vpop.f32.mrf.mxu1 }
 0x28a   :  { %1573 = vmatpush1.msra.mxu0 %v6600_v10  ;;  %1658 = vmatpush1.msra.mxu1 %v5814_v14  ;;  %v1775_v14 = vld [vmem:[#allocation9 + $0x90] sm:$0xff] }
 0x28b   :  { %1574 = vmatprep.subr.mxu0 %v6598_v61  ;;  %1659 = vmatprep.subr.mxu1 %v6598_v61  ;;  %v1211_v27 = vpop.f32.mrf.mxu1  ;;  %v1912_v10 = vld [vmem:[#allocation9 + $0xf0] sm:$0xff] }
 0x28c   :  { %1575 = vmatpush1.msra.mxu0 %v6601_v7  ;;  %1660 = vmatpush1.msra.mxu1 %v5819_v63  ;;  %v1925_v63 = vld [vmem:[#allocation9 + $0x158] sm:$0xf] }
 0x28d   :  { %1576 = vmatprep.subr.mxu0 %v6598_v61  ;;  %1661 = vmatprep.subr.mxu1 %v6598_v61  ;;  %v1213_v33 = vpop.f32.mrf.mxu1  ;;  %v1760_v7 = vld [vmem:[#allocation9 + $0x18] sm:$0xff] }
 0x28e   :  { %1577 = vmatpush1.msra.mxu0 %v6602_v45  ;;  %1662 = vmatpush1.msra.mxu1 %v5824_v12  ;;  %v1773_v12 = vld [vmem:[#allocation9 + $0x80] sm:$0xff]  ;;  %v1911_v45 = vld [vmem:[#allocation9 + $0xe8] sm:$0xff] }
 0x28f   :  { %1578 = vmatprep.subr.mxu0 %v6598_v61  ;;  %1663 = vmatprep.subr.mxu1 %v6598_v61  ;;  %v1217_v23 = vpop.f32.mrf.mxu1 }
 0x290   :  { %1579 = vmatpush1.msra.mxu0 %v6603_v9  ;;  %1664 = vmatpush1.msra.mxu1 %v5829_v53  ;;  %v1772_v53 = vld [vmem:[#allocation9 + $0x78] sm:$0xff]  ;;  %v1910_v9 = vld [vmem:[#allocation9 + $0xe0] sm:$0xff] }
 0x291   :  { %1580 = vmatprep.subr.mxu0 %v6598_v61  ;;  %1665 = vmatprep.subr.mxu1 %v6598_v61  ;;  %v1219_v13 = vpop.f32.mrf.mxu1 }
 0x292   :  { %1581 = vmatpush1.msra.mxu0 %v6604_v28  ;;  %1666 = vmatpush1.msra.mxu1 %v5834_v19  ;;  %v1923_v19 = vld [vmem:[#allocation9 + $0x148] sm:$0xff] }
 0x293   :  { %1582 = vmatprep.subr.mxu0 %v6598_v61  ;;  %1667 = vmatprep.subr.mxu1 %v6598_v61  ;;  %v1305_v16 = vpop.f32.mrf.mxu1  ;;  %v1758_v28 = vld [vmem:[#allocation9 + $0x8] sm:$0xff] }
 0x294   :  { %1583 = vmatpush1.msra.mxu0 %v6605_v20  ;;  %1668 = vmatpush1.msra.mxu1 %v5839_v58  ;;  %v1922_v58 = vld [vmem:[#allocation9 + $0x140] sm:$0xff] }
 0x295   :  { %1584 = vmatprep.subr.mxu0 %v6598_v61  ;;  %1669 = vmatprep.subr.mxu1 %v6598_v61  ;;  %v1307_v11 = vpop.f32.mrf.mxu1  ;;  %v1757_v20 = vld [vmem:[#allocation9] sm:$0xff] }
 0x296   :  { %1585 = vmatpush1.msra.mxu0 %v6606_v56  ;;  %1670 = vmatpush1.msra.mxu1 %v5844_v59  ;;  %v1770_v59 = vld [vmem:[#allocation9 + $0x68] sm:$0xff]  ;;  %v1908_v56 = vld [vmem:[#allocation9 + $0xd0] sm:$0xff] }
 0x297   :  { %1586 = vmatprep.subr.mxu0 %v6598_v61  ;;  %1671 = vmatprep.subr.mxu1 %v6598_v61  ;;  %v1311_v21 = vpop.f32.mrf.mxu1 }
 0x298   :  { %1587 = vmatpush1.msra.mxu0 %v6607_v60  ;;  %1672 = vmatpush1.msra.mxu1 %v5848_v54  ;;  %v1921_v54 = vld [vmem:[#allocation9 + $0x138] sm:$0xff]  ;;  %v2067_v60 = vld [vmem:[#allocation9 + $0x208] sm:$0xf] }
 0x299   :  { %1588 = vmatprep.subr.mxu0 %v6598_v61  ;;  %1673 = vmatprep.subr.mxu1 %v6598_v61  ;;  %v1313_v40 = vpop.f32.mrf.mxu1 }
 0x29a   :  { %1589 = vmatpush1.msra.mxu0 %v6608_v30  ;;  %1674 = vmatpush1.msra.mxu1 %v5852_v0  ;;  %v1769_v0 = vld [vmem:[#allocation9 + $0x60] sm:$0xff] }
 0x29b   :  { %1590 = vmatprep.subr.mxu0 %v6598_v61  ;;  %1675 = vmatprep.subr.mxu1 %v6598_v61  ;;  %v1317_v6 = vpop.f32.mrf.mxu1  ;;  %v1906_v30 = vld [vmem:[#allocation9 + $0xc0] sm:$0xff] }
 0x29c   :  { %1591 = vmatpush1.msra.mxu0 %v6609_v3  ;;  %1676 = vmatpush1.msra.mxu1 %v5856_v47  ;;  %v1920_v47 = vld [vmem:[#allocation9 + $0x130] sm:$0xff] }
 0x29d   :  { %1592 = vmatprep.subr.mxu0 %v6598_v61  ;;  %1677 = vmatprep.subr.mxu1 %v6598_v61  ;;  %v1319_v48 = vpop.f32.mrf.mxu1  ;;  %v1904_v3 = vld [vmem:[#allocation9 + $0xb0] sm:$0xff] }
 0x29e   :  { %1593 = vmatpush1.msra.mxu0 %v6610_v18  ;;  %1678 = vmatpush1.msra.mxu1 %v5860_v52  ;;  %v1768_v52 = vld [vmem:[#allocation9 + $0x58] sm:$0xff] }
 0x29f   :  { %1594 = vmatprep.subr.mxu0 %v6598_v61  ;;  %1679 = vmatprep.subr.mxu1 %v6598_v61  ;;  %v1323_v5 = vpop.f32.mrf.mxu1  ;;  %v2209_v18 = vld [vmem:[#allocation9 + $0x2b8] sm:$0xf] }
 0x2a0   :  { %1595 = vmatpush1.msra.mxu0 %v6611_v41  ;;  %1680 = vmatpush1.msra.mxu1 %v5864_v43  ;;  %v1919_v43 = vld [vmem:[#allocation9 + $0x128] sm:$0xff] }
 0x2a1   :  { %1596 = vmatprep.subr.mxu0 %v6598_v61  ;;  %1681 = vmatprep.subr.mxu1 %v6598_v61  ;;  %v1325_v37 = vpop.f32.mrf.mxu1 }
 0x2a2   :  { %1597 = vmatpush1.msra.mxu0 %v6612_v1  ;;  %1682 = vmatpush1.msra.mxu1 %v5868_v29  ;;  %v1767_v29 = vld [vmem:[#allocation9 + $0x50] sm:$0xff] }
 0x2a3   :  { %1598 = vmatprep.subr.mxu0 %v6598_v61  ;;  %1683 = vmatprep.subr.mxu1 %v6598_v61 }
 0x2a4   :  { %4181 = vmatprep.mubr.msk.f32.mxu0 %vm1349_vm2, %v1207_v4  ;;  %4185 = vmatprep.mubr.msk.f32.mxu1 %vm1349_vm2, %v1207_v4  ;;  %v1909_v4 = vld [vmem:[#allocation9 + $0xd8] sm:$0xff] }
 0x2a5   :  { %1599 = vmatpush1.msra.mxu0 %v6613_v31  ;;  %1684 = vmatpush1.msra.mxu1 %v5872_v49  ;;  %v1918_v49 = vld [vmem:[#allocation9 + $0x120] sm:$0xff] }
 0x2a6   :  { %1432 = vmatmul.mubr.f32.gmra.mxu0 %v1205_v25  ;;  %1539 = vmatmul.mubr.f32.gmra.mxu1 %v1205_v25  ;;  %v1759_v25 = vld [vmem:[#allocation9 + $0x10] sm:$0xff] }
 0x2a7   :  { %1600 = vmatprep.subr.mxu0 %v6598_v61  ;;  %1685 = vmatprep.subr.mxu1 %v6598_v61 }
 0x2a8   :  { %1601 = vmatpush1.msra.mxu0 %v6614_v62  ;;  %1686 = vmatpush1.msra.mxu1 %v5876_v35  ;;  %v1766_v35 = vld [vmem:[#allocation9 + $0x48] sm:$0xff] }
 0x2a9   :  { %1624 = vmatprep.subr.mxu0 %v6598_v61  ;;  %1709 = vmatprep.subr.mxu1 %v6598_v61 }
 0x2aa   :  { %4182 = vmatprep.mubr.msk.f32.mxu0 %vm1349_vm2, %v1213_v33  ;;  %4186 = vmatprep.mubr.msk.f32.mxu1 %vm1349_vm2, %v1213_v33  ;;  %v1905_v33 = vld [vmem:[#allocation9 + $0xb8] sm:$0xff] }
 0x2ab   :  { %1625 = vmatpush2.msra.mxu0 %v6615_v34  ;;  %1710 = vmatpush2.msra.mxu1 %v5880_v42  ;;  %v1917_v42 = vld [vmem:[#allocation9 + $0x118] sm:$0xff] }
 0x2ac   :  { %1437 = vmatmul.mubr.f32.gmra.mxu0 %v1211_v27  ;;  %1544 = vmatmul.mubr.f32.gmra.mxu1 %v1211_v27  ;;  %v1907_v27 = vld [vmem:[#allocation9 + $0xc8] sm:$0xff] }
 0x2ad   :  { %1626 = vmatprep.subr.mxu0 %v6598_v61  ;;  %1711 = vmatprep.subr.mxu1 %v6598_v61 }
 0x2ae   :  { %1627 = vmatpush2.msra.mxu0 %v6616_v44  ;;  %1712 = vmatpush2.msra.mxu1 %v5884_v50  ;;  %v1765_v50 = vld [vmem:[#allocation9 + $0x40] sm:$0xff] }
 0x2af   :  { %1628 = vmatprep.subr.mxu0 %v6598_v61  ;;  %1713 = vmatprep.subr.mxu1 %v6598_v61 }
 0x2b0   :  { %4183 = vmatprep.mubr.msk.f32.mxu0 %vm1349_vm2, %v1219_v13  ;;  %4187 = vmatprep.mubr.msk.f32.mxu1 %vm1349_vm2, %v1219_v13 }
 0x2b1   :  { %1629 = vmatpush2.msra.mxu0 %v6617_v57  ;;  %1714 = vmatpush2.msra.mxu1 %v5888_v32  ;;  %v1916_v32 = vld [vmem:[#allocation9 + $0x110] sm:$0xff] }
 0x2b2   :  { %1442 = vmatmul.mubr.f32.gmra.mxu0 %v1217_v23  ;;  %1549 = vmatmul.mubr.f32.gmra.mxu1 %v1217_v23 }
 0x2b3   :  { %1630 = vmatprep.subr.mxu0 %v6598_v61  ;;  %1715 = vmatprep.subr.mxu1 %v6598_v61 }
 0x2b4   :  { %1631 = vmatpush2.msra.mxu0 %v5894_v38  ;;  %1716 = vmatpush2.msra.mxu1 %v5896_v22  ;;  %v1764_v38 = vld [vmem:[#allocation9 + $0x38] sm:$0xff]  ;;  %v1915_v22 = vld [vmem:[#allocation9 + $0x108] sm:$0xff] }
 0x2b5   :  { %1632 = vmatprep.subr.mxu0 %v6598_v61  ;;  %1717 = vmatprep.subr.mxu1 %v6598_v61 }
 0x2b6   :  { %1633 = vmatpush2.msra.mxu0 %v5902_v17  ;;  %4188 = vmatprep.mubr.msk.f32.mxu0 %vm1349_vm2, %v1307_v11  ;;  %v1763_v17 = vld [vmem:[#allocation9 + $0x30] sm:$0xff] }
 0x2b7   :  { %1718 = vmatpush2.msra.mxu1 %v5904_v36  ;;  %4192 = vmatprep.mubr.msk.f32.mxu1 %vm1349_vm2, %v1307_v11  ;;  %v1914_v36 = vld [vmem:[#allocation9 + $0x100] sm:$0xff] }
 0x2b8   :  { %1635 = vmatmul.mubr.f32.vlgmr.msra.gmra.mxu0 %v1305_v16  ;;  %1720 = vmatmul.mubr.f32.vlgmr.msra.gmra.mxu1 %v1305_v16 }
 0x2b9   :  { %4189 = vmatprep.mubr.msk.f32.mxu0 %vm1349_vm2, %v1313_v40  ;;  %4193 = vmatprep.mubr.msk.f32.mxu1 %vm1349_vm2, %v1313_v40 }
 0x2ba   :  { %4196 = vmatprep.subr.msk.mxu0 %vm1803_vm3, %v1778_v46  ;;  %4202 = vmatprep.subr.msk.mxu1 %vm1803_vm3, %v1925_v63 }
 0x2bb   :  { %4197 = vmatpush1.msk.msra.mxu0 %vm1803_vm3, %v1777_v2  ;;  %4203 = vmatpush1.msk.msra.mxu1 %vm1803_vm3, %v1924_v51 }
 0x2bc   :  { %1640 = vmatmul.mubr.f32.gmra.mxu0 %v1311_v21  ;;  %1725 = vmatmul.mubr.f32.gmra.mxu1 %v1311_v21 }
 0x2bd   :  { %4190 = vmatprep.mubr.msk.f32.mxu0 %vm1349_vm2, %v1319_v48  ;;  %4194 = vmatprep.mubr.msk.f32.mxu1 %vm1349_vm2, %v1319_v48 }
 0x2be   :  { %1822 = vmatprep.subr.mxu0 %v1776_v39  ;;  %1956 = vmatprep.subr.mxu1 %v1923_v19 }
 0x2bf   :  { %1823 = vmatpush1.msra.mxu0 %v1775_v14  ;;  %1957 = vmatpush1.msra.mxu1 %v1922_v58 }
 0x2c0   :  { %1645 = vmatmul.mubr.f32.gmra.mxu0 %v1317_v6  ;;  %1730 = vmatmul.mubr.f32.gmra.mxu1 %v1317_v6 }
 0x2c1   :  { %4191 = vmatprep.mubr.msk.f32.mxu0 %vm1349_vm2, %v1325_v37  ;;  %4195 = vmatprep.mubr.msk.f32.mxu1 %vm1349_vm2, %v1325_v37 }
 0x2c2   :  { %1824 = vmatprep.subr.mxu0 %v1774_v26  ;;  %1958 = vmatprep.subr.mxu1 %v1921_v54 }
 0x2c3   :  { %1825 = vmatpush1.msra.mxu0 %v1773_v12  ;;  %1959 = vmatpush1.msra.mxu1 %v1920_v47 }
 0x2c4   :  { %1650 = vmatmul.mubr.f32.gmra.mxu0 %v1323_v5  ;;  %1735 = vmatmul.mubr.f32.gmra.mxu1 %v1323_v5 }
 0x2c5   :  { %1874 = vmatprep.mubr.f32.mxu0 %v6598_v61  ;;  %2008 = vmatprep.mubr.f32.mxu1 %v6598_v61 }
 0x2c6   :  { %1826 = vmatprep.subr.mxu0 %v1772_v53  ;;  %1960 = vmatprep.subr.mxu1 %v1919_v43 }
 0x2c7   :  { %1827 = vmatpush1.msra.mxu0 %v1771_v55  ;;  %1961 = vmatpush1.msra.mxu1 %v1918_v49 }
 0x2c8   :  { %1828 = vmatprep.subr.mxu0 %v1770_v59  ;;  %1962 = vmatprep.subr.mxu1 %v1917_v42 }
 0x2c9   :  { %1829 = vmatpush1.msra.mxu0 %v1769_v0  ;;  %1963 = vmatpush1.msra.mxu1 %v1916_v32 }
 0x2ca   :  { %1830 = vmatprep.subr.mxu0 %v1768_v52  ;;  %1964 = vmatprep.subr.mxu1 %v1915_v22 }
 0x2cb   :  { %1831 = vmatpush1.msra.mxu0 %v1767_v29  ;;  %1965 = vmatpush1.msra.mxu1 %v1914_v36  ;;  %v2064_v36 = vld [vmem:[#allocation9 + $0x1f0] sm:$0xff] }
 0x2cc   :  { %1832 = vmatprep.subr.mxu0 %v1766_v35  ;;  %1966 = vmatprep.subr.mxu1 %v1913_v8  ;;  %v2066_v35 = vld [vmem:[#allocation9 + $0x200] sm:$0xf] }
 0x2cd   :  { %1833 = vmatpush1.msra.mxu0 %v1765_v50  ;;  %1967 = vmatpush1.msra.mxu1 %v1912_v10 }
 0x2ce   :  { %1834 = vmatprep.subr.mxu0 %v1764_v38  ;;  %1968 = vmatprep.subr.mxu1 %v1911_v45  ;;  %v2065_v38 = vld [vmem:[#allocation9 + $0x1f8] sm:$0xff]  ;;  %v2208_v45 = vld [vmem:[#allocation9 + $0x2b0] sm:$0xf] }
 0x2cf   :  { %1835 = vmatpush1.msra.mxu0 %v1763_v17  ;;  %1969 = vmatpush1.msra.mxu1 %v1910_v9 }
 0x2d0   :  { %1836 = vmatprep.subr.mxu0 %v1762_v24  ;;  %1970 = vmatprep.subr.mxu1 %v1909_v4  ;;  %v2063_v24 = vld [vmem:[#allocation9 + $0x1e8] sm:$0xff] }
 0x2d1   :  { %1837 = vmatpush1.msra.mxu0 %v1761_v15  ;;  %1971 = vmatpush1.msra.mxu1 %v1908_v56  ;;  %v2207_v4 = vld [vmem:[#allocation9 + $0x2a8] sm:$0xff]  ;;  %v2206_v56 = vld [vmem:[#allocation9 + $0x2a0] sm:$0xff] }
 0x2d2   :  { %1838 = vmatprep.subr.mxu0 %v1760_v7  ;;  %1972 = vmatprep.subr.mxu1 %v1907_v27  ;;  %v2062_v7 = vld [vmem:[#allocation9 + $0x1e0] sm:$0xff]  ;;  %v2059_v27 = vld [vmem:[#allocation9 + $0x1c8] sm:$0xff] }
 0x2d3   :  { %1839 = vmatpush1.msra.mxu0 %v1759_v25  ;;  %1973 = vmatpush1.msra.mxu1 %v1906_v30 }
 0x2d4   :  { %1840 = vmatprep.subr.mxu0 %v1758_v28  ;;  %1974 = vmatprep.subr.mxu1 %v1905_v33  ;;  %v2061_v28 = vld [vmem:[#allocation9 + $0x1d8] sm:$0xff] }
 0x2d5   :  { %1841 = vmatpush1.msra.mxu0 %v1757_v20  ;;  %1975 = vmatpush1.msra.mxu1 %v1904_v3  ;;  %v2060_v20 = vld [vmem:[#allocation9 + $0x1d0] sm:$0xff]  ;;  %v2058_v3 = vld [vmem:[#allocation9 + $0x1c0] sm:$0xff] }
 0x2d6   :  { %4208 = vmatprep.subr.msk.mxu0 %vm1803_vm3, %v2067_v60  ;;  %4214 = vmatprep.subr.msk.mxu1 %vm1803_vm3, %v2209_v18  ;;  %v2205_v60 = vld [vmem:[#allocation9 + $0x298] sm:$0xff]  ;;  %v2204_v18 = vld [vmem:[#allocation9 + $0x290] sm:$0xff] }
 0x347   :  { %v1428_v23 = vpop.f32.mrf.mxu0  ;;  %v1535_v41 = vpop.f32.mrf.mxu1 }
 0x348   :  { %v1554_v2 = vmax.f32 %v1428_v23, %v1535_v41  ;;  %v2057_v23 = vld [vmem:[#allocation9 + $0x1b8] sm:$0xff]  ;;  %v2203_v41 = vld [vmem:[#allocation9 + $0x288] sm:$0xff] }
 0x349   :  { %v1430_v1 = vpop.f32.mrf.mxu0  ;;  %v1537_v13 = vpop.f32.mrf.mxu1 }
 0x34a   :  { %v2056_v1 = vld [vmem:[#allocation9 + $0x1b0] sm:$0xff]  ;;  %v2202_v13 = vld [vmem:[#allocation9 + $0x280] sm:$0xff] }
 0x366   :  { %v1433_v16 = vpop.f32.mrf.mxu0  ;;  %v1540_v31 = vpop.f32.mrf.mxu1 }
 0x367   :  { %v1555_v53 = vmax.f32 %v1433_v16, %v1540_v31  ;;  %v2055_v16 = vld [vmem:[#allocation9 + $0x1a8] sm:$0xff]  ;;  %v2201_v31 = vld [vmem:[#allocation9 + $0x278] sm:$0xff] }
 0x368   :  { %v1435_v62 = vpop.f32.mrf.mxu0  ;;  %v1542_v11 = vpop.f32.mrf.mxu1 }
 0x36c   :  { %v1438_v21 = vpop.f32.mrf.mxu0  ;;  %v1545_v34 = vpop.f32.mrf.mxu1 }
 0x36d   :  { %v1556_v47 = vmax.f32 %v1438_v21, %v1545_v34  ;;  %v2054_v21 = vld [vmem:[#allocation9 + $0x1a0] sm:$0xff]  ;;  %v2200_v34 = vld [vmem:[#allocation9 + $0x270] sm:$0xff] }
 0x36e   :  { %v1440_v44 = vpop.f32.mrf.mxu0  ;;  %v1547_v40 = vpop.f32.mrf.mxu1 }
 0x36f   :  { %v2053_v44 = vld [vmem:[#allocation9 + $0x198] sm:$0xff]  ;;  %v2199_v40 = vld [vmem:[#allocation9 + $0x268] sm:$0xff] }
 0x372   :  { %v1443_v57 = vpop.f32.mrf.mxu0  ;;  %v1550_v6 = vpop.f32.mrf.mxu1 }
 0x373   :  { %v1557_v22 = vmax.f32 %v1443_v57, %v1550_v6  ;;  %v2052_v57 = vld [vmem:[#allocation9 + $0x190] sm:$0xff]  ;;  %v2198_v6 = vld [vmem:[#allocation9 + $0x260] sm:$0xff] }
 0x374   :  { %v1445_v48 = vpop.f32.mrf.mxu0  ;;  %v1552_v5 = vpop.f32.mrf.mxu1 }
 0x375   :  { %v2051_v48 = vld [vmem:[#allocation9 + $0x188] sm:$0xff]  ;;  %v2197_v5 = vld [vmem:[#allocation9 + $0x258] sm:$0xff] }
 0x378   :  { %v1636_v37 = vpop.f32.mrf.mxu0  ;;  %v1721_v46 = vpop.f32.mrf.mxu1 }
 0x379   :  { %v1740_v39 = vmax.f32 %v1636_v37, %v1721_v46  ;;  %v2050_v37 = vld [vmem:[#allocation9 + $0x180] sm:$0xff]  ;;  %v2196_v46 = vld [vmem:[#allocation9 + $0x250] sm:$0xff] }
 0x37a   :  { %v1638_v14 = vpop.f32.mrf.mxu0  ;;  %v1723_v26 = vpop.f32.mrf.mxu1 }
 0x37b   :  { %v1744_v63 = vmax.f32 %v1554_v2, %v1740_v39  ;;  %v2049_v2 = vld [vmem:[#allocation9 + $0x178] sm:$0xff]  ;;  %v2195_v14 = vld [vmem:[#allocation9 + $0x248] sm:$0xff]  ;;  %v2048_v26 = vld [vmem:[#allocation9 + $0x170] sm:$0xff] }
 0x37c   :  { %v1641_v12 = vpop.f32.mrf.mxu0  ;;  %v1726_v51 = vpop.f32.mrf.mxu1 }
 0x37d   :  { %1749 = vst.msk [vmem:[#allocation2] sm:$0xff] %vm1748_vm4, %v1744_v63  ;;  %v1741_v19 = vmax.f32 %v1641_v12, %v1726_v51  ;;  %v2194_v63 = vld [vmem:[#allocation9 + $0x240] sm:$0xff]  ;;  %v2047_v12 = vld [vmem:[#allocation9 + $0x168] sm:$0xff]  ;;  %v2193_v51 = vld [vmem:[#allocation9 + $0x238] sm:$0xff] }
 0x37e   :  { %v1643_v55 = vpop.f32.mrf.mxu0  ;;  %v1728_v58 = vpop.f32.mrf.mxu1 }
 0x37f   :  { %v1745_v59 = vmax.f32 %v1555_v53, %v1741_v19  ;;  %v2046_v53 = vld [vmem:[#allocation9 + $0x160] sm:$0xff]  ;;  %v2192_v19 = vld [vmem:[#allocation9 + $0x230] sm:$0xff]  ;;  %v2191_v55 = vld [vmem:[#allocation9 + $0x228] sm:$0xff] }
 0x380   :  { %v1646_v54 = vpop.f32.mrf.mxu0  ;;  %v1731_v0 = vpop.f32.mrf.mxu1  ;;  %v2351_v58 = vld [vmem:[#allocation9 + $0x368] sm:$0xf] }
 0x381   :  { %1750 = vst.msk [vmem:[#allocation2 + $0x8] sm:$0xff] %vm1748_vm4, %v1745_v59  ;;  %v1742_v52 = vmax.f32 %v1646_v54, %v1731_v0  ;;  %v2190_v59 = vld [vmem:[#allocation9 + $0x220] sm:$0xff] }
 0x382   :  { %v1648_v43 = vpop.f32.mrf.mxu0  ;;  %v1733_v29 = vpop.f32.mrf.mxu1  ;;  %v2350_v0 = vld [vmem:[#allocation9 + $0x360] sm:$0xf] }
 0x383   :  { %v1746_v49 = vmax.f32 %v1556_v47, %v1742_v52  ;;  %v2189_v47 = vld [vmem:[#allocation9 + $0x218] sm:$0xff]  ;;  %v2188_v43 = vld [vmem:[#allocation9 + $0x210] sm:$0xff] }
 0x384   :  { %v1651_v42 = vpop.f32.mrf.mxu0  ;;  %v1736_v50 = vpop.f32.mrf.mxu1  ;;  %v1753_v32 = vld [vmem:[#allocation2] sm:$0xff]  ;;  %v2349_v52 = vld [vmem:[#allocation9 + $0x358] sm:$0xff] }
 0x385   :  { %1751 = vst.msk [vmem:[#allocation2 + $0x10] sm:$0xff] %vm1748_vm4, %v1746_v49  ;;  %v1743_v17 = vmax.f32 %v1651_v42, %v1736_v50  ;;  %4198 = vmatmul.mubr.msk.f32.vlgmr.msra.gmra.mxu0 %vm1748_vm4, %v1753_v32  ;;  %v2348_v29 = vld [vmem:[#allocation9 + $0x350] sm:$0xff]  ;;  %v2347_v49 = vld [vmem:[#allocation9 + $0x348] sm:$0xff]  ;;  %v2346_v42 = vld [vmem:[#allocation9 + $0x340] sm:$0xff] }
 0x386   :  { %4209 = vmatpush1.msk.msra.mxu0 %vm1803_vm3, %v2066_v35  ;;  %1880 = vmatprep.mubr.f32.mxu0 %v6598_v61  ;;  %v1653_v8 = vpop.f32.mrf.mxu0  ;;  %v1738_v15 = vpop.f32.mrf.mxu1  ;;  %v2345_v32 = vld [vmem:[#allocation9 + $0x338] sm:$0xff] }
 0x387   :  { %v1747_v10 = vmax.f32 %v1557_v22, %v1743_v17  ;;  %2098 = vmatprep.subr.mxu0 %v2065_v38  ;;  %v2344_v38 = vld [vmem:[#allocation9 + $0x330] sm:$0xff]  ;;  %v2343_v22 = vld [vmem:[#allocation9 + $0x328] sm:$0xff]  ;;  %v2341_v8 = vld [vmem:[#allocation9 + $0x318] sm:$0xff] }
 0x388   :  { %2099 = vmatpush1.msra.mxu0 %v2064_v36  ;;  %v1754_v25 = vld [vmem:[#allocation2 + $0x8] sm:$0xff]  ;;  %v2342_v36 = vld [vmem:[#allocation9 + $0x320] sm:$0xff] }
 0x389   :  { %v1899_v9 = vld [vmem:[#allocation2 + $0x1] sm:$0xff]  ;;  %1752 = vst.msk [vmem:[#allocation2 + $0x18] sm:$0xff] %vm1748_vm4, %v1747_v10  ;;  %2100 = vmatprep.subr.mxu0 %v2063_v24  ;;  %4199 = vmatmul.mubr.msk.f32.gmra.mxu0 %vm1748_vm4, %v1754_v25 }
 0x38a   :  { %4204 = vmatmul.mubr.msk.f32.vlgmr.msra.gmra.mxu1 %vm1748_vm4, %v1899_v9  ;;  %2101 = vmatpush1.msra.mxu0 %v2062_v7  ;;  %v2041_v54 = vld [vmem:[#allocation2 + $0x2] sm:$0xff]  ;;  %v2339_v10 = vld [vmem:[#allocation9 + $0x308] sm:$0xff]  ;;  %v2337_v9 = vld [vmem:[#allocation9 + $0x2f8] sm:$0xff] }
 0x38b   :  { %4215 = vmatpush1.msk.msra.mxu1 %vm1803_vm3, %v2208_v45  ;;  %2102 = vmatprep.subr.mxu0 %v2061_v28  ;;  %v2183_v35 = vld [vmem:[#allocation2 + $0x3] sm:$0xff]  ;;  %v2338_v45 = vld [vmem:[#allocation9 + $0x300] sm:$0xff] }
 0x38c   :  { %2240 = vmatprep.subr.mxu1 %v2207_v4  ;;  %2103 = vmatpush1.msra.mxu0 %v2060_v20  ;;  %v1755_v30 = vld [vmem:[#allocation2 + $0x10] sm:$0xff]  ;;  %v2340_v15 = vld [vmem:[#allocation9 + $0x310] sm:$0xff]  ;;  %v2335_v4 = vld [vmem:[#allocation9 + $0x2e8] sm:$0xff] }
 0x38d   :  { %2241 = vmatpush1.msra.mxu1 %v2206_v56  ;;  %1886 = vmatprep.mubr.f32.mxu0 %v6598_v61  ;;  %v1900_v33 = vld [vmem:[#allocation2 + $0x9] sm:$0xff]  ;;  %v2334_v56 = vld [vmem:[#allocation9 + $0x2e0] sm:$0xff] }
 0x38e   :  { %2014 = vmatprep.mubr.f32.mxu1 %v6598_v61  ;;  %2104 = vmatprep.subr.mxu0 %v2059_v27  ;;  %v2042_v50 = vld [vmem:[#allocation2 + $0xa] sm:$0xff]  ;;  %v2336_v28 = vld [vmem:[#allocation9 + $0x2f0] sm:$0xff] }
 0x38f   :  { %2242 = vmatprep.subr.mxu1 %v2205_v60  ;;  %4200 = vmatmul.mubr.msk.f32.gmra.mxu0 %vm1748_vm4, %v1755_v30  ;;  %v2184_v17 = vld [vmem:[#allocation2 + $0xb] sm:$0xff]  ;;  %v2332_v60 = vld [vmem:[#allocation9 + $0x2d0] sm:$0xff]  ;;  %v2331_v30 = vld [vmem:[#allocation9 + $0x2c8] sm:$0xff] }
 0x390   :  { %4205 = vmatmul.mubr.msk.f32.gmra.mxu1 %vm1748_vm4, %v1900_v33  ;;  %2105 = vmatpush1.msra.mxu0 %v2058_v3  ;;  %v1756_v62 = vld [vmem:[#allocation2 + $0x18] sm:$0xf]  ;;  %v2333_v27 = vld [vmem:[#allocation9 + $0x2d8] sm:$0xff] }
 0x391   :  { %2243 = vmatpush1.msra.mxu1 %v2204_v18  ;;  %2106 = vmatprep.subr.mxu0 %v2057_v23  ;;  %v1901_v11 = vld [vmem:[#allocation2 + $0x11] sm:$0xff]  ;;  %v1902_v39 = vld [vmem:[#allocation2 + $0x19] sm:$0xf]  ;;  %v2325_v3 = vld [vmem:[#allocation2 + $0x4] sm:$0xff] }
 0x392   :  { %2244 = vmatprep.subr.mxu1 %v2203_v41  ;;  %2107 = vmatpush1.msra.mxu0 %v2056_v1  ;;  %v2043_v24 = vld [vmem:[#allocation2 + $0x12] sm:$0xff]  ;;  %v2044_v25 = vld [vmem:[#allocation2 + $0x1a] sm:$0xf] }
 0x393   :  { %2245 = vmatpush1.msra.mxu1 %v2202_v13  ;;  %1892 = vmatprep.mubr.f32.mxu0 %v6598_v61  ;;  %v2185_v7 = vld [vmem:[#allocation2 + $0x13] sm:$0xff]  ;;  %v2186_v20 = vld [vmem:[#allocation2 + $0x1b] sm:$0xf] }
 0x394   :  { %2020 = vmatprep.mubr.f32.mxu1 %v6598_v61  ;;  %2108 = vmatprep.subr.mxu0 %v2055_v16  ;;  %v2330_v33 = vld [vmem:[#allocation9 + $0x2c0] sm:$0xff]  ;;  %v2328_v41 = vld [vmem:[#allocation2 + $0x1c] sm:$0xf] }
 0x395   :  { %2246 = vmatprep.subr.mxu1 %v2201_v31  ;;  %4201 = vmatmul.mubr.msk.f32.gmra.mxu0 %vm1748_vm4, %v1756_v62  ;;  %v2326_v18 = vld [vmem:[#allocation2 + $0xc] sm:$0xff]  ;;  %v2327_v23 = vld [vmem:[#allocation2 + $0x14] sm:$0xff] }
 0x396   :  { %4206 = vmatmul.mubr.msk.f32.gmra.mxu1 %vm1748_vm4, %v1901_v11  ;;  %2109 = vmatpush1.msra.mxu0 %v2054_v21 }
 0x397   :  { %2247 = vmatpush1.msra.mxu1 %v2200_v34  ;;  %2110 = vmatprep.subr.mxu0 %v2053_v44 }
 0x398   :  { %2248 = vmatprep.subr.mxu1 %v2199_v40  ;;  %2111 = vmatpush1.msra.mxu0 %v2052_v57 }
 0x399   :  { %2249 = vmatpush1.msra.mxu1 %v2198_v6  ;;  %2026 = vmatprep.mubr.f32.mxu1 %v6598_v61 }
 0x39a   :  { %2112 = vmatprep.subr.mxu0 %v2051_v48  ;;  %2250 = vmatprep.subr.mxu1 %v2197_v5 }
 0x39b   :  { %4207 = vmatmul.mubr.msk.f32.gmra.mxu1 %vm1748_vm4, %v1902_v39  ;;  %2113 = vmatpush1.msra.mxu0 %v2050_v37 }
 0x39c   :  { %2251 = vmatpush1.msra.mxu1 %v2196_v46  ;;  %2114 = vmatprep.subr.mxu0 %v2049_v2 }
 0x39d   :  { %2252 = vmatprep.subr.mxu1 %v2195_v14  ;;  %2115 = vmatpush1.msra.mxu0 %v2048_v26 }
 0x39e   :  { %2253 = vmatpush1.msra.mxu1 %v2194_v63  ;;  %2116 = vmatprep.subr.mxu0 %v2047_v12 }
 0x39f   :  { %2254 = vmatprep.subr.mxu1 %v2193_v51  ;;  %2117 = vmatpush1.msra.mxu0 %v2046_v53 }
 0x3a0   :  { %2150 = vmatprep.mubr.f32.mxu0 %v6598_v61  ;;  %2255 = vmatpush1.msra.mxu1 %v2192_v19 }
 0x3a1   :  { %4210 = vmatmul.mubr.msk.f32.vlgmr.msra.gmra.mxu0 %vm1748_vm4, %v2041_v54  ;;  %2256 = vmatprep.subr.mxu1 %v2191_v55 }
 0x3a2   :  { %4220 = vmatprep.subr.msk.mxu0 %vm1803_vm3, %v2351_v58  ;;  %2257 = vmatpush1.msra.mxu1 %v2190_v59 }
 0x3a3   :  { %4221 = vmatpush1.msk.msra.mxu0 %vm1803_vm3, %v2350_v0  ;;  %2258 = vmatprep.subr.mxu1 %v2189_v47  ;;  %v1779_v47 = vld [vmem:[%s6509_s6] sm:$0x3] }
 0x3a4   :  { %2382 = vmatprep.subr.mxu0 %v2349_v52  ;;  %2156 = vmatprep.mubr.f32.mxu0 %v6598_v61 }
 0x3a5   :  { %2259 = vmatpush1.msra.mxu1 %v2188_v43  ;;  %2292 = vmatprep.mubr.f32.mxu1 %v6598_v61 }
 0x3a6   :  { %2383 = vmatpush1.msra.mxu0 %v2348_v29  ;;  %4216 = vmatmul.mubr.msk.f32.vlgmr.msra.gmra.mxu1 %vm1748_vm4, %v2183_v35  ;;  %v6618_v29 = vld [vmem:[#allocation25_spill] sm:$0xff] }
 0x3a7   :  { %4211 = vmatmul.mubr.msk.f32.gmra.mxu0 %vm1748_vm4, %v2042_v50  ;;  %2384 = vmatprep.subr.mxu0 %v2347_v49  ;;  %v6619_v49 = vsub.s32 0, %v6618_v29  ;;  %v6620_v50 = vsub.s32 1, %v6618_v29 }
 0x3a8   :  { %2385 = vmatpush1.msra.mxu0 %v2346_v42  ;;  %2162 = vmatprep.mubr.f32.mxu0 %v6598_v61 }
 0x3a9   :  { %2386 = vmatprep.subr.mxu0 %v2345_v32  ;;  %2298 = vmatprep.mubr.f32.mxu1 %v6598_v61  ;;  %v1784_v35 = vrot.slane %v1779_v47, %v6619_v49  ;;  %v1788_v32 = vrot.slane %v1779_v47, %v6620_v50  ;;  %v6090_v50 = vld [vmem:[#allocation12 + $0x70] sm:$0xff] }
 0x3aa   :  { %2387 = vmatpush1.msra.mxu0 %v2344_v38  ;;  %4217 = vmatmul.mubr.msk.f32.gmra.mxu1 %vm1748_vm4, %v2184_v17 }
 0x3ab   :  { %4212 = vmatmul.mubr.msk.f32.gmra.mxu0 %vm1748_vm4, %v2043_v24  ;;  %2388 = vmatprep.subr.mxu0 %v2343_v22 }
 0x3ac   :  { %2389 = vmatpush1.msra.mxu0 %v2342_v36  ;;  %2168 = vmatprep.mubr.f32.mxu0 %v6598_v61 }
 0x3ad   :  { %2390 = vmatprep.subr.mxu0 %v2341_v8  ;;  %2304 = vmatprep.mubr.f32.mxu1 %v6598_v61 }
 0x3ae   :  { %2391 = vmatpush1.msra.mxu0 %v2340_v15  ;;  %4218 = vmatmul.mubr.msk.f32.gmra.mxu1 %vm1748_vm4, %v2185_v7 }
 0x3af   :  { %4213 = vmatmul.mubr.msk.f32.gmra.mxu0 %vm1748_vm4, %v2044_v25  ;;  %2392 = vmatprep.subr.mxu0 %v2339_v10 }
 0x3b0   :  { %2393 = vmatpush1.msra.mxu0 %v2338_v45  ;;  %2310 = vmatprep.mubr.f32.mxu1 %v6598_v61 }
 0x3b1   :  { %2394 = vmatprep.subr.mxu0 %v2337_v9  ;;  %2434 = vmatprep.mubr.f32.mxu0 %v6598_v61 }
 0x3b2   :  { %2395 = vmatpush1.msra.mxu0 %v2336_v28  ;;  %4219 = vmatmul.mubr.msk.f32.gmra.mxu1 %vm1748_vm4, %v2186_v20 }
 0x3b3   :  { %2396 = vmatprep.subr.mxu0 %v2335_v4  ;;  %2554 = vmatprep.mubr.f32.mxu1 %v6598_v61 }
 0x3b4   :  { %2397 = vmatpush1.msra.mxu0 %v2334_v56 }
 0x3b5   :  { %2398 = vmatprep.subr.mxu0 %v2333_v27 }
 0x3b6   :  { %2399 = vmatpush1.msra.mxu0 %v2332_v60 }
 0x3b7   :  { %2400 = vmatprep.subr.mxu0 %v2331_v30 }
 0x3b8   :  { %2401 = vmatpush1.msra.mxu0 %v2330_v33 }
 0x3b9   :  { %4222 = vmatmul.mubr.msk.f32.vlgmr.msra.gmra.mxu0 %vm1748_vm4, %v2325_v3 }
 0x3ba   :  { %2440 = vmatprep.mubr.f32.mxu0 %v6598_v61 }
 0x3bd   :  { %4223 = vmatmul.mubr.msk.f32.gmra.mxu0 %vm1748_vm4, %v2326_v18 }
 0x3be   :  { %2446 = vmatprep.mubr.f32.mxu0 %v6598_v61 }
 0x3c1   :  { %4224 = vmatmul.mubr.msk.f32.gmra.mxu0 %vm1748_vm4, %v2327_v23 }
 0x3c2   :  { %2452 = vmatprep.mubr.f32.mxu0 %v6598_v61 }
 0x3c5   :  { %4225 = vmatmul.mubr.msk.f32.gmra.mxu0 %vm1748_vm4, %v2328_v41 }
 0x3c6   :  { %2640 = vmatprep.mubr.f32.mxu0 %v6598_v61 }
 0x445   :  { %v1876_v1 = vpop.f32.mrf.mxu0 }
 0x446   :  { %v1877_v3 = vadd.f32 %v1876_v1, %v1784_v35 }
 0x447   :  { %v1878_v13 = vpop.f32.mrf.mxu0 }
 0x448   :  { %v1879_v27 = vadd.f32 %v1878_v13, %v1788_v32 }
 0x449   :  { %v1882_v31 = vpop.f32.mrf.mxu0 }
 0x44a   :  { %v6064_v16 = vpop.f32.mrf.mxu1  ;;  %v1883_v9 = vadd.f32 %v1882_v31, %v1784_v35 }
 0x44b   :  { %v1884_v11 = vpop.f32.mrf.mxu0 }
 0x44c   :  { %v2012_v62 = vpop.f32.mrf.mxu1  ;;  %v1885_v7 = vadd.f32 %v1884_v11, %v1788_v32 }
 0x44f   :  { %v1888_v34 = vpop.f32.mrf.mxu0 }
 0x450   :  { %v2016_v21 = vpop.f32.mrf.mxu1  ;;  %v1889_v8 = vadd.f32 %v1888_v34, %v1784_v35  ;;  %v2034_v34 = vadd.f32 %v2012_v62, %v1879_v27  ;;  %v6162_v27 = vld [vmem:[#allocation12 + $0x28] sm:$0xff] }
 0x451   :  { %v1890_v40 = vpop.f32.mrf.mxu0  ;;  %v2035_v18 = vadd.f32 %v2016_v21, %v1883_v9  ;;  %v6140_v9 = vld [vmem:[#allocation12 + $0xe0] sm:$0xff] }
 0x452   :  { %v2018_v44 = vpop.f32.mrf.mxu1  ;;  %v1891_v36 = vadd.f32 %v1890_v40, %v1788_v32 }
 0x453   :  { %v2036_v60 = vadd.f32 %v2018_v44, %v1885_v7  ;;  %v6130_v7 = vld [vmem:[#allocation12 + $0x48] sm:$0xff] }
 0x455   :  { %v1894_v6 = vpop.f32.mrf.mxu0 }
 0x456   :  { %v2022_v57 = vpop.f32.mrf.mxu1  ;;  %v1895_v38 = vadd.f32 %v1894_v6, %v1784_v35 }
 0x457   :  { %v1896_v5 = vpop.f32.mrf.mxu0  ;;  %v2037_v28 = vadd.f32 %v2022_v57, %v1889_v8  ;;  %v6116_v8 = vld [vmem:[#allocation12 + $0xf8] sm:$0xff] }
 0x458   :  { %v2024_v48 = vpop.f32.mrf.mxu1  ;;  %v1897_v24 = vadd.f32 %v1896_v5, %v1788_v32  ;;  %v6092_v32 = vld [vmem:[#allocation12 + $0x110] sm:$0xff] }
 0x459   :  { %v2038_v45 = vadd.f32 %v2024_v48, %v1891_v36  ;;  %v2033_v48 = vadd.f32 %v6064_v16, %v1877_v3  ;;  %v6108_v36 = vld [vmem:[#allocation12 + $0x100] sm:$0xff]  ;;  %v6178_v3 = vld [vmem:[#allocation12 + $0x18] sm:$0xff] }
 0x45b   :  { %v2028_v37 = vpop.f32.mrf.mxu1 }
 0x45c   :  { %v2039_v15 = vadd.f32 %v2028_v37, %v1895_v38  ;;  %v6098_v38 = vld [vmem:[#allocation12 + $0x68] sm:$0xff] }
 0x45d   :  { %v2030_v39 = vpop.f32.mrf.mxu1 }
 0x45e   :  { %v2040_v25 = vadd.f32 %v2030_v39, %v1897_v24  ;;  %v6114_v24 = vld [vmem:[#allocation12 + $0x58] sm:$0xff] }
 0x461   :  { %v2152_v46 = vpop.f32.mrf.mxu0 }
 0x463   :  { %v2154_v2 = vpop.f32.mrf.mxu0 }
 0x466   :  { %v2294_v26 = vpop.f32.mrf.mxu1 }
 0x467   :  { %v2158_v14 = vpop.f32.mrf.mxu0 }
 0x468   :  { %v2296_v12 = vpop.f32.mrf.mxu1  ;;  %v2177_v31 = vadd.f32 %v2158_v14, %v2035_v18  ;;  %v6180_v18 = vld [vmem:[#allocation12 + $0xb8] sm:$0xff] }
 0x469   :  { %v2160_v63 = vpop.f32.mrf.mxu0 }
 0x46a   :  { %v2300_v53 = vpop.f32.mrf.mxu1  ;;  %v2178_v6 = vadd.f32 %v2160_v63, %v2036_v60  ;;  %v6164_v60 = vld [vmem:[#allocation12 + $0xc8] sm:$0xff] }
 0x46b   :  { %v2164_v51 = vpop.f32.mrf.mxu0  ;;  %v2319_v1 = vadd.f32 %v2300_v53, %v2177_v31  ;;  %v2475_v53 = vld [vmem:[#allocation11] sm:$0xff]  ;;  %v6218_v31 = vld [vmem:[#allocation12 + $0x90] sm:$0xff] }
 0x46c   :  { %v2302_v55 = vpop.f32.mrf.mxu1  ;;  %v2179_v23 = vadd.f32 %v2164_v51, %v2037_v28  ;;  %v6146_v28 = vld [vmem:[#allocation12 + $0x38] sm:$0xff] }
 0x46d   :  { %v2166_v19 = vpop.f32.mrf.mxu0  ;;  %v2320_v13 = vadd.f32 %v2302_v55, %v2178_v6  ;;  %v2568_v55 = vld [vmem:[#allocation11 + $0x10] sm:$0xff]  ;;  %v6202_v6 = vld [vmem:[#allocation12] sm:$0xff] }
 0x46e   :  { %v2306_v59 = vpop.f32.mrf.mxu1  ;;  %v2180_v30 = vadd.f32 %v2166_v19, %v2038_v45  ;;  %v6132_v45 = vld [vmem:[#allocation12 + $0xe8] sm:$0xff] }
 0x46f   :  { %v2170_v58 = vpop.f32.mrf.mxu0  ;;  %v2321_v57 = vadd.f32 %v2306_v59, %v2179_v23  ;;  %v6080_v59 = vld [vmem:[#allocation12 + $0x78] sm:$0xff]  ;;  %v6186_v23 = vld [vmem:[#allocation12 + $0x10] sm:$0xff] }
 0x470   :  { %v2308_v52 = vpop.f32.mrf.mxu1  ;;  %v2181_v4 = vadd.f32 %v2170_v58, %v2039_v15  ;;  %v2176_v58 = vadd.f32 %v2154_v2, %v2034_v34  ;;  %v6122_v15 = vld [vmem:[#allocation12 + $0x50] sm:$0xff]  ;;  %v6196_v34 = vld [vmem:[#allocation12 + $0xa8] sm:$0xff] }
 0x471   :  { %v2172_v54 = vpop.f32.mrf.mxu0  ;;  %v2322_v5 = vadd.f32 %v2308_v52, %v2180_v30  ;;  %v6170_v30 = vld [vmem:[#allocation12 + $0x20] sm:$0xff] }
 0x472   :  { %v2312_v22 = vpop.f32.mrf.mxu1  ;;  %v2182_v33 = vadd.f32 %v2172_v54, %v2040_v25  ;;  %v2175_v54 = vadd.f32 %v2152_v46, %v2033_v48  ;;  %v2318_v51 = vadd.f32 %v2296_v12, %v2176_v58  ;;  %v6138_v25 = vld [vmem:[#allocation12 + $0x40] sm:$0xff]  ;;  %v6212_v48 = vld [vmem:[#allocation12 + $0x138] sm:$0xff] }
 0x473   :  { %v2323_v41 = vadd.f32 %v2312_v22, %v2181_v4  ;;  %v6100_v22 = vld [vmem:[#allocation12 + $0x108] sm:$0xff]  ;;  %v6148_v4 = vld [vmem:[#allocation12 + $0xd8] sm:$0xff]  ;;  %v6238_v58 = vld [vmem:[#allocation12 + $0x80] sm:$0xff] }
 0x474   :  { %v2314_v20 = vpop.f32.mrf.mxu1  ;;  %v2317_v62 = vadd.f32 %v2294_v26, %v2175_v54 }
 0x475   :  { %v2324_v11 = vadd.f32 %v2314_v20, %v2182_v33  ;;  %v6154_v20 = vld [vmem:[#allocation12 + $0x30] sm:$0xff]  ;;  %v6172_v33 = vld [vmem:[#allocation12 + $0xc0] sm:$0xff] }
 0x479   :  { %v2436_v0 = vpop.f32.mrf.mxu0 }
 0x47a   :  { %v2459_v16 = vadd.f32 %v2436_v0, %v2317_v62  ;;  %v6082_v0 = vld [vmem:[#allocation12 + $0x118] sm:$0xff]  ;;  %v3101_v62 = vld [vmem:[#allocation14 + $0x48] sm:$0xff] }
 0x47b   :  { %v2438_v43 = vpop.f32.mrf.mxu0 }
 0x47c   :  { %v2460_v49 = vadd.f32 %v2438_v43, %v2318_v51  ;;  %v2467_v12 = vmax.f32 %v2459_v16, 0.0  ;;  %v2476_v43 = vld [vmem:[#allocation11 + $0x8] sm:$0x3] }
 0x47d   :  { %v2442_v42 = vpop.f32.mrf.mxu0 }
 0x47e   :  { %v2461_v63 = vadd.f32 %v2442_v42, %v2319_v1  ;;  %v2468_v26 = vmax.f32 %v2460_v49, 0.0  ;;  %v2569_v42 = vld [vmem:[#allocation11 + $0x18] sm:$0x3] }
 0x47f   :  { %v2444_v17 = vpop.f32.mrf.mxu0 }
 0x480   :  { %v2462_v47 = vadd.f32 %v2444_v17, %v2320_v13  ;;  %v2469_v14 = vmax.f32 %v2461_v63, 0.0  ;;  %v6106_v17 = vld [vmem:[#allocation12 + $0x60] sm:$0xff] }
 0x481   :  { %v2448_v10 = vpop.f32.mrf.mxu0  ;;  %v6240_v13 = vld [vmem:[#allocation12 + $0x120] sm:$0xff] }
 0x482   :  { %v2463_v21 = vadd.f32 %v2448_v10, %v2321_v57  ;;  %v2470_v46 = vmax.f32 %v2462_v47, 0.0  ;;  %v6124_v10 = vld [vmem:[#allocation12 + $0xf0] sm:$0xff]  ;;  %v3100_v63 = vld [vmem:[#allocation14 + $0x40] sm:$0xff] }
 0x483   :  { %v2450_v56 = vpop.f32.mrf.mxu0  ;;  %v6220_v57 = vld [vmem:[#allocation12 + $0x130] sm:$0xff] }
 0x484   :  { %v2464_v44 = vadd.f32 %v2450_v56, %v2322_v5  ;;  %v2471_v2 = vmax.f32 %v2463_v21, 0.0  ;;  %v6156_v56 = vld [vmem:[#allocation12 + $0xd0] sm:$0xff]  ;;  %v6204_v5 = vld [vmem:[#allocation12 + $0xa0] sm:$0xff] }
 0x485   :  { %v2454_v40 = vpop.f32.mrf.mxu0 }
 0x486   :  { %v2465_v37 = vadd.f32 %v2454_v40, %v2323_v41  ;;  %v2472_v35 = vmax.f32 %v2464_v44, 0.0  ;;  %v6188_v41 = vld [vmem:[#allocation12 + $0xb0] sm:$0xff]  ;;  %v6194_v40 = vld [vmem:[#allocation12 + $0x8] sm:$0xff] }
 0x487   :  { %v2456_v39 = vpop.f32.mrf.mxu0 }
 0x488   :  { %v2466_v19 = vadd.f32 %v2456_v39, %v2324_v11  ;;  %v2473_v52 = vmax.f32 %v2465_v37, 0.0  ;;  %v6210_v11 = vld [vmem:[#allocation12 + $0x98] sm:$0xff]  ;;  %v6230_v37 = vld [vmem:[#allocation12 + $0x88] sm:$0xff] }
 0x489   :  { %v6232_v39 = vld [vmem:[#allocation12 + $0x128] sm:$0xff] }
 0x48a   :  { %v2474_v29 = vmax.f32 %v2466_v19, 0.0 }
 0x48c   :  { %4226 = vmatprep.subr.msk.mxu1 %vm1803_vm3, %v2474_v29  ;;  %4230 = vmatprep.subr.msk.mxu0 %vm1803_vm3, %v2474_v29 }
 0x48d   :  { %4227 = vmatpush1.msk.msra.mxu1 %vm1803_vm3, %v2473_v52  ;;  %4231 = vmatpush1.msk.msra.mxu0 %vm1803_vm3, %v2473_v52 }
 0x48e   :  { %2516 = vmatprep.subr.mxu1 %v2472_v35  ;;  %2602 = vmatprep.subr.mxu0 %v2472_v35 }
 0x48f   :  { %2517 = vmatpush1.msra.mxu1 %v2471_v2  ;;  %2603 = vmatpush1.msra.mxu0 %v2471_v2 }
 0x490   :  { %2518 = vmatprep.subr.mxu1 %v2470_v46  ;;  %2604 = vmatprep.subr.mxu0 %v2470_v46 }
 0x491   :  { %2519 = vmatpush1.msra.mxu1 %v2469_v14  ;;  %2605 = vmatpush1.msra.mxu0 %v2469_v14 }
 0x492   :  { %2520 = vmatprep.subr.mxu1 %v2468_v26  ;;  %2606 = vmatprep.subr.mxu0 %v2468_v26 }
 0x493   :  { %2521 = vmatpush1.msra.mxu1 %v2467_v12  ;;  %2607 = vmatpush1.msra.mxu0 %v2467_v12 }
 0x494   :  { %4228 = vmatmul.mubr.msk.f32.vlgmr.msra.gmra.mxu1 %vm2477_vm5, %v2475_v53  ;;  %4232 = vmatmul.mubr.msk.f32.vlgmr.msra.gmra.mxu0 %vm2477_vm5, %v2568_v55 }
 0x495   :  { %2560 = vmatprep.mubr.f32.mxu1 %v6598_v61  ;;  %2646 = vmatprep.mubr.f32.mxu0 %v6598_v61 }
 0x496   :  { %2680 = vmatprep.subr.mxu1 %v6598_v61  ;;  %2776 = vmatprep.subr.mxu0 %v6598_v61 }
 0x497   :  { %2681 = vmatpush1.msra.mxu1 %v6080_v59  ;;  %2777 = vmatpush1.msra.mxu0 %v6082_v0 }
 0x498   :  { %4229 = vmatmul.mubr.msk.f32.gmra.mxu1 %vm2477_vm5, %v2476_v43  ;;  %4233 = vmatmul.mubr.msk.f32.gmra.mxu0 %vm2477_vm5, %v2569_v42 }
 0x499   :  { %2682 = vmatprep.subr.mxu1 %v6598_v61  ;;  %2778 = vmatprep.subr.mxu0 %v6598_v61 }
 0x49a   :  { %2683 = vmatpush1.msra.mxu1 %v6090_v50  ;;  %2779 = vmatpush1.msra.mxu0 %v6092_v32 }
 0x49b   :  { %2684 = vmatprep.subr.mxu1 %v6598_v61  ;;  %2780 = vmatprep.subr.mxu0 %v6598_v61 }
 0x49c   :  { %2685 = vmatpush1.msra.mxu1 %v6098_v38  ;;  %2781 = vmatpush1.msra.mxu0 %v6100_v22 }
 0x49d   :  { %2686 = vmatprep.subr.mxu1 %v6598_v61  ;;  %2782 = vmatprep.subr.mxu0 %v6598_v61 }
 0x49e   :  { %2687 = vmatpush1.msra.mxu1 %v6106_v17  ;;  %2783 = vmatpush1.msra.mxu0 %v6108_v36 }
 0x49f   :  { %2688 = vmatprep.subr.mxu1 %v6598_v61  ;;  %2784 = vmatprep.subr.mxu0 %v6598_v61 }
 0x4a0   :  { %2689 = vmatpush1.msra.mxu1 %v6114_v24  ;;  %2785 = vmatpush1.msra.mxu0 %v6116_v8 }
 0x4a1   :  { %2690 = vmatprep.subr.mxu1 %v6598_v61  ;;  %2786 = vmatprep.subr.mxu0 %v6598_v61 }
 0x4a2   :  { %2691 = vmatpush1.msra.mxu1 %v6122_v15  ;;  %2787 = vmatpush1.msra.mxu0 %v6124_v10 }
 0x4a3   :  { %2692 = vmatprep.subr.mxu1 %v6598_v61  ;;  %2788 = vmatprep.subr.mxu0 %v6598_v61 }
 0x4a4   :  { %2693 = vmatpush1.msra.mxu1 %v6130_v7  ;;  %2789 = vmatpush1.msra.mxu0 %v6132_v45 }
 0x4a5   :  { %2694 = vmatprep.subr.mxu1 %v6598_v61  ;;  %2790 = vmatprep.subr.mxu0 %v6598_v61 }
 0x4a6   :  { %2695 = vmatpush1.msra.mxu1 %v6138_v25  ;;  %2791 = vmatpush1.msra.mxu0 %v6140_v9 }
 0x4a7   :  { %2696 = vmatprep.subr.mxu1 %v6598_v61  ;;  %2792 = vmatprep.subr.mxu0 %v6598_v61 }
 0x4a8   :  { %2697 = vmatpush1.msra.mxu1 %v6146_v28  ;;  %2793 = vmatpush1.msra.mxu0 %v6148_v4 }
 0x4a9   :  { %2698 = vmatprep.subr.mxu1 %v6598_v61  ;;  %2794 = vmatprep.subr.mxu0 %v6598_v61 }
 0x4aa   :  { %2699 = vmatpush1.msra.mxu1 %v6154_v20  ;;  %2795 = vmatpush1.msra.mxu0 %v6156_v56 }
 0x4ab   :  { %2700 = vmatprep.subr.mxu1 %v6598_v61  ;;  %2796 = vmatprep.subr.mxu0 %v6598_v61 }
 0x4ac   :  { %2701 = vmatpush1.msra.mxu1 %v6162_v27  ;;  %2797 = vmatpush1.msra.mxu0 %v6164_v60 }
 0x4ad   :  { %2702 = vmatprep.subr.mxu1 %v6598_v61  ;;  %2798 = vmatprep.subr.mxu0 %v6598_v61 }
 0x4ae   :  { %2703 = vmatpush1.msra.mxu1 %v6170_v30  ;;  %2799 = vmatpush1.msra.mxu0 %v6172_v33 }
 0x4af   :  { %2704 = vmatprep.subr.mxu1 %v6598_v61  ;;  %2800 = vmatprep.subr.mxu0 %v6598_v61 }
 0x4b0   :  { %2705 = vmatpush1.msra.mxu1 %v6178_v3  ;;  %2801 = vmatpush1.msra.mxu0 %v6180_v18 }
 0x4b1   :  { %2706 = vmatprep.subr.mxu1 %v6598_v61  ;;  %2802 = vmatprep.subr.mxu0 %v6598_v61 }
 0x4b2   :  { %2707 = vmatpush1.msra.mxu1 %v6186_v23  ;;  %2803 = vmatpush1.msra.mxu0 %v6188_v41 }
 0x4b3   :  { %2708 = vmatprep.subr.mxu1 %v6598_v61  ;;  %2804 = vmatprep.subr.mxu0 %v6598_v61 }
 0x4b4   :  { %2709 = vmatpush1.msra.mxu1 %v6194_v40  ;;  %2805 = vmatpush1.msra.mxu0 %v6196_v34 }
 0x4b5   :  { %2710 = vmatprep.subr.mxu1 %v6598_v61  ;;  %2806 = vmatprep.subr.mxu0 %v6598_v61 }
 0x4b6   :  { %2711 = vmatpush1.msra.mxu1 %v6202_v6  ;;  %2807 = vmatpush1.msra.mxu0 %v6204_v5 }
 0x4b7   :  { %2736 = vmatprep.subr.mxu1 %v6598_v61  ;;  %2832 = vmatprep.subr.mxu0 %v6598_v61 }
 0x4b8   :  { %2737 = vmatpush2.msra.mxu1 %v6210_v11  ;;  %2833 = vmatpush2.msra.mxu0 %v6212_v48 }
 0x4b9   :  { %2738 = vmatprep.subr.mxu1 %v6598_v61  ;;  %2834 = vmatprep.subr.mxu0 %v6598_v61 }
 0x4ba   :  { %2739 = vmatpush2.msra.mxu1 %v6218_v31  ;;  %2835 = vmatpush2.msra.mxu0 %v6220_v57 }
 0x4bb   :  { %2740 = vmatprep.subr.mxu1 %v6598_v61  ;;  %2836 = vmatprep.subr.mxu0 %v6598_v61 }
 0x4bc   :  { %2741 = vmatpush2.msra.mxu1 %v6230_v37  ;;  %2837 = vmatpush2.msra.mxu0 %v6232_v39 }
 0x4bd   :  { %2742 = vmatprep.subr.mxu1 %v6598_v61  ;;  %2838 = vmatprep.subr.mxu0 %v6598_v61 }
 0x4be   :  { %2743 = vmatpush2.msra.mxu1 %v6238_v58  ;;  %2839 = vmatpush2.msra.mxu0 %v6240_v13 }
 0x4bf   :  { %2859 = vmatprep.subr.mxu1 %v6598_v61  ;;  %2934 = vmatprep.subr.mxu0 %v6598_v61 }
 0x554   :  { %v2556_v44 = vpop.f32.mrf.mxu1  ;;  %v2642_v1 = vpop.f32.mrf.mxu0 }
 0x556   :  { %v2558_v19 = vpop.f32.mrf.mxu1  ;;  %v2644_v51 = vpop.f32.mrf.mxu0 }
 0x557   :  { %4234 = vmatprep.mubr.msk.f32.mxu1 %vm2673_vm6, %v2558_v19  ;;  %4236 = vmatprep.mubr.msk.f32.mxu0 %vm2673_vm6, %v2558_v19  ;;  %v3587_v19 = vld [vmem:[#allocation14 + $0x130] sm:$0xff] }
 0x558   :  { %2745 = vmatmul.mubr.f32.vlgmr.msra.gmra.mxu1 %v2556_v44  ;;  %2841 = vmatmul.mubr.f32.vlgmr.msra.gmra.mxu0 %v2556_v44  ;;  %v2562_v54 = vpop.f32.mrf.mxu1  ;;  %v2648_v47 = vpop.f32.mrf.mxu0  ;;  %v3424_v44 = vld [vmem:[#allocation14 + $0xc8] sm:$0xff] }
 0x559   :  { %2860 = vmatpush1.msra.mxu1 %v6080_v59  ;;  %2935 = vmatpush1.msra.mxu0 %v6082_v0 }
 0x55a   :  { %2861 = vmatprep.subr.mxu1 %v6598_v61  ;;  %2936 = vmatprep.subr.mxu0 %v6598_v61  ;;  %v2564_v21 = vpop.f32.mrf.mxu1  ;;  %v2650_v29 = vpop.f32.mrf.mxu0 }
 0x55b   :  { %2862 = vmatpush1.msra.mxu1 %v6090_v50  ;;  %2937 = vmatpush1.msra.mxu0 %v6092_v32 }
 0x55c   :  { %2863 = vmatprep.subr.mxu1 %v6598_v61  ;;  %2938 = vmatprep.subr.mxu0 %v6598_v61 }
 0x55d   :  { %2864 = vmatpush1.msra.mxu1 %v6098_v38  ;;  %2939 = vmatpush1.msra.mxu0 %v6100_v22 }
 0x55e   :  { %2865 = vmatprep.subr.mxu1 %v6598_v61  ;;  %2940 = vmatprep.subr.mxu0 %v6598_v61 }
 0x55f   :  { %2866 = vmatpush1.msra.mxu1 %v6106_v17  ;;  %2941 = vmatpush1.msra.mxu0 %v6108_v36 }
 0x560   :  { %2867 = vmatprep.subr.mxu1 %v6598_v61  ;;  %2942 = vmatprep.subr.mxu0 %v6598_v61 }
 0x561   :  { %2868 = vmatpush1.msra.mxu1 %v6114_v24  ;;  %2943 = vmatpush1.msra.mxu0 %v6116_v8  ;;  %v3013_v8 = vld [vmem:[%s6512_s9] sm:$0x3] }
 0x562   :  { %2869 = vmatprep.subr.mxu1 %v6598_v61  ;;  %2944 = vmatprep.subr.mxu0 %v6598_v61 }
 0x563   :  { %2870 = vmatpush1.msra.mxu1 %v6122_v15  ;;  %2945 = vmatpush1.msra.mxu0 %v6124_v10  ;;  %v4246_v15 = vld [vmem:[%s6512_s9 + $0x2] sm:$0x3]  ;;  %v3268_v10 = vld [vmem:[#allocation14 + $0x98] sm:$0xff] }
 0x564   :  { %2871 = vmatprep.subr.mxu1 %v6598_v61  ;;  %2946 = vmatprep.subr.mxu0 %v6598_v61 }
 0x565   :  { %2872 = vmatpush1.msra.mxu1 %v6130_v7  ;;  %2947 = vmatpush1.msra.mxu0 %v6132_v45  ;;  %v3267_v7 = vld [vmem:[#allocation14 + $0x90] sm:$0xff]  ;;  %v3266_v45 = vld [vmem:[#allocation14 + $0x88] sm:$0xff] }
 0x566   :  { %2873 = vmatprep.subr.mxu1 %v6598_v61  ;;  %2948 = vmatprep.subr.mxu0 %v6598_v61 }
 0x567   :  { %2874 = vmatpush1.msra.mxu1 %v6138_v25  ;;  %2949 = vmatpush1.msra.mxu0 %v6140_v9  ;;  %v3265_v25 = vld [vmem:[#allocation14 + $0x80] sm:$0xff]  ;;  %v3264_v9 = vld [vmem:[#allocation14 + $0x78] sm:$0xff] }
 0x568   :  { %2875 = vmatprep.subr.mxu1 %v6598_v61  ;;  %2950 = vmatprep.subr.mxu0 %v6598_v61 }
 0x569   :  { %2876 = vmatpush1.msra.mxu1 %v6146_v28  ;;  %2951 = vmatpush1.msra.mxu0 %v6148_v4  ;;  %v3263_v28 = vld [vmem:[#allocation14 + $0x70] sm:$0xff]  ;;  %v3262_v4 = vld [vmem:[#allocation14 + $0x68] sm:$0xff] }
 0x56a   :  { %2877 = vmatprep.subr.mxu1 %v6598_v61  ;;  %2952 = vmatprep.subr.mxu0 %v6598_v61 }
 0x56b   :  { %2878 = vmatpush1.msra.mxu1 %v6154_v20  ;;  %2953 = vmatpush1.msra.mxu0 %v6156_v56  ;;  %v3261_v20 = vld [vmem:[#allocation14 + $0x60] sm:$0xff]  ;;  %v3099_v56 = vld [vmem:[#allocation14 + $0x38] sm:$0xff] }
 0x56c   :  { %2879 = vmatprep.subr.mxu1 %v6598_v61  ;;  %2954 = vmatprep.subr.mxu0 %v6598_v61 }
 0x56d   :  { %2880 = vmatpush1.msra.mxu1 %v6162_v27  ;;  %2955 = vmatpush1.msra.mxu0 %v6164_v60  ;;  %v3098_v27 = vld [vmem:[#allocation14 + $0x30] sm:$0xff]  ;;  %v3097_v60 = vld [vmem:[#allocation14 + $0x28] sm:$0xff] }
 0x56e   :  { %2881 = vmatprep.subr.mxu1 %v6598_v61  ;;  %2956 = vmatprep.subr.mxu0 %v6598_v61 }
 0x56f   :  { %2882 = vmatpush1.msra.mxu1 %v6170_v30  ;;  %2957 = vmatpush1.msra.mxu0 %v6172_v33  ;;  %v3096_v30 = vld [vmem:[#allocation14 + $0x20] sm:$0xff]  ;;  %v3095_v33 = vld [vmem:[#allocation14 + $0x18] sm:$0xff] }
 0x570   :  { %2883 = vmatprep.subr.mxu1 %v6598_v61  ;;  %2958 = vmatprep.subr.mxu0 %v6598_v61 }
 0x571   :  { %2884 = vmatpush1.msra.mxu1 %v6178_v3  ;;  %2959 = vmatpush1.msra.mxu0 %v6180_v18  ;;  %v3094_v3 = vld [vmem:[#allocation14 + $0x10] sm:$0xff]  ;;  %v3260_v18 = vld [vmem:[#allocation14 + $0x58] sm:$0xff] }
 0x572   :  { %2885 = vmatprep.subr.mxu1 %v6598_v61  ;;  %2960 = vmatprep.subr.mxu0 %v6598_v61 }
 0x573   :  { %2886 = vmatpush1.msra.mxu1 %v6186_v23  ;;  %2961 = vmatpush1.msra.mxu0 %v6188_v41  ;;  %v3093_v23 = vld [vmem:[#allocation14 + $0x8] sm:$0xff]  ;;  %v3259_v41 = vld [vmem:[#allocation14 + $0x50] sm:$0xff] }
 0x574   :  { %2887 = vmatprep.subr.mxu1 %v6598_v61  ;;  %2962 = vmatprep.subr.mxu0 %v6598_v61 }
 0x575   :  { %2888 = vmatpush1.msra.mxu1 %v6194_v40  ;;  %2963 = vmatpush1.msra.mxu0 %v6196_v34  ;;  %v3092_v40 = vld [vmem:[#allocation14] sm:$0xff]  ;;  %v3428_v34 = vld [vmem:[#allocation14 + $0xe8] sm:$0xff] }
 0x576   :  { %2889 = vmatprep.subr.mxu1 %v6598_v61  ;;  %2964 = vmatprep.subr.mxu0 %v6598_v61 }
 0x577   :  { %2890 = vmatpush1.msra.mxu1 %v6202_v6  ;;  %2965 = vmatpush1.msra.mxu0 %v6204_v5  ;;  %v3427_v5 = vld [vmem:[#allocation14 + $0xe0] sm:$0xff] }
 0x578   :  { %2915 = vmatprep.subr.mxu1 %v6598_v61  ;;  %2990 = vmatprep.subr.mxu0 %v6598_v61 }
 0x579   :  { %2916 = vmatpush2.msra.mxu1 %v6210_v11  ;;  %2991 = vmatpush2.msra.mxu0 %v6212_v48 }
 0x57a   :  { %2917 = vmatprep.subr.mxu1 %v6598_v61  ;;  %2992 = vmatprep.subr.mxu0 %v6598_v61 }
 0x57b   :  { %4235 = vmatprep.mubr.msk.f32.mxu1 %vm2673_vm6, %v2564_v21  ;;  %4237 = vmatprep.mubr.msk.f32.mxu0 %vm2673_vm6, %v2564_v21  ;;  %v3422_v21 = vld [vmem:[#allocation14 + $0xb8] sm:$0xff] }
 0x57c   :  { %2918 = vmatpush2.msra.mxu1 %v6218_v31  ;;  %2993 = vmatpush2.msra.mxu0 %v6220_v57  ;;  %v3426_v31 = vld [vmem:[#allocation14 + $0xd8] sm:$0xff]  ;;  %v4250_v57 = vld [vmem:[%s6512_s9 + $0x4] sm:$0x3] }
 0x57d   :  { %2750 = vmatmul.mubr.f32.gmra.mxu1 %v2562_v54  ;;  %2846 = vmatmul.mubr.f32.gmra.mxu0 %v2562_v54  ;;  %v3423_v54 = vld [vmem:[#allocation14 + $0xc0] sm:$0xff] }
 0x57e   :  { %2919 = vmatprep.subr.mxu1 %v6598_v61  ;;  %2994 = vmatprep.subr.mxu0 %v6598_v61 }
 0x57f   :  { %2920 = vmatpush2.msra.mxu1 %v6230_v37  ;;  %2995 = vmatpush2.msra.mxu0 %v6232_v39  ;;  %v3425_v39 = vld [vmem:[#allocation14 + $0xd0] sm:$0xff] }
 0x580   :  { %2921 = vmatprep.subr.mxu1 %v6598_v61  ;;  %2996 = vmatprep.subr.mxu0 %v6598_v61 }
 0x581   :  { %2922 = vmatpush2.msra.mxu1 %v6238_v58  ;;  %4238 = vmatprep.mubr.msk.f32.mxu1 %vm2673_vm6, %v2644_v51  ;;  %v4254_v58 = vld [vmem:[%s6512_s9 + $0x6] sm:$0x3] }
 0x582   :  { %2997 = vmatpush2.msra.mxu0 %v6240_v13  ;;  %4240 = vmatprep.mubr.msk.f32.mxu0 %vm2673_vm6, %v2644_v51  ;;  %v3588_v13 = vld [vmem:[#allocation14 + $0x138] sm:$0xff]  ;;  %v3585_v51 = vld [vmem:[#allocation14 + $0x120] sm:$0xff] }
 0x583   :  { %2924 = vmatmul.mubr.f32.vlgmr.msra.gmra.mxu1 %v2642_v1  ;;  %2999 = vmatmul.mubr.f32.vlgmr.msra.gmra.mxu0 %v2642_v1  ;;  %v3586_v1 = vld [vmem:[#allocation14 + $0x128] sm:$0xff] }
 0x584   :  { %4239 = vmatprep.mubr.msk.f32.mxu1 %vm2673_vm6, %v2650_v29  ;;  %4241 = vmatprep.mubr.msk.f32.mxu0 %vm2673_vm6, %v2650_v29  ;;  %v3584_v29 = vld [vmem:[#allocation14 + $0x118] sm:$0xff] }
 0x585   :  { %4365 = vmatprep.subr.mxu1 %v6598_v61  ;;  %4372 = vmatprep.subr.mxu0 %v6598_v61 }
 0x586   :  { %4373 = vmatpush3.msra.mxu0 %v3101_v62  ;;  %v3583_v62 = vld [vmem:[#allocation14 + $0x110] sm:$0xff] }
 0x587   :  { %2929 = vmatmul.mubr.f32.gmra.mxu1 %v2648_v47  ;;  %3004 = vmatmul.mubr.f32.gmra.mxu0 %v2648_v47  ;;  %v3421_v47 = vld [vmem:[#allocation14 + $0xb0] sm:$0xff] }
 0x588   :  { %4369 = vmatprep.mubr.msk.f32.mxu1 %vm4815_vm7, %v6598_v61  ;;  %4392 = vmatprep.mubr.msk.f32.mxu0 %vm4815_vm7, %v6598_v61 }
 0x589   :  { %4374 = vmatprep.subr.mxu0 %v6598_v61 }
 0x58a   :  { %4375 = vmatpush3.msra.mxu0 %v3100_v63  ;;  %v3420_v63 = vld [vmem:[#allocation14 + $0xa8] sm:$0xff] }
 0x58b   :  { %4376 = vmatprep.subr.mxu0 %v6598_v61 }
 0x58c   :  { %4377 = vmatpush3.msra.mxu0 %v3099_v56  ;;  %v3833_v56 = vld [vmem:[#allocation15 + $0x48] sm:$0xff] }
 0x58d   :  { %4378 = vmatprep.subr.mxu0 %v6598_v61 }
 0x58e   :  { %4379 = vmatpush3.msra.mxu0 %v3098_v27  ;;  %v3832_v27 = vld [vmem:[#allocation15 + $0x40] sm:$0xff] }
 0x58f   :  { %4380 = vmatprep.subr.mxu0 %v6598_v61 }
 0x590   :  { %4381 = vmatpush3.msra.mxu0 %v3097_v60  ;;  %v3831_v60 = vld [vmem:[#allocation15 + $0x38] sm:$0xff] }
 0x591   :  { %4382 = vmatprep.subr.mxu0 %v6598_v61 }
 0x592   :  { %4383 = vmatpush3.msra.mxu0 %v3096_v30  ;;  %v3830_v30 = vld [vmem:[#allocation15 + $0x30] sm:$0xff] }
 0x593   :  { %4384 = vmatprep.subr.mxu0 %v6598_v61 }
 0x594   :  { %4385 = vmatpush3.msra.mxu0 %v3095_v33  ;;  %v3829_v33 = vld [vmem:[#allocation15 + $0x28] sm:$0xff] }
 0x595   :  { %4386 = vmatprep.subr.mxu0 %v6598_v61 }
 0x596   :  { %4387 = vmatpush3.msra.mxu0 %v3094_v3  ;;  %v3828_v3 = vld [vmem:[#allocation15 + $0x20] sm:$0xff] }
 0x597   :  { %4388 = vmatprep.subr.mxu0 %v6598_v61 }
 0x598   :  { %4389 = vmatpush3.msra.mxu0 %v3093_v23 }
 0x599   :  { %4390 = vmatprep.subr.mxu0 %v6598_v61 }
 0x59a   :  { %4391 = vmatpush3.msra.mxu0 %v3092_v40 }
 0x59b   :  { %4432 = vmatprep.subr.mxu0 %v6598_v61 }
 0x618   :  { %v2746_v52 = vpop.f32.mrf.mxu1  ;;  %v2842_v49 = vpop.f32.mrf.mxu0 }
 0x619   :  { %v2851_v17 = vmax.f32 %v2746_v52, %v2842_v49  ;;  %v3582_v52 = vld [vmem:[#allocation14 + $0x108] sm:$0xff]  ;;  %v3419_v49 = vld [vmem:[#allocation14 + $0xa0] sm:$0xff] }
 0x61a   :  { %v2748_v35 = vpop.f32.mrf.mxu1  ;;  %v2844_v16 = vpop.f32.mrf.mxu0 }
 0x61b   :  { %v3581_v35 = vld [vmem:[#allocation14 + $0x100] sm:$0xff]  ;;  %v3580_v16 = vld [vmem:[#allocation14 + $0xf8] sm:$0xff] }
 0x63d   :  { %v2751_v2 = vpop.f32.mrf.mxu1  ;;  %v2847_v46 = vpop.f32.mrf.mxu0 }
 0x63e   :  { %v2852_v42 = vmax.f32 %v2751_v2, %v2847_v46  ;;  %v3579_v2 = vld [vmem:[#allocation14 + $0xf0] sm:$0xff]  ;;  %v4244_v46 = vld [vmem:[%s6514_s11] ss:$0 sm:$0xff] }
 0x63f   :  { %v2753_v14 = vpop.f32.mrf.mxu1  ;;  %v2849_v26 = vpop.f32.mrf.mxu0 }
 0x643   :  { %v2925_v12 = vpop.f32.mrf.mxu1  ;;  %v3000_v53 = vpop.f32.mrf.mxu0 }
 0x644   :  { %v3009_v50 = vmax.f32 %v2925_v12, %v3000_v53 }
 0x645   :  { %v2927_v55 = vpop.f32.mrf.mxu1  ;;  %v3002_v59 = vpop.f32.mrf.mxu0 }
 0x646   :  { %v6342_v24 = vmax.f32 %v2851_v17, %v3009_v50  ;;  %v3746_v17 = vld [vmem:[#allocation14 + $0x178] sm:$0xff] }
 0x647   :  { %v2930_v0 = vpop.f32.mrf.mxu1  ;;  %v3005_v43 = vpop.f32.mrf.mxu0 }
 0x648   :  { %v3010_v32 = vmax.f32 %v2930_v0, %v3005_v43 }
 0x649   :  { %v2932_v38 = vpop.f32.mrf.mxu1  ;;  %v3007_v22 = vpop.f32.mrf.mxu0 }
 0x64a   :  { %v6340_v36 = vmax.f32 %v2852_v42, %v3010_v32  ;;  %v4258_v42 = vld [vmem:[%s6512_s9 + $0x8] sm:$0x3]  ;;  %v3748_v32 = vld [vmem:[#allocation14 + $0x188] sm:$0xff] }
 0x64b   :  { %v3747_v38 = vld [vmem:[#allocation14 + $0x180] sm:$0xff] }
 0x64c   :  { %4366 = vmatpush3.msk.msra.mxu1 %vm3018_vm8, %v6340_v36 }
 0x64d   :  { %4367 = vmatprep.subr.mxu1 %v6598_v61 }
 0x64e   :  { %4368 = vmatpush3.msra.mxu1 %v6342_v24 }
 0x64f   :  { %4370 = vmatmul.mubr.msk.f32.vlgmr.msra.gmra.mxu1 %vm3014_vm9, %v3013_v8  ;;  %4395 = vmatprep.subr.mxu1 %v6598_v61  ;;  %v3743_v8 = vld [vmem:[#allocation14 + $0x160] sm:$0xff] }
 0x650   :  { %4396 = vmatpush3.msk.msra.mxu1 %vm3018_vm8, %v6340_v36  ;;  %4399 = vmatprep.mubr.msk.f32.mxu1 %vm4815_vm7, %v6598_v61 }
 0x651   :  { %4397 = vmatprep.subr.mxu1 %v6598_v61 }
 0x652   :  { %4398 = vmatpush3.msra.mxu1 %v6342_v24 }
 0x653   :  { %4400 = vmatmul.mubr.msk.f32.vlgmr.msra.gmra.mxu1 %vm3014_vm9, %v4246_v15  ;;  %4402 = vmatprep.subr.mxu1 %v6598_v61  ;;  %v3742_v15 = vld [vmem:[#allocation14 + $0x158] sm:$0xff] }
 0x654   :  { %4403 = vmatpush3.msra.mxu1 %v3268_v10  ;;  %4422 = vmatprep.mubr.msk.f32.mxu1 %vm4815_vm7, %v6598_v61  ;;  %v3741_v10 = vld [vmem:[#allocation14 + $0x150] sm:$0xff] }
 0x655   :  { %4404 = vmatprep.subr.mxu1 %v6598_v61 }
 0x656   :  { %4405 = vmatpush3.msra.mxu1 %v3267_v7  ;;  %v3740_v7 = vld [vmem:[#allocation14 + $0x148] sm:$0xff] }
 0x657   :  { %4406 = vmatprep.subr.mxu1 %v6598_v61 }
 0x658   :  { %4407 = vmatpush3.msra.mxu1 %v3266_v45  ;;  %v3739_v45 = vld [vmem:[#allocation14 + $0x140] sm:$0xff] }
 0x659   :  { %4408 = vmatprep.subr.mxu1 %v6598_v61 }
 0x65a   :  { %4409 = vmatpush3.msra.mxu1 %v3265_v25  ;;  %v3838_v25 = vld [vmem:[#allocation15 + $0x70] sm:$0xff] }
 0x65b   :  { %4410 = vmatprep.subr.mxu1 %v6598_v61 }
 0x65c   :  { %4411 = vmatpush3.msra.mxu1 %v3264_v9  ;;  %v3837_v9 = vld [vmem:[#allocation15 + $0x68] sm:$0xff] }
 0x65d   :  { %4412 = vmatprep.subr.mxu1 %v6598_v61 }
 0x65e   :  { %4413 = vmatpush3.msra.mxu1 %v3263_v28  ;;  %v3836_v28 = vld [vmem:[#allocation15 + $0x60] sm:$0xff] }
 0x65f   :  { %4414 = vmatprep.subr.mxu1 %v6598_v61 }
 0x660   :  { %4415 = vmatpush3.msra.mxu1 %v3262_v4  ;;  %v3835_v4 = vld [vmem:[#allocation15 + $0x58] sm:$0xff] }
 0x661   :  { %4416 = vmatprep.subr.mxu1 %v6598_v61 }
 0x662   :  { %4417 = vmatpush3.msra.mxu1 %v3261_v20  ;;  %v3834_v20 = vld [vmem:[#allocation15 + $0x50] sm:$0xff] }
 0x663   :  { %4418 = vmatprep.subr.mxu1 %v6598_v61 }
 0x664   :  { %4419 = vmatpush3.msra.mxu1 %v3260_v18  ;;  %v3827_v18 = vld [vmem:[#allocation15 + $0x18] sm:$0xff] }
 0x665   :  { %4420 = vmatprep.subr.mxu1 %v6598_v61 }
 0x666   :  { %4421 = vmatpush3.msra.mxu1 %v3259_v41 }
 0x667   :  { %4425 = vmatprep.subr.mxu1 %v6598_v61 }
 0x70f   :  { %v3088_v6 = vpop.f32.mrf.mxu1 }
 0x710   :  { %4393 = vmatmul.mubr.msk.f32.vlgmr.msra.gmra.mxu0 %vm3109_vm10, %v3088_v6 }
 0x711   :  { %v4371_v11 = vpop.f32.mrf.mxu1  ;;  %4433 = vmatpush3.msra.mxu0 %v3428_v34  ;;  %4452 = vmatprep.mubr.msk.f32.mxu0 %vm4815_vm7, %v6598_v61 }
 0x712   :  { %4434 = vmatprep.subr.mxu0 %v6598_v61 }
 0x713   :  { %v3254_v48 = vpop.f32.mrf.mxu1  ;;  %4435 = vmatpush3.msra.mxu0 %v3427_v5 }
 0x714   :  { %4423 = vmatmul.mubr.msk.f32.vlgmr.msra.gmra.mxu1 %vm3109_vm10, %v3254_v48  ;;  %4436 = vmatprep.subr.mxu0 %v6598_v61 }
 0x715   :  { %4426 = vmatpush3.msk.msra.mxu1 %vm3018_vm8, %v6340_v36  ;;  %4429 = vmatprep.mubr.msk.f32.mxu1 %vm4815_vm7, %v6598_v61  ;;  %v4401_v37 = vpop.f32.mrf.mxu1 }
 0x716   :  { %4427 = vmatprep.subr.mxu1 %v6598_v61  ;;  %4437 = vmatpush3.msra.mxu0 %v3426_v31  ;;  %v3826_v31 = vld [vmem:[#allocation15 + $0x10] sm:$0xff]  ;;  %v3824_v37 = vld [vmem:[#allocation15] sm:$0xff] }
 0x717   :  { %4428 = vmatpush3.msra.mxu1 %v6342_v24  ;;  %4438 = vmatprep.subr.mxu0 %v6598_v61 }
 0x718   :  { %4455 = vmatprep.subr.mxu1 %v6598_v61  ;;  %4430 = vmatmul.mubr.msk.f32.vlgmr.msra.gmra.mxu1 %vm3014_vm9, %v4250_v57  ;;  %v3825_v57 = vld [vmem:[#allocation15 + $0x8] sm:$0xff] }
 0x719   :  { %4456 = vmatpush3.msk.msra.mxu1 %vm3018_vm8, %v6340_v36  ;;  %4459 = vmatprep.mubr.msk.f32.mxu1 %vm4815_vm7, %v6598_v61 }
 0x71a   :  { %4457 = vmatprep.subr.mxu1 %v6598_v61  ;;  %4439 = vmatpush3.msra.mxu0 %v3425_v39  ;;  %v3931_v39 = vld [vmem:[#allocation17 + $0x50] sm:$0xf] }
 0x71b   :  { %4458 = vmatpush3.msra.mxu1 %v6342_v24  ;;  %4440 = vmatprep.subr.mxu0 %v6598_v61 }
 0x71c   :  { %4460 = vmatmul.mubr.msk.f32.vlgmr.msra.gmra.mxu1 %vm3014_vm9, %v4254_v58  ;;  %4462 = vmatprep.subr.mxu1 %v6598_v61  ;;  %v3930_v58 = vld [vmem:[#allocation17 + $0x48] sm:$0xff] }
 0x71d   :  { %4463 = vmatpush3.msra.mxu1 %v3588_v13  ;;  %4441 = vmatpush3.msra.mxu0 %v3424_v44  ;;  %v3929_v13 = vld [vmem:[#allocation17 + $0x40] sm:$0xff]  ;;  %v3928_v44 = vld [vmem:[#allocation17 + $0x38] sm:$0xff] }
 0x71e   :  { %4464 = vmatprep.subr.mxu1 %v6598_v61  ;;  %4442 = vmatprep.subr.mxu0 %v6598_v61 }
 0x71f   :  { %4465 = vmatpush3.msra.mxu1 %v3587_v19  ;;  %4443 = vmatpush3.msra.mxu0 %v3423_v54  ;;  %v3927_v19 = vld [vmem:[#allocation17 + $0x30] sm:$0xff]  ;;  %v3926_v54 = vld [vmem:[#allocation17 + $0x28] sm:$0xff] }
 0x720   :  { %4466 = vmatprep.subr.mxu1 %v6598_v61  ;;  %4444 = vmatprep.subr.mxu0 %v6598_v61 }
 0x721   :  { %4467 = vmatpush3.msra.mxu1 %v3586_v1  ;;  %4445 = vmatpush3.msra.mxu0 %v3422_v21  ;;  %v3925_v1 = vld [vmem:[#allocation17 + $0x20] sm:$0xff]  ;;  %v3924_v21 = vld [vmem:[#allocation17 + $0x18] sm:$0xff] }
 0x722   :  { %4468 = vmatprep.subr.mxu1 %v6598_v61  ;;  %4446 = vmatprep.subr.mxu0 %v6598_v61 }
 0x723   :  { %4469 = vmatpush3.msra.mxu1 %v3585_v51  ;;  %4447 = vmatpush3.msra.mxu0 %v3421_v47 }
 0x724   :  { %4470 = vmatprep.subr.mxu1 %v6598_v61  ;;  %4448 = vmatprep.subr.mxu0 %v6598_v61 }
 0x725   :  { %4471 = vmatpush3.msra.mxu1 %v3584_v29  ;;  %4482 = vmatprep.mubr.msk.f32.mxu1 %vm4815_vm7, %v6598_v61 }
 0x726   :  { %4472 = vmatprep.subr.mxu1 %v6598_v61  ;;  %4449 = vmatpush3.msra.mxu0 %v3420_v63  ;;  %v3923_v63 = vld [vmem:[#allocation17 + $0x10] sm:$0xff] }
 0x727   :  { %4473 = vmatpush3.msra.mxu1 %v3583_v62  ;;  %4450 = vmatprep.subr.mxu0 %v6598_v61 }
 0x728   :  { %4474 = vmatprep.subr.mxu1 %v6598_v61  ;;  %4451 = vmatpush3.msra.mxu0 %v3419_v49  ;;  %v3921_v49 = vld [vmem:[#allocation17] sm:$0xff] }
 0x729   :  { %4475 = vmatpush3.msra.mxu1 %v3582_v52  ;;  %4485 = vmatprep.subr.mxu0 %v6598_v61  ;;  %v3922_v52 = vld [vmem:[#allocation17 + $0x8] sm:$0xff] }
 0x72a   :  { %4476 = vmatprep.subr.mxu1 %v6598_v61 }
 0x72b   :  { %4477 = vmatpush3.msra.mxu1 %v3581_v35  ;;  %v4262_v35 = vld [vmem:[%s6516_s13] ss:$0 sm:$0xff] }
 0x72c   :  { %4478 = vmatprep.subr.mxu1 %v6598_v61 }
 0x72d   :  { %4479 = vmatpush3.msra.mxu1 %v3580_v16 }
 0x72e   :  { %4480 = vmatprep.subr.mxu1 %v6598_v61 }
 0x72f   :  { %4481 = vmatpush3.msra.mxu1 %v3579_v2 }
 0x730   :  { %4515 = vmatprep.subr.mxu1 %v6598_v61 }
 0x7d0   :  { %v3179_v14 = vpop.f32.mrf.mxu0 }
 0x7d1   :  { %v3180_v12 = vadd.f32 %v4244_v46, %v3179_v14 }
 0x7d2   :  { %v4394_v26 = vpop.f32.mrf.mxu0 }
 0x7d3   :  { %v4264_v26 = vld [vmem:[%s6518_s15] ss:$0 sm:$0xff] }
 0x7d4   :  { %v3338_v53 = vpop.f32.mrf.mxu1 }
 0x7d5   :  { %v6435_v55 = vadd.f32 %v3338_v53, %v3180_v12 }
 0x7d6   :  { %v4424_v59 = vpop.f32.mrf.mxu1 }
 0x7d8   :  { %v3414_v0 = vpop.f32.mrf.mxu1 }
 0x7d9   :  { %4453 = vmatmul.mubr.msk.f32.vlgmr.msra.gmra.mxu0 %vm3109_vm10, %v3414_v0 }
 0x7da   :  { %4486 = vmatpush3.msk.msra.mxu0 %vm3018_vm8, %v6340_v36  ;;  %v4431_v43 = vpop.f32.mrf.mxu1  ;;  %4489 = vmatprep.mubr.msk.f32.mxu0 %vm4815_vm7, %v6598_v61  ;;  %v3745_v36 = vld [vmem:[#allocation14 + $0x170] sm:$0xff] }
 0x7db   :  { %4487 = vmatprep.subr.mxu0 %v6598_v61 }
 0x7dc   :  { %4488 = vmatpush3.msra.mxu0 %v6342_v24  ;;  %v3574_v50 = vpop.f32.mrf.mxu1  ;;  %v3744_v24 = vld [vmem:[#allocation14 + $0x168] sm:$0xff] }
 0x7dd   :  { %4483 = vmatmul.mubr.msk.f32.vlgmr.msra.gmra.mxu1 %vm3109_vm10, %v3574_v50  ;;  %4490 = vmatmul.mubr.msk.f32.vlgmr.msra.gmra.mxu0 %vm3014_vm9, %v4258_v42 }
 0x7de   :  { %4492 = vmatprep.subr.mxu0 %v6598_v61  ;;  %v4461_v22 = vpop.f32.mrf.mxu1  ;;  %4512 = vmatprep.mubr.msk.f32.mxu0 %vm4815_vm7, %v6598_v61 }
 0x7df   :  { %4493 = vmatpush3.msra.mxu0 %v3748_v32  ;;  %4545 = vmatprep.mubr.msk.f32.mxu1 %vm4815_vm7, %v6598_v61 }
 0x7e0   :  { %4494 = vmatprep.subr.mxu0 %v6598_v61  ;;  %4516 = vmatpush3.msra.mxu1 %v3838_v25 }
 0x7e1   :  { %4495 = vmatpush3.msra.mxu0 %v3747_v38  ;;  %4517 = vmatprep.subr.mxu1 %v6598_v61 }
 0x7e2   :  { %4496 = vmatprep.subr.mxu0 %v6598_v61  ;;  %4518 = vmatpush3.msra.mxu1 %v3837_v9 }
 0x7e3   :  { %4497 = vmatpush3.msra.mxu0 %v3746_v17  ;;  %4519 = vmatprep.subr.mxu1 %v6598_v61 }
 0x7e4   :  { %4498 = vmatprep.subr.mxu0 %v6598_v61  ;;  %4520 = vmatpush3.msra.mxu1 %v3836_v28 }
 0x7e5   :  { %4499 = vmatpush3.msra.mxu0 %v3745_v36  ;;  %4521 = vmatprep.subr.mxu1 %v6598_v61 }
 0x7e6   :  { %4500 = vmatprep.subr.mxu0 %v6598_v61  ;;  %4522 = vmatpush3.msra.mxu1 %v3835_v4 }
 0x7e7   :  { %4501 = vmatpush3.msra.mxu0 %v3744_v24  ;;  %4523 = vmatprep.subr.mxu1 %v6598_v61 }
 0x7e8   :  { %4502 = vmatprep.subr.mxu0 %v6598_v61  ;;  %4524 = vmatpush3.msra.mxu1 %v3834_v20 }
 0x7e9   :  { %4503 = vmatpush3.msra.mxu0 %v3743_v8  ;;  %4525 = vmatprep.subr.mxu1 %v6598_v61 }
 0x7ea   :  { %4504 = vmatprep.subr.mxu0 %v6598_v61  ;;  %4526 = vmatpush3.msra.mxu1 %v3833_v56 }
 0x7eb   :  { %4505 = vmatpush3.msra.mxu0 %v3742_v15  ;;  %4527 = vmatprep.subr.mxu1 %v6598_v61 }
 0x7ec   :  { %4506 = vmatprep.subr.mxu0 %v6598_v61  ;;  %4528 = vmatpush3.msra.mxu1 %v3832_v27 }
 0x7ed   :  { %4507 = vmatpush3.msra.mxu0 %v3741_v10  ;;  %4529 = vmatprep.subr.mxu1 %v6598_v61 }
 0x7ee   :  { %4508 = vmatprep.subr.mxu0 %v6598_v61  ;;  %4530 = vmatpush3.msra.mxu1 %v3831_v60 }
 0x7ef   :  { %4509 = vmatpush3.msra.mxu0 %v3740_v7  ;;  %4531 = vmatprep.subr.mxu1 %v6598_v61 }
 0x7f0   :  { %4510 = vmatprep.subr.mxu0 %v6598_v61  ;;  %4532 = vmatpush3.msra.mxu1 %v3830_v30 }
 0x7f1   :  { %4511 = vmatpush3.msra.mxu0 %v3739_v45  ;;  %4533 = vmatprep.subr.mxu1 %v6598_v61 }
 0x7f2   :  { %4548 = vmatprep.subr.mxu0 %v6598_v61  ;;  %4534 = vmatpush3.msra.mxu1 %v3829_v33 }
 0x7f3   :  { %4535 = vmatprep.subr.mxu1 %v6598_v61 }
 0x7f4   :  { %4536 = vmatpush3.msra.mxu1 %v3828_v3 }
 0x7f5   :  { %4537 = vmatprep.subr.mxu1 %v6598_v61 }
 0x7f6   :  { %4538 = vmatpush3.msra.mxu1 %v3827_v18 }
 0x7f7   :  { %4539 = vmatprep.subr.mxu1 %v6598_v61 }
 0x7f8   :  { %4540 = vmatpush3.msra.mxu1 %v3826_v31 }
 0x7f9   :  { %4541 = vmatprep.subr.mxu1 %v6598_v61 }
 0x7fa   :  { %4542 = vmatpush3.msra.mxu1 %v3825_v57 }
 0x7fb   :  { %4543 = vmatprep.subr.mxu1 %v6598_v61 }
 0x7fc   :  { %4544 = vmatpush3.msra.mxu1 %v3824_v37 }
 0x899   :  { %v3498_v23 = vpop.f32.mrf.mxu0 }
 0x89a   :  { %v3502_v41 = vadd.f32 %v3498_v23, %v6435_v55 }
 0x89b   :  { %v4454_v40 = vpop.f32.mrf.mxu0 }
 0x89d   :  { %v3658_v34 = vpop.f32.mrf.mxu1  ;;  %v3734_v6 = vpop.f32.mrf.mxu0 }
 0x89e   :  { %v3662_v5 = vadd.f32 %v3658_v34, %v3502_v41  ;;  %4513 = vmatmul.mubr.msk.f32.vlgmr.msra.gmra.mxu0 %vm3109_vm10, %v3734_v6 }
 0x89f   :  { %v4491_v11 = vpop.f32.mrf.mxu0  ;;  %v4484_v48 = vpop.f32.mrf.mxu1  ;;  %4570 = vmatprep.mubr.msk.f32.mxu0 %vm4815_vm7, %v6598_v61  ;;  %4549 = vmatpush3.msk.msra.mxu0 %vm1803_vm3, %v3931_v39 }
 0x8a0   :  { %4550 = vmatprep.subr.mxu0 %v6598_v61 }
 0x8a1   :  { %4551 = vmatpush3.msra.mxu0 %v3930_v58 }
 0x8a2   :  { %4552 = vmatprep.subr.mxu0 %v6598_v61 }
 0x8a3   :  { %4553 = vmatpush3.msra.mxu0 %v3929_v13 }
 0x8a4   :  { %4554 = vmatprep.subr.mxu0 %v6598_v61 }
 0x8a5   :  { %4555 = vmatpush3.msra.mxu0 %v3928_v44 }
 0x8a6   :  { %4556 = vmatprep.subr.mxu0 %v6598_v61 }
 0x8a7   :  { %4557 = vmatpush3.msra.mxu0 %v3927_v19 }
 0x8a8   :  { %4558 = vmatprep.subr.mxu0 %v6598_v61 }
 0x8a9   :  { %4559 = vmatpush3.msra.mxu0 %v3926_v54 }
 0x8aa   :  { %4560 = vmatprep.subr.mxu0 %v6598_v61 }
 0x8ab   :  { %4561 = vmatpush3.msra.mxu0 %v3925_v1 }
 0x8ac   :  { %4562 = vmatprep.subr.mxu0 %v6598_v61 }
 0x8ad   :  { %4563 = vmatpush3.msra.mxu0 %v3924_v21 }
 0x8ae   :  { %4564 = vmatprep.subr.mxu0 %v6598_v61 }
 0x8af   :  { %4565 = vmatpush3.msra.mxu0 %v3923_v63 }
 0x8b0   :  { %4566 = vmatprep.subr.mxu0 %v6598_v61 }
 0x8b1   :  { %4567 = vmatpush3.msra.mxu0 %v3922_v52 }
 0x8b2   :  { %4568 = vmatprep.subr.mxu0 %v6598_v61 }
 0x8b3   :  { %4569 = vmatpush3.msra.mxu0 %v3921_v49 }
 0x95e   :  { %v3818_v51 = vpop.f32.mrf.mxu0 }
 0x95f   :  { %v3822_v47 = vadd.f32 %v3818_v51, %v3662_v5 }
 0x960   :  { %v4514_v29 = vpop.f32.mrf.mxu0 }
 0x961   :  { %v3823_v62 = vmax.f32 %v3822_v47, 0.0 }
 0x963   :  { %4546 = vmatmul.mubr.msk.f32.vlgmr.msra.gmra.mxu1 %vm3846_vm11, %v3823_v62 }
 0xa23   :  { %v3916_v16 = vpop.f32.mrf.mxu1 }
 0xa24   :  { %v3917_v2 = vadd.f32 %v4262_v35, %v3916_v16 }
 0xa25   :  { %v4547_v46 = vpop.f32.mrf.mxu1 }
 0xa26   :  { %v3920_v14 = vmax.f32 %v3917_v2, 0.0 }
 0xa28   :  { %4571 = vmatmul.mubr.msk.f32.vlgmr.msra.gmra.mxu0 %vm1748_vm4, %v3920_v14 }
 0xae8   :  { %v4011_v12 = vpop.f32.mrf.mxu0 }
 0xae9   :  { %v4012_v61 = vadd.f32 %v4264_v26, %v4011_v12 }
 0xaea   :  { %v4572_v53 = vpop.f32.mrf.mxu0 }
 0xaeb   :  { %4016 = vst.msk [vmem:[#allocation18] sm:$0x3] %vm4015_vm12, %v4012_v61 }
 0xaec   :  { %4780 = shalt.err (!%p4777_p7)
}
 0xaed   :  { %4026 = dma.vmem_to_hbm [thread:$0]  %s4024_s23, 32, %s6519_s16, [#allocation5]  }
 0xaee   :  { %4799 = dma.done.wait [#allocation5], 32  }
 0xaef   :  { %4800 = vsyncadd [#allocation5], 4294967264 }
 0xaf0   :  { %4030 = vsyncpa [#allocation4], 1 }
 0xaf1   :  { %4031 = vsyncpa [#allocation7], 1 }
 0xaf2   :  { %4032 = vsyncpa [#allocation10], 1 }
 0xaf3   :  { %4033 = vsyncpa [#allocation13], 1 }
 0xaf4   :  { %4034 = vsyncpa [#allocation16], 1 }
 0xaf5   :  { %4035 = vsyncpa [#allocation5], 1 }

</bundles_post_ra>
